<compile_context>
chip_gen: v7x
topology: tpu7x:2x2x1
jax: 0.10.0
libtpu: 0.0.40
codegen_flags: <defaults>
</compile_context>

<pallas_src>
import functools

import jax
import jax.numpy as jnp
from jax import lax
from jax.experimental import pallas as pl
from jax.experimental.pallas import tpu as pltpu

NEG_INF = -1e30
MXU_DTYPE = jnp.bfloat16   # bf16 MXU path on v5e/v6e/v7x; accumulation stays f32.


# ----------------------------------------------------------------------------
# Single fused forward kernel
# ----------------------------------------------------------------------------
def _fused_forward_kernel(
        x_ref, edge_ref, src_col_ref, dst_col_ref, dst_row_ref,
        bat_col_ref, bat_row_ref,
        proj_w_ref, proj_b_ref,
        w_node_ref, w_edge_ref, w_att_ref, w_att_e_ref, w_scale_ref, mp_bias_ref,
        w_lstm_ref, b_lstm_ref,
        w1_ref, b1_ref, gamma_ref, beta_ref, w2_ref, b2_ref,
        o_ref, *, set2set_steps):
    f32 = jnp.float32
    n = x_ref.shape[0]
    e_cnt = edge_ref.shape[0]
    nb = o_ref.shape[0]
    hidden = proj_w_ref.shape[1]
    layers = w_node_ref.shape[0]

    def mxdot(a, b):
        # bf16 MXU operands, f32 accumulation.
        return jnp.dot(a.astype(MXU_DTYPE), b.astype(MXU_DTYPE),
                       preferred_element_type=f32)

    def onehot(mask):
        # exact in bf16; keep a bool mask for the f32 softmax path.
        return jnp.where(mask, 1.0, 0.0).astype(MXU_DTYPE)

    # --- graph structure built in-register from int index vectors (no HBM one-hot) ---
    lane_n = lax.broadcasted_iota(jnp.int32, (e_cnt, n), 1)        # [E, N]
    g_src_b = src_col_ref[...] == lane_n                           # [E, N] bool
    g_dst_b = dst_col_ref[...] == lane_n                           # [E, N] bool
    g_src_h = onehot(g_src_b)
    g_dst_h = onehot(g_dst_b)
    # transposed scatter matrix built directly from the [1,E] index row (no transpose op)
    g_dst_t_h = onehot(dst_row_ref[...] ==
                       lax.broadcasted_iota(jnp.int32, (n, e_cnt), 0))  # [N, E]

    # --- projection + CELU(alpha=1) ---
    y = mxdot(x_ref[...], proj_w_ref[...]) + proj_b_ref[...]
    out = jnp.where(y > 0, y, jnp.exp(jnp.minimum(y, 0.0)) - 1.0)   # [N, H] f32

    edge_attr = edge_ref[...]

    # --- triplet message-passing layers (unrolled, residual folded in) ---
    for l in range(layers):
        hw = mxdot(out, w_node_ref[l])                    # [N, H]
        ew = mxdot(edge_attr, w_edge_ref[l])              # [E, H]

        # reassociated attention logits: node-level att first, then one-hot gather
        att_n = mxdot(hw, w_att_ref[l])                   # [N, 2]  (col 0: i, col 1: j)
        att_d = mxdot(g_dst_h, att_n)                     # [E, 2]
        att_s = mxdot(g_src_h, att_n)                     # [E, 2]
        logit = att_d[:, 0:1] + att_s[:, 1:2] + mxdot(ew, w_att_e_ref[l])   # [E, 1]

        # segment softmax over edges sharing a destination node (f32, VPU/XLU only)
        max_n = jnp.max(jnp.where(g_dst_b, logit, NEG_INF), axis=0, keepdims=True)  # [1,N]
        m_e = jnp.sum(jnp.where(g_dst_b, max_n, 0.0), axis=1, keepdims=True)        # [E,1]
        p = jnp.exp(logit - m_e)                                                    # [E,1]
        den_n = jnp.sum(jnp.where(g_dst_b, p, 0.0), axis=0, keepdims=True)          # [1,N]
        den_e = jnp.sum(jnp.where(g_dst_b, den_n, 0.0), axis=1, keepdims=True)      # [E,1]
        alpha = p / (den_e + 1e-16)

        x_j = mxdot(g_src_h, hw)                          # [E, H] gather source nodes
        msg = alpha * (ew * x_j)                          # [E, H]
        aggr = mxdot(g_dst_t_h, msg)                      # [N, H] scatter-add by dst

        upd = mxdot(jnp.concatenate([aggr, hw], axis=-1), w_scale_ref[l]) + mp_bias_ref[l]
        out = out + upd                                   # residual folded in-kernel

    # --- Set2Set pooling (single-layer LSTM, unrolled processing steps) ---
    m_b = bat_col_ref[...] == lax.broadcasted_iota(jnp.int32, (n, nb), 1)     # [N,B] bool
    m_h = onehot(m_b)                                                         # [N,B]
    m_t_h = onehot(bat_row_ref[...] ==
                   lax.broadcasted_iota(jnp.int32, (nb, n), 0))               # [B,N]

    w_lstm = w_lstm_ref[...]        # [3H, 4H] (rows: q | r | h), hoisted out of loop
    b_lstm = b_lstm_ref[...]        # [1, 4H]
    x_nodes = out
    zeros = jnp.zeros((nb, hidden), dtype=f32)

    def s2s_step(_, carry):
        q, r, h, c = carry
        gates = mxdot(jnp.concatenate([q, r, h], axis=-1), w_lstm) + b_lstm   # [B,4H]
        i_g = jax.nn.sigmoid(gates[:, 0 * hidden:1 * hidden])
        f_g = jax.nn.sigmoid(gates[:, 1 * hidden:2 * hidden])
        g_g = jnp.tanh(gates[:, 2 * hidden:3 * hidden])
        o_g = jax.nn.sigmoid(gates[:, 3 * hidden:4 * hidden])
        c = f_g * c + i_g * g_g
        h = o_g * jnp.tanh(c)
        q = h                                                                 # [B, H]

        q_per_node = mxdot(m_h, q)                                            # [N, H]
        e_n = jnp.sum(x_nodes * q_per_node, axis=-1, keepdims=True)           # [N, 1]
        max_b = jnp.max(jnp.where(m_b, e_n, NEG_INF), axis=0, keepdims=True)  # [1, B]
        m_node = jnp.sum(jnp.where(m_b, max_b, 0.0), axis=1, keepdims=True)   # [N, 1]
        pe = jnp.exp(e_n - m_node)
        den_b = jnp.sum(jnp.where(m_b, pe, 0.0), axis=0, keepdims=True)       # [1, B]
        den_node = jnp.sum(jnp.where(m_b, den_b, 0.0), axis=1, keepdims=True) # [N, 1]
        a = pe / (den_node + 1e-16)
        r = mxdot(m_t_h, a * x_nodes)                                         # [B, H]
        return (q, r, h, c)

    q, r, _, _ = lax.fori_loop(0, set2set_steps, s2s_step,
                               (zeros, zeros, zeros, zeros), unroll=True)
    pooled = jnp.concatenate([q, r], axis=-1)                                 # [B, 2H]

    # --- output MLP: Linear -> LayerNorm -> ReLU -> (Dropout=id) -> Linear ---
    h1 = mxdot(pooled, w1_ref[...]) + b1_ref[...]
    mean = jnp.mean(h1, axis=-1, keepdims=True)
    var = jnp.mean((h1 - mean) ** 2, axis=-1, keepdims=True)
    h1 = (h1 - mean) * lax.rsqrt(var + 1e-5) * gamma_ref[...] + beta_ref[...]
    h1 = jnp.maximum(h1, 0.0)
    o_ref[...] = mxdot(h1, w2_ref[...]) + b2_ref[...]


# ----------------------------------------------------------------------------
# Wrapper: one pallas_call for the entire forward pass
# ----------------------------------------------------------------------------
def triplet_mpn_forward(params, x, edge_index, edge_attr, batch, num_graphs,
                        *, set2set_steps):
    src = edge_index[0].astype(jnp.int32)
    dst = edge_index[1].astype(jnp.int32)
    batch = batch.astype(jnp.int32)
    out_features = params['mlp']['w2'].shape[1]

    inputs = (x.astype(jnp.float32), edge_attr.astype(jnp.float32),
              src[:, None], dst[:, None], dst[None, :],
              batch[:, None], batch[None, :],
              params['proj_w'], params['proj_b'],
              params['w_node'], params['w_edge'], params['w_att'],
              params['w_att_e'], params['w_scale'], params['mp_bias'],
              params['w_lstm'], params['b_lstm'],
              params['mlp']['w1'], params['mlp']['b1'], params['mlp']['gamma'],
              params['mlp']['beta'], params['mlp']['w2'], params['mlp']['b2'])

    kernel = functools.partial(_fused_forward_kernel, set2set_steps=set2set_steps)
    return pl.pallas_call(
        kernel,
        out_shape=jax.ShapeDtypeStruct((num_graphs, out_features), jnp.float32),
        in_specs=[pl.BlockSpec(memory_space=pltpu.MemorySpace.VMEM)] * len(inputs),
        out_specs=pl.BlockSpec(memory_space=pltpu.MemorySpace.VMEM),
    )(*inputs)


# ----------------------------------------------------------------------------
# Parameter init (deterministic, synthetic weights; merged/stacked layouts)
# ----------------------------------------------------------------------------
def init_params(key, in_features, hidden, out_features, edge_features, layers_count):
    keys = jax.random.split(key, 8 + 8 * layers_count)
    ki = iter(keys)
    scale = 0.1

    def w(shape):
        return jax.random.normal(next(ki), shape, jnp.float32) * scale

    params = {
        'proj_w': w((in_features, hidden)),
        'proj_b': jnp.zeros((1, hidden), jnp.float32),
    }

    w_node, w_edge, w_att, w_att_e, w_scale, mp_bias = [], [], [], [], [], []
    for _ in range(layers_count):
        w_node.append(w((hidden, hidden)))
        w_edge.append(w((edge_features, hidden)))
        # merged attention weights: col 0 acts on x_i (dst), col 1 on x_j (src)
        w_att.append(jnp.concatenate([w((hidden, 1)), w((hidden, 1))], axis=1))
        w_att_e.append(w((hidden, 1)))
        # merged update weight: rows 0:H act on aggr, rows H:2H on hw
        w_scale.append(jnp.concatenate([w((hidden, hidden)), w((hidden, hidden))], axis=0))
        mp_bias.append(jnp.zeros((1, hidden), jnp.float32))
    params['w_node'] = jnp.stack(w_node)       # [L, H, H]
    params['w_edge'] = jnp.stack(w_edge)       # [L, Fe, H]
    params['w_att'] = jnp.stack(w_att)         # [L, H, 2]
    params['w_att_e'] = jnp.stack(w_att_e)     # [L, H, 1]
    params['w_scale'] = jnp.stack(w_scale)     # [L, 2H, H]
    params['mp_bias'] = jnp.stack(mp_bias)     # [L, 1, H]

    # Set2Set LSTM (num_layers=1): input 2H, hidden H, PyTorch gate order (i, f, g, o)
    w_ih = w((4 * hidden, 2 * hidden))
    w_hh = w((4 * hidden, hidden))
    b_ih = jnp.zeros((4 * hidden,), jnp.float32)
    b_hh = jnp.zeros((4 * hidden,), jnp.float32)
    # merged LSTM weight: rows 0:H act on q, H:2H on r, 2H:3H on h   -> [3H, 4H]
    params['w_lstm'] = jnp.concatenate(
        [jnp.transpose(w_ih[:, :hidden]),
         jnp.transpose(w_ih[:, hidden:]),
         jnp.transpose(w_hh)], axis=0)
    params['b_lstm'] = (b_ih + b_hh)[None, :]  # [1, 4H]

    params['mlp'] = {
        'w1': w((2 * hidden, hidden)),
        'b1': jnp.zeros((1, hidden), jnp.float32),
        'gamma': jnp.ones((1, hidden), jnp.float32),
        'beta': jnp.zeros((1, hidden), jnp.float32),
        'w2': w((hidden, out_features)),
        'b2': jnp.zeros((1, out_features), jnp.float32),
    }
    return params


if __name__ == "__main__":
    in_features, hidden_features, out_features, edge_features = 8, 32, 4, 6
    layers_count, set2set_steps = 2, 6
    N, E, B = 16, 24, 3

    key = jax.random.PRNGKey(0)
    k_param, k_x, k_e, k_src, k_dst = jax.random.split(key, 5)

    params = init_params(k_param, in_features, hidden_features, out_features,
                         edge_features, layers_count)

    x = jax.random.normal(k_x, (N, in_features), jnp.float32)
    edge_attr = jax.random.normal(k_e, (E, edge_features), jnp.float32)
    batch = jnp.array([0] * 6 + [1] * 5 + [2] * 5, dtype=jnp.int32)   # [N]
    src = jax.random.randint(k_src, (E,), 0, N, dtype=jnp.int32)
    dst = jax.random.randint(k_dst, (E,), 0, N, dtype=jnp.int32)
    edge_index = jnp.stack([src, dst], axis=0)                        # [2, E]

    fwd = jax.jit(lambda p, xx, ei, ea, bb: triplet_mpn_forward(
        p, xx, ei, ea, bb, B, set2set_steps=set2set_steps))

    out = fwd(params, x, edge_index, edge_attr, batch)
    out = jax.block_until_ready(out)
    assert out.shape == (B, out_features), out.shape
    assert jnp.all(jnp.isfinite(out))
    print("KERNEL_OK")
</pallas_src>

<mosaic_0001>
module attributes {stable_mosaic.version = 11 : i64} {
  func.func @_fused_forward_kernel(%arg0: memref<16x8xf32, #tpu.memory_space<vmem>>, %arg1: memref<24x6xf32, #tpu.memory_space<vmem>>, %arg2: memref<24x1xi32, #tpu.memory_space<vmem>>, %arg3: memref<24x1xi32, #tpu.memory_space<vmem>>, %arg4: memref<1x24xi32, #tpu.memory_space<vmem>>, %arg5: memref<16x1xi32, #tpu.memory_space<vmem>>, %arg6: memref<1x16xi32, #tpu.memory_space<vmem>>, %arg7: memref<8x32xf32, #tpu.memory_space<vmem>>, %arg8: memref<1x32xf32, #tpu.memory_space<vmem>>, %arg9: memref<2x32x32xf32, #tpu.memory_space<vmem>>, %arg10: memref<2x6x32xf32, #tpu.memory_space<vmem>>, %arg11: memref<2x32x2xf32, #tpu.memory_space<vmem>>, %arg12: memref<2x32x1xf32, #tpu.memory_space<vmem>>, %arg13: memref<2x64x32xf32, #tpu.memory_space<vmem>>, %arg14: memref<2x1x32xf32, #tpu.memory_space<vmem>>, %arg15: memref<96x128xf32, #tpu.memory_space<vmem>>, %arg16: memref<1x128xf32, #tpu.memory_space<vmem>>, %arg17: memref<64x32xf32, #tpu.memory_space<vmem>>, %arg18: memref<1x32xf32, #tpu.memory_space<vmem>>, %arg19: memref<1x32xf32, #tpu.memory_space<vmem>>, %arg20: memref<1x32xf32, #tpu.memory_space<vmem>>, %arg21: memref<32x4xf32, #tpu.memory_space<vmem>>, %arg22: memref<1x4xf32, #tpu.memory_space<vmem>>, %arg23: memref<3x4xf32, #tpu.memory_space<vmem>>) attributes {dimension_semantics = [], scalar_prefetch = 0 : i64, scratch_operands = 0 : i64, tpu.core_type = #tpu.core_type<tc>} {
    %0 = tpu.iota {dimensions = array<i32: 1>} : vector<24x16xi32>
    %c0 = arith.constant 0 : index
    %c0_0 = arith.constant 0 : index
    %1 = vector.load %arg2[%c0, %c0_0] : memref<24x1xi32, #tpu.memory_space<vmem>>, vector<24x1xi32>
    %2 = vector.broadcast %1 : vector<24x1xi32> to vector<24x16xi32>
    %3 = arith.cmpi eq, %2, %0 : vector<24x16xi32>
    %c0_1 = arith.constant 0 : index
    %c0_2 = arith.constant 0 : index
    %4 = vector.load %arg3[%c0_1, %c0_2] : memref<24x1xi32, #tpu.memory_space<vmem>>, vector<24x1xi32>
    %5 = vector.broadcast %4 : vector<24x1xi32> to vector<24x16xi32>
    %6 = arith.cmpi eq, %5, %0 : vector<24x16xi32>
    %cst = arith.constant 1.000000e+00 : f32
    %cst_3 = arith.constant 0.000000e+00 : f32
    %7 = vector.broadcast %cst : f32 to vector<24x16xf32>
    %8 = vector.broadcast %cst_3 : f32 to vector<24x16xf32>
    %9 = arith.select %3, %7, %8 : vector<24x16xi1>, vector<24x16xf32>
    %10 = arith.truncf %9 : vector<24x16xf32> to vector<24x16xbf16>
    %cst_4 = arith.constant 1.000000e+00 : f32
    %cst_5 = arith.constant 0.000000e+00 : f32
    %11 = vector.broadcast %cst_4 : f32 to vector<24x16xf32>
    %12 = vector.broadcast %cst_5 : f32 to vector<24x16xf32>
    %13 = arith.select %6, %11, %12 : vector<24x16xi1>, vector<24x16xf32>
    %14 = arith.truncf %13 : vector<24x16xf32> to vector<24x16xbf16>
    %c0_6 = arith.constant 0 : index
    %c0_7 = arith.constant 0 : index
    %15 = vector.load %arg4[%c0_6, %c0_7] : memref<1x24xi32, #tpu.memory_space<vmem>>, vector<1x24xi32>
    %16 = tpu.iota {dimensions = array<i32: 0>} : vector<16x24xi32>
    %17 = vector.broadcast %15 : vector<1x24xi32> to vector<16x24xi32>
    %18 = arith.cmpi eq, %17, %16 : vector<16x24xi32>
    %cst_8 = arith.constant 1.000000e+00 : f32
    %cst_9 = arith.constant 0.000000e+00 : f32
    %19 = vector.broadcast %cst_8 : f32 to vector<16x24xf32>
    %20 = vector.broadcast %cst_9 : f32 to vector<16x24xf32>
    %21 = arith.select %18, %19, %20 : vector<16x24xi1>, vector<16x24xf32>
    %22 = arith.truncf %21 : vector<16x24xf32> to vector<16x24xbf16>
    %c0_10 = arith.constant 0 : index
    %c0_11 = arith.constant 0 : index
    %23 = vector.load %arg0[%c0_10, %c0_11] : memref<16x8xf32, #tpu.memory_space<vmem>>, vector<16x8xf32>
    %c0_12 = arith.constant 0 : index
    %c0_13 = arith.constant 0 : index
    %24 = vector.load %arg7[%c0_12, %c0_13] : memref<8x32xf32, #tpu.memory_space<vmem>>, vector<8x32xf32>
    %25 = arith.truncf %23 : vector<16x8xf32> to vector<16x8xbf16>
    %26 = arith.truncf %24 : vector<8x32xf32> to vector<8x32xbf16>
    %cst_14 = arith.constant dense<0.000000e+00> : vector<16x32xf32>
    %27 = tpu.matmul %25, %26, %cst_14 {dimension_numbers = #tpu.dot_dimension_numbers<[1], [0], [0], [1], [0, 0, 1, 1], [], []>} : vector<16x8xbf16>, vector<8x32xbf16>, vector<16x32xf32> -> vector<16x32xf32>
    %c0_15 = arith.constant 0 : index
    %c0_16 = arith.constant 0 : index
    %28 = vector.load %arg8[%c0_15, %c0_16] : memref<1x32xf32, #tpu.memory_space<vmem>>, vector<1x32xf32>
    %29 = vector.broadcast %28 : vector<1x32xf32> to vector<16x32xf32>
    %30 = arith.addf %27, %29 : vector<16x32xf32>
    %cst_17 = arith.constant 0.000000e+00 : f32
    %31 = vector.broadcast %cst_17 : f32 to vector<16x32xf32>
    %32 = arith.cmpf ogt, %30, %31 : vector<16x32xf32>
    %cst_18 = arith.constant 0.000000e+00 : f32
    %33 = vector.broadcast %cst_18 : f32 to vector<16x32xf32>
    %34 = arith.minimumf %30, %33 : vector<16x32xf32>
    %35 = math.exp %34 : vector<16x32xf32>
    %cst_19 = arith.constant 1.000000e+00 : f32
    %36 = vector.broadcast %cst_19 : f32 to vector<16x32xf32>
    %37 = arith.subf %35, %36 : vector<16x32xf32>
    %38 = arith.select %32, %30, %37 : vector<16x32xi1>, vector<16x32xf32>
    %c0_20 = arith.constant 0 : index
    %c0_21 = arith.constant 0 : index
    %39 = vector.load %arg1[%c0_20, %c0_21] : memref<24x6xf32, #tpu.memory_space<vmem>>, vector<24x6xf32>
    %c0_22 = arith.constant 0 : index
    %c0_23 = arith.constant 0 : index
    %c0_24 = arith.constant 0 : index
    %40 = vector.load %arg9[%c0_22, %c0_23, %c0_24] : memref<2x32x32xf32, #tpu.memory_space<vmem>>, vector<1x32x32xf32>
    %41 = vector.shape_cast %40 : vector<1x32x32xf32> to vector<32x32xf32>
    %42 = arith.truncf %38 : vector<16x32xf32> to vector<16x32xbf16>
    %43 = arith.truncf %41 : vector<32x32xf32> to vector<32x32xbf16>
    %cst_25 = arith.constant dense<0.000000e+00> : vector<16x32xf32>
    %44 = tpu.matmul %42, %43, %cst_25 {dimension_numbers = #tpu.dot_dimension_numbers<[1], [0], [0], [1], [0, 0, 1, 1], [], []>} : vector<16x32xbf16>, vector<32x32xbf16>, vector<16x32xf32> -> vector<16x32xf32>
    %c0_26 = arith.constant 0 : index
    %c0_27 = arith.constant 0 : index
    %c0_28 = arith.constant 0 : index
    %45 = vector.load %arg10[%c0_26, %c0_27, %c0_28] : memref<2x6x32xf32, #tpu.memory_space<vmem>>, vector<1x6x32xf32>
    %46 = vector.shape_cast %45 : vector<1x6x32xf32> to vector<6x32xf32>
    %47 = arith.truncf %39 : vector<24x6xf32> to vector<24x6xbf16>
    %48 = arith.truncf %46 : vector<6x32xf32> to vector<6x32xbf16>
    %cst_29 = arith.constant dense<0.000000e+00> : vector<24x32xf32>
    %49 = tpu.matmul %47, %48, %cst_29 {dimension_numbers = #tpu.dot_dimension_numbers<[1], [0], [0], [1], [0, 0, 1, 1], [], []>} : vector<24x6xbf16>, vector<6x32xbf16>, vector<24x32xf32> -> vector<24x32xf32>
    %c0_30 = arith.constant 0 : index
    %c0_31 = arith.constant 0 : index
    %c0_32 = arith.constant 0 : index
    %50 = vector.load %arg11[%c0_30, %c0_31, %c0_32] : memref<2x32x2xf32, #tpu.memory_space<vmem>>, vector<1x32x2xf32>
    %51 = vector.shape_cast %50 : vector<1x32x2xf32> to vector<32x2xf32>
    %52 = arith.truncf %44 : vector<16x32xf32> to vector<16x32xbf16>
    %53 = arith.truncf %51 : vector<32x2xf32> to vector<32x2xbf16>
    %cst_33 = arith.constant dense<0.000000e+00> : vector<16x2xf32>
    %54 = tpu.matmul %52, %53, %cst_33 {dimension_numbers = #tpu.dot_dimension_numbers<[1], [0], [0], [1], [0, 0, 1, 1], [], []>} : vector<16x32xbf16>, vector<32x2xbf16>, vector<16x2xf32> -> vector<16x2xf32>
    %55 = arith.truncf %54 : vector<16x2xf32> to vector<16x2xbf16>
    %cst_34 = arith.constant dense<0.000000e+00> : vector<24x2xf32>
    %56 = tpu.matmul %14, %55, %cst_34 {dimension_numbers = #tpu.dot_dimension_numbers<[1], [0], [0], [1], [0, 0, 1, 1], [], []>} : vector<24x16xbf16>, vector<16x2xbf16>, vector<24x2xf32> -> vector<24x2xf32>
    %57 = arith.truncf %54 : vector<16x2xf32> to vector<16x2xbf16>
    %cst_35 = arith.constant dense<0.000000e+00> : vector<24x2xf32>
    %58 = tpu.matmul %10, %57, %cst_35 {dimension_numbers = #tpu.dot_dimension_numbers<[1], [0], [0], [1], [0, 0, 1, 1], [], []>} : vector<24x16xbf16>, vector<16x2xbf16>, vector<24x2xf32> -> vector<24x2xf32>
    %59 = vector.extract_strided_slice %56 {offsets = [0, 0], sizes = [24, 1], strides = [1, 1]} : vector<24x2xf32> to vector<24x1xf32>
    %60 = vector.extract_strided_slice %58 {offsets = [0, 1], sizes = [24, 1], strides = [1, 1]} : vector<24x2xf32> to vector<24x1xf32>
    %61 = arith.addf %59, %60 : vector<24x1xf32>
    %c0_36 = arith.constant 0 : index
    %c0_37 = arith.constant 0 : index
    %c0_38 = arith.constant 0 : index
    %62 = vector.load %arg12[%c0_36, %c0_37, %c0_38] : memref<2x32x1xf32, #tpu.memory_space<vmem>>, vector<1x32x1xf32>
    %63 = vector.shape_cast %62 : vector<1x32x1xf32> to vector<32x1xf32>
    %64 = arith.truncf %49 : vector<24x32xf32> to vector<24x32xbf16>
    %65 = arith.truncf %63 : vector<32x1xf32> to vector<32x1xbf16>
    %cst_39 = arith.constant dense<0.000000e+00> : vector<24x1xf32>
    %66 = tpu.matmul %64, %65, %cst_39 {dimension_numbers = #tpu.dot_dimension_numbers<[1], [0], [0], [1], [0, 0, 1, 1], [], []>} : vector<24x32xbf16>, vector<32x1xbf16>, vector<24x1xf32> -> vector<24x1xf32>
    %67 = arith.addf %61, %66 : vector<24x1xf32>
    %cst_40 = arith.constant -1.000000e+30 : f32
    %68 = vector.shape_cast %67 : vector<24x1xf32> to vector<24x1xf32>
    %69 = vector.broadcast %68 : vector<24x1xf32> to vector<24x16xf32>
    %70 = vector.broadcast %cst_40 : f32 to vector<24x16xf32>
    %71 = arith.select %6, %69, %70 : vector<24x16xi1>, vector<24x16xf32>
    %cst_41 = arith.constant dense<0xFF800000> : vector<16xf32>
    %72 = vector.multi_reduction <maximumf>, %71, %cst_41 [0] : vector<24x16xf32> to vector<16xf32>
    %73 = vector.shape_cast %72 : vector<16xf32> to vector<1x16xf32>
    %cst_42 = arith.constant 0.000000e+00 : f32
    %74 = vector.shape_cast %73 : vector<1x16xf32> to vector<1x16xf32>
    %75 = vector.broadcast %74 : vector<1x16xf32> to vector<24x16xf32>
    %76 = vector.broadcast %cst_42 : f32 to vector<24x16xf32>
    %77 = arith.select %6, %75, %76 : vector<24x16xi1>, vector<24x16xf32>
    %cst_43 = arith.constant dense<0.000000e+00> : vector<24xf32>
    %78 = vector.multi_reduction <add>, %77, %cst_43 [1] : vector<24x16xf32> to vector<24xf32>
    %79 = vector.shape_cast %78 : vector<24xf32> to vector<24x1xf32>
    %80 = arith.subf %67, %79 : vector<24x1xf32>
    %81 = math.exp %80 : vector<24x1xf32>
    %cst_44 = arith.constant 0.000000e+00 : f32
    %82 = vector.shape_cast %81 : vector<24x1xf32> to vector<24x1xf32>
    %83 = vector.broadcast %82 : vector<24x1xf32> to vector<24x16xf32>
    %84 = vector.broadcast %cst_44 : f32 to vector<24x16xf32>
    %85 = arith.select %6, %83, %84 : vector<24x16xi1>, vector<24x16xf32>
    %cst_45 = arith.constant dense<0.000000e+00> : vector<16xf32>
    %86 = vector.multi_reduction <add>, %85, %cst_45 [0] : vector<24x16xf32> to vector<16xf32>
    %87 = vector.shape_cast %86 : vector<16xf32> to vector<1x16xf32>
    %cst_46 = arith.constant 0.000000e+00 : f32
    %88 = vector.shape_cast %87 : vector<1x16xf32> to vector<1x16xf32>
    %89 = vector.broadcast %88 : vector<1x16xf32> to vector<24x16xf32>
    %90 = vector.broadcast %cst_46 : f32 to vector<24x16xf32>
    %91 = arith.select %6, %89, %90 : vector<24x16xi1>, vector<24x16xf32>
    %cst_47 = arith.constant dense<0.000000e+00> : vector<24xf32>
    %92 = vector.multi_reduction <add>, %91, %cst_47 [1] : vector<24x16xf32> to vector<24xf32>
    %93 = vector.shape_cast %92 : vector<24xf32> to vector<24x1xf32>
    %cst_48 = arith.constant 1.000000e-16 : f32
    %94 = vector.broadcast %cst_48 : f32 to vector<24x1xf32>
    %95 = arith.addf %93, %94 : vector<24x1xf32>
    %96 = arith.divf %81, %95 : vector<24x1xf32>
    %97 = arith.truncf %44 : vector<16x32xf32> to vector<16x32xbf16>
    %cst_49 = arith.constant dense<0.000000e+00> : vector<24x32xf32>
    %98 = tpu.matmul %10, %97, %cst_49 {dimension_numbers = #tpu.dot_dimension_numbers<[1], [0], [0], [1], [0, 0, 1, 1], [], []>} : vector<24x16xbf16>, vector<16x32xbf16>, vector<24x32xf32> -> vector<24x32xf32>
    %99 = arith.mulf %49, %98 : vector<24x32xf32>
    %100 = vector.broadcast %96 : vector<24x1xf32> to vector<24x32xf32>
    %101 = arith.mulf %100, %99 : vector<24x32xf32>
    %102 = arith.truncf %101 : vector<24x32xf32> to vector<24x32xbf16>
    %cst_50 = arith.constant dense<0.000000e+00> : vector<16x32xf32>
    %103 = tpu.matmul %22, %102, %cst_50 {dimension_numbers = #tpu.dot_dimension_numbers<[1], [0], [0], [1], [0, 0, 1, 1], [], []>} : vector<16x24xbf16>, vector<24x32xbf16>, vector<16x32xf32> -> vector<16x32xf32>
    %104 = tpu.concatenate %103, %44 in 1 : vector<16x32xf32>, vector<16x32xf32> -> vector<16x64xf32>
    %c0_51 = arith.constant 0 : index
    %c0_52 = arith.constant 0 : index
    %c0_53 = arith.constant 0 : index
    %105 = vector.load %arg13[%c0_51, %c0_52, %c0_53] : memref<2x64x32xf32, #tpu.memory_space<vmem>>, vector<1x64x32xf32>
    %106 = vector.shape_cast %105 : vector<1x64x32xf32> to vector<64x32xf32>
    %107 = arith.truncf %104 : vector<16x64xf32> to vector<16x64xbf16>
    %108 = arith.truncf %106 : vector<64x32xf32> to vector<64x32xbf16>
    %cst_54 = arith.constant dense<0.000000e+00> : vector<16x32xf32>
    %109 = tpu.matmul %107, %108, %cst_54 {dimension_numbers = #tpu.dot_dimension_numbers<[1], [0], [0], [1], [0, 0, 1, 1], [], []>} : vector<16x64xbf16>, vector<64x32xbf16>, vector<16x32xf32> -> vector<16x32xf32>
    %c0_55 = arith.constant 0 : index
    %c0_56 = arith.constant 0 : index
    %c0_57 = arith.constant 0 : index
    %110 = vector.load %arg14[%c0_55, %c0_56, %c0_57] : memref<2x1x32xf32, #tpu.memory_space<vmem>>, vector<1x1x32xf32>
    %111 = vector.shape_cast %110 : vector<1x1x32xf32> to vector<1x32xf32>
    %112 = vector.broadcast %111 : vector<1x32xf32> to vector<16x32xf32>
    %113 = arith.addf %109, %112 : vector<16x32xf32>
    %114 = arith.addf %38, %113 : vector<16x32xf32>
    %c1 = arith.constant 1 : index
    %c0_58 = arith.constant 0 : index
    %c0_59 = arith.constant 0 : index
    %115 = vector.load %arg9[%c1, %c0_58, %c0_59] : memref<2x32x32xf32, #tpu.memory_space<vmem>>, vector<1x32x32xf32>
    %116 = vector.shape_cast %115 : vector<1x32x32xf32> to vector<32x32xf32>
    %117 = arith.truncf %114 : vector<16x32xf32> to vector<16x32xbf16>
    %118 = arith.truncf %116 : vector<32x32xf32> to vector<32x32xbf16>
    %cst_60 = arith.constant dense<0.000000e+00> : vector<16x32xf32>
    %119 = tpu.matmul %117, %118, %cst_60 {dimension_numbers = #tpu.dot_dimension_numbers<[1], [0], [0], [1], [0, 0, 1, 1], [], []>} : vector<16x32xbf16>, vector<32x32xbf16>, vector<16x32xf32> -> vector<16x32xf32>
    %c1_61 = arith.constant 1 : index
    %c0_62 = arith.constant 0 : index
    %c0_63 = arith.constant 0 : index
    %120 = vector.load %arg10[%c1_61, %c0_62, %c0_63] : memref<2x6x32xf32, #tpu.memory_space<vmem>>, vector<1x6x32xf32>
    %121 = vector.shape_cast %120 : vector<1x6x32xf32> to vector<6x32xf32>
    %122 = arith.truncf %39 : vector<24x6xf32> to vector<24x6xbf16>
    %123 = arith.truncf %121 : vector<6x32xf32> to vector<6x32xbf16>
    %cst_64 = arith.constant dense<0.000000e+00> : vector<24x32xf32>
    %124 = tpu.matmul %122, %123, %cst_64 {dimension_numbers = #tpu.dot_dimension_numbers<[1], [0], [0], [1], [0, 0, 1, 1], [], []>} : vector<24x6xbf16>, vector<6x32xbf16>, vector<24x32xf32> -> vector<24x32xf32>
    %c1_65 = arith.constant 1 : index
    %c0_66 = arith.constant 0 : index
    %c0_67 = arith.constant 0 : index
    %125 = vector.load %arg11[%c1_65, %c0_66, %c0_67] : memref<2x32x2xf32, #tpu.memory_space<vmem>>, vector<1x32x2xf32>
    %126 = vector.shape_cast %125 : vector<1x32x2xf32> to vector<32x2xf32>
    %127 = arith.truncf %119 : vector<16x32xf32> to vector<16x32xbf16>
    %128 = arith.truncf %126 : vector<32x2xf32> to vector<32x2xbf16>
    %cst_68 = arith.constant dense<0.000000e+00> : vector<16x2xf32>
    %129 = tpu.matmul %127, %128, %cst_68 {dimension_numbers = #tpu.dot_dimension_numbers<[1], [0], [0], [1], [0, 0, 1, 1], [], []>} : vector<16x32xbf16>, vector<32x2xbf16>, vector<16x2xf32> -> vector<16x2xf32>
    %130 = arith.truncf %129 : vector<16x2xf32> to vector<16x2xbf16>
    %cst_69 = arith.constant dense<0.000000e+00> : vector<24x2xf32>
    %131 = tpu.matmul %14, %130, %cst_69 {dimension_numbers = #tpu.dot_dimension_numbers<[1], [0], [0], [1], [0, 0, 1, 1], [], []>} : vector<24x16xbf16>, vector<16x2xbf16>, vector<24x2xf32> -> vector<24x2xf32>
    %132 = arith.truncf %129 : vector<16x2xf32> to vector<16x2xbf16>
    %cst_70 = arith.constant dense<0.000000e+00> : vector<24x2xf32>
    %133 = tpu.matmul %10, %132, %cst_70 {dimension_numbers = #tpu.dot_dimension_numbers<[1], [0], [0], [1], [0, 0, 1, 1], [], []>} : vector<24x16xbf16>, vector<16x2xbf16>, vector<24x2xf32> -> vector<24x2xf32>
    %134 = vector.extract_strided_slice %131 {offsets = [0, 0], sizes = [24, 1], strides = [1, 1]} : vector<24x2xf32> to vector<24x1xf32>
    %135 = vector.extract_strided_slice %133 {offsets = [0, 1], sizes = [24, 1], strides = [1, 1]} : vector<24x2xf32> to vector<24x1xf32>
    %136 = arith.addf %134, %135 : vector<24x1xf32>
    %c1_71 = arith.constant 1 : index
    %c0_72 = arith.constant 0 : index
    %c0_73 = arith.constant 0 : index
    %137 = vector.load %arg12[%c1_71, %c0_72, %c0_73] : memref<2x32x1xf32, #tpu.memory_space<vmem>>, vector<1x32x1xf32>
    %138 = vector.shape_cast %137 : vector<1x32x1xf32> to vector<32x1xf32>
    %139 = arith.truncf %124 : vector<24x32xf32> to vector<24x32xbf16>
    %140 = arith.truncf %138 : vector<32x1xf32> to vector<32x1xbf16>
    %cst_74 = arith.constant dense<0.000000e+00> : vector<24x1xf32>
    %141 = tpu.matmul %139, %140, %cst_74 {dimension_numbers = #tpu.dot_dimension_numbers<[1], [0], [0], [1], [0, 0, 1, 1], [], []>} : vector<24x32xbf16>, vector<32x1xbf16>, vector<24x1xf32> -> vector<24x1xf32>
    %142 = arith.addf %136, %141 : vector<24x1xf32>
    %cst_75 = arith.constant -1.000000e+30 : f32
    %143 = vector.shape_cast %142 : vector<24x1xf32> to vector<24x1xf32>
    %144 = vector.broadcast %143 : vector<24x1xf32> to vector<24x16xf32>
    %145 = vector.broadcast %cst_75 : f32 to vector<24x16xf32>
    %146 = arith.select %6, %144, %145 : vector<24x16xi1>, vector<24x16xf32>
    %cst_76 = arith.constant dense<0xFF800000> : vector<16xf32>
    %147 = vector.multi_reduction <maximumf>, %146, %cst_76 [0] : vector<24x16xf32> to vector<16xf32>
    %148 = vector.shape_cast %147 : vector<16xf32> to vector<1x16xf32>
    %cst_77 = arith.constant 0.000000e+00 : f32
    %149 = vector.shape_cast %148 : vector<1x16xf32> to vector<1x16xf32>
    %150 = vector.broadcast %149 : vector<1x16xf32> to vector<24x16xf32>
    %151 = vector.broadcast %cst_77 : f32 to vector<24x16xf32>
    %152 = arith.select %6, %150, %151 : vector<24x16xi1>, vector<24x16xf32>
    %cst_78 = arith.constant dense<0.000000e+00> : vector<24xf32>
    %153 = vector.multi_reduction <add>, %152, %cst_78 [1] : vector<24x16xf32> to vector<24xf32>
    %154 = vector.shape_cast %153 : vector<24xf32> to vector<24x1xf32>
    %155 = arith.subf %142, %154 : vector<24x1xf32>
    %156 = math.exp %155 : vector<24x1xf32>
    %cst_79 = arith.constant 0.000000e+00 : f32
    %157 = vector.shape_cast %156 : vector<24x1xf32> to vector<24x1xf32>
    %158 = vector.broadcast %157 : vector<24x1xf32> to vector<24x16xf32>
    %159 = vector.broadcast %cst_79 : f32 to vector<24x16xf32>
    %160 = arith.select %6, %158, %159 : vector<24x16xi1>, vector<24x16xf32>
    %cst_80 = arith.constant dense<0.000000e+00> : vector<16xf32>
    %161 = vector.multi_reduction <add>, %160, %cst_80 [0] : vector<24x16xf32> to vector<16xf32>
    %162 = vector.shape_cast %161 : vector<16xf32> to vector<1x16xf32>
    %cst_81 = arith.constant 0.000000e+00 : f32
    %163 = vector.shape_cast %162 : vector<1x16xf32> to vector<1x16xf32>
    %164 = vector.broadcast %163 : vector<1x16xf32> to vector<24x16xf32>
    %165 = vector.broadcast %cst_81 : f32 to vector<24x16xf32>
    %166 = arith.select %6, %164, %165 : vector<24x16xi1>, vector<24x16xf32>
    %cst_82 = arith.constant dense<0.000000e+00> : vector<24xf32>
    %167 = vector.multi_reduction <add>, %166, %cst_82 [1] : vector<24x16xf32> to vector<24xf32>
    %168 = vector.shape_cast %167 : vector<24xf32> to vector<24x1xf32>
    %cst_83 = arith.constant 1.000000e-16 : f32
    %169 = vector.broadcast %cst_83 : f32 to vector<24x1xf32>
    %170 = arith.addf %168, %169 : vector<24x1xf32>
    %171 = arith.divf %156, %170 : vector<24x1xf32>
    %172 = arith.truncf %119 : vector<16x32xf32> to vector<16x32xbf16>
    %cst_84 = arith.constant dense<0.000000e+00> : vector<24x32xf32>
    %173 = tpu.matmul %10, %172, %cst_84 {dimension_numbers = #tpu.dot_dimension_numbers<[1], [0], [0], [1], [0, 0, 1, 1], [], []>} : vector<24x16xbf16>, vector<16x32xbf16>, vector<24x32xf32> -> vector<24x32xf32>
    %174 = arith.mulf %124, %173 : vector<24x32xf32>
    %175 = vector.broadcast %171 : vector<24x1xf32> to vector<24x32xf32>
    %176 = arith.mulf %175, %174 : vector<24x32xf32>
    %177 = arith.truncf %176 : vector<24x32xf32> to vector<24x32xbf16>
    %cst_85 = arith.constant dense<0.000000e+00> : vector<16x32xf32>
    %178 = tpu.matmul %22, %177, %cst_85 {dimension_numbers = #tpu.dot_dimension_numbers<[1], [0], [0], [1], [0, 0, 1, 1], [], []>} : vector<16x24xbf16>, vector<24x32xbf16>, vector<16x32xf32> -> vector<16x32xf32>
    %179 = tpu.concatenate %178, %119 in 1 : vector<16x32xf32>, vector<16x32xf32> -> vector<16x64xf32>
    %c1_86 = arith.constant 1 : index
    %c0_87 = arith.constant 0 : index
    %c0_88 = arith.constant 0 : index
    %180 = vector.load %arg13[%c1_86, %c0_87, %c0_88] : memref<2x64x32xf32, #tpu.memory_space<vmem>>, vector<1x64x32xf32>
    %181 = vector.shape_cast %180 : vector<1x64x32xf32> to vector<64x32xf32>
    %182 = arith.truncf %179 : vector<16x64xf32> to vector<16x64xbf16>
    %183 = arith.truncf %181 : vector<64x32xf32> to vector<64x32xbf16>
    %cst_89 = arith.constant dense<0.000000e+00> : vector<16x32xf32>
    %184 = tpu.matmul %182, %183, %cst_89 {dimension_numbers = #tpu.dot_dimension_numbers<[1], [0], [0], [1], [0, 0, 1, 1], [], []>} : vector<16x64xbf16>, vector<64x32xbf16>, vector<16x32xf32> -> vector<16x32xf32>
    %c1_90 = arith.constant 1 : index
    %c0_91 = arith.constant 0 : index
    %c0_92 = arith.constant 0 : index
    %185 = vector.load %arg14[%c1_90, %c0_91, %c0_92] : memref<2x1x32xf32, #tpu.memory_space<vmem>>, vector<1x1x32xf32>
    %186 = vector.shape_cast %185 : vector<1x1x32xf32> to vector<1x32xf32>
    %187 = vector.broadcast %186 : vector<1x32xf32> to vector<16x32xf32>
    %188 = arith.addf %184, %187 : vector<16x32xf32>
    %189 = arith.addf %114, %188 : vector<16x32xf32>
    %c0_93 = arith.constant 0 : index
    %c0_94 = arith.constant 0 : index
    %190 = vector.load %arg5[%c0_93, %c0_94] : memref<16x1xi32, #tpu.memory_space<vmem>>, vector<16x1xi32>
    %191 = tpu.iota {dimensions = array<i32: 1>} : vector<16x3xi32>
    %192 = vector.broadcast %190 : vector<16x1xi32> to vector<16x3xi32>
    %193 = arith.cmpi eq, %192, %191 : vector<16x3xi32>
    %cst_95 = arith.constant 1.000000e+00 : f32
    %cst_96 = arith.constant 0.000000e+00 : f32
    %194 = vector.broadcast %cst_95 : f32 to vector<16x3xf32>
    %195 = vector.broadcast %cst_96 : f32 to vector<16x3xf32>
    %196 = arith.select %193, %194, %195 : vector<16x3xi1>, vector<16x3xf32>
    %197 = arith.truncf %196 : vector<16x3xf32> to vector<16x3xbf16>
    %c0_97 = arith.constant 0 : index
    %c0_98 = arith.constant 0 : index
    %198 = vector.load %arg6[%c0_97, %c0_98] : memref<1x16xi32, #tpu.memory_space<vmem>>, vector<1x16xi32>
    %199 = tpu.iota {dimensions = array<i32: 0>} : vector<3x16xi32>
    %200 = vector.broadcast %198 : vector<1x16xi32> to vector<3x16xi32>
    %201 = arith.cmpi eq, %200, %199 : vector<3x16xi32>
    %cst_99 = arith.constant 1.000000e+00 : f32
    %cst_100 = arith.constant 0.000000e+00 : f32
    %202 = vector.broadcast %cst_99 : f32 to vector<3x16xf32>
    %203 = vector.broadcast %cst_100 : f32 to vector<3x16xf32>
    %204 = arith.select %201, %202, %203 : vector<3x16xi1>, vector<3x16xf32>
    %205 = arith.truncf %204 : vector<3x16xf32> to vector<3x16xbf16>
    %c0_101 = arith.constant 0 : index
    %c0_102 = arith.constant 0 : index
    %206 = vector.load %arg15[%c0_101, %c0_102] : memref<96x128xf32, #tpu.memory_space<vmem>>, vector<96x128xf32>
    %c0_103 = arith.constant 0 : index
    %c0_104 = arith.constant 0 : index
    %207 = vector.load %arg16[%c0_103, %c0_104] : memref<1x128xf32, #tpu.memory_space<vmem>>, vector<1x128xf32>
    %cst_105 = arith.constant 0.000000e+00 : f32
    %208 = vector.broadcast %cst_105 : f32 to vector<3x32xf32>
    %c0_i32 = arith.constant 0 : i32
    %209 = tpu.concatenate %208, %208, %208 in 1 : vector<3x32xf32>, vector<3x32xf32>, vector<3x32xf32> -> vector<3x96xf32>
    %210 = arith.truncf %209 : vector<3x96xf32> to vector<3x96xbf16>
    %211 = arith.truncf %206 : vector<96x128xf32> to vector<96x128xbf16>
    %cst_106 = arith.constant dense<0.000000e+00> : vector<3x128xf32>
    %212 = tpu.matmul %210, %211, %cst_106 {dimension_numbers = #tpu.dot_dimension_numbers<[1], [0], [0], [1], [0, 0, 1, 1], [], []>} : vector<3x96xbf16>, vector<96x128xbf16>, vector<3x128xf32> -> vector<3x128xf32>
    %213 = vector.broadcast %207 : vector<1x128xf32> to vector<3x128xf32>
    %214 = arith.addf %212, %213 : vector<3x128xf32>
    %215 = vector.extract_strided_slice %214 {offsets = [0, 0], sizes = [3, 32], strides = [1, 1]} : vector<3x128xf32> to vector<3x32xf32>
    %216 = arith.negf %215 : vector<3x32xf32>
    %217 = math.exp %216 : vector<3x32xf32>
    %cst_107 = arith.constant 1.000000e+00 : f32
    %218 = vector.broadcast %cst_107 : f32 to vector<3x32xf32>
    %219 = arith.addf %218, %217 : vector<3x32xf32>
    %220 = arith.divf %218, %219 : vector<3x32xf32>
    %221 = vector.extract_strided_slice %214 {offsets = [0, 32], sizes = [3, 32], strides = [1, 1]} : vector<3x128xf32> to vector<3x32xf32>
    %222 = arith.negf %221 : vector<3x32xf32>
    %223 = math.exp %222 : vector<3x32xf32>
    %cst_108 = arith.constant 1.000000e+00 : f32
    %224 = vector.broadcast %cst_108 : f32 to vector<3x32xf32>
    %225 = arith.addf %224, %223 : vector<3x32xf32>
    %226 = arith.divf %224, %225 : vector<3x32xf32>
    %227 = vector.extract_strided_slice %214 {offsets = [0, 64], sizes = [3, 32], strides = [1, 1]} : vector<3x128xf32> to vector<3x32xf32>
    %228 = math.tanh %227 : vector<3x32xf32>
    %229 = vector.extract_strided_slice %214 {offsets = [0, 96], sizes = [3, 32], strides = [1, 1]} : vector<3x128xf32> to vector<3x32xf32>
    %230 = arith.negf %229 : vector<3x32xf32>
    %231 = math.exp %230 : vector<3x32xf32>
    %cst_109 = arith.constant 1.000000e+00 : f32
    %232 = vector.broadcast %cst_109 : f32 to vector<3x32xf32>
    %233 = arith.addf %232, %231 : vector<3x32xf32>
    %234 = arith.divf %232, %233 : vector<3x32xf32>
    %235 = arith.mulf %226, %208 : vector<3x32xf32>
    %236 = arith.mulf %220, %228 : vector<3x32xf32>
    %237 = arith.addf %235, %236 : vector<3x32xf32>
    %238 = math.tanh %237 : vector<3x32xf32>
    %239 = arith.mulf %234, %238 : vector<3x32xf32>
    %240 = arith.truncf %239 : vector<3x32xf32> to vector<3x32xbf16>
    %cst_110 = arith.constant dense<0.000000e+00> : vector<16x32xf32>
    %241 = tpu.matmul %197, %240, %cst_110 {dimension_numbers = #tpu.dot_dimension_numbers<[1], [0], [0], [1], [0, 0, 1, 1], [], []>} : vector<16x3xbf16>, vector<3x32xbf16>, vector<16x32xf32> -> vector<16x32xf32>
    %242 = arith.mulf %189, %241 : vector<16x32xf32>
    %cst_111 = arith.constant dense<0.000000e+00> : vector<16xf32>
    %243 = vector.multi_reduction <add>, %242, %cst_111 [1] : vector<16x32xf32> to vector<16xf32>
    %244 = vector.shape_cast %243 : vector<16xf32> to vector<16x1xf32>
    %cst_112 = arith.constant -1.000000e+30 : f32
    %245 = vector.shape_cast %244 : vector<16x1xf32> to vector<16x1xf32>
    %246 = vector.broadcast %245 : vector<16x1xf32> to vector<16x3xf32>
    %247 = vector.broadcast %cst_112 : f32 to vector<16x3xf32>
    %248 = arith.select %193, %246, %247 : vector<16x3xi1>, vector<16x3xf32>
    %cst_113 = arith.constant dense<0xFF800000> : vector<3xf32>
    %249 = vector.multi_reduction <maximumf>, %248, %cst_113 [0] : vector<16x3xf32> to vector<3xf32>
    %250 = vector.shape_cast %249 : vector<3xf32> to vector<1x3xf32>
    %cst_114 = arith.constant 0.000000e+00 : f32
    %251 = vector.shape_cast %250 : vector<1x3xf32> to vector<1x3xf32>
    %252 = vector.broadcast %251 : vector<1x3xf32> to vector<16x3xf32>
    %253 = vector.broadcast %cst_114 : f32 to vector<16x3xf32>
    %254 = arith.select %193, %252, %253 : vector<16x3xi1>, vector<16x3xf32>
    %cst_115 = arith.constant dense<0.000000e+00> : vector<16xf32>
    %255 = vector.multi_reduction <add>, %254, %cst_115 [1] : vector<16x3xf32> to vector<16xf32>
    %256 = vector.shape_cast %255 : vector<16xf32> to vector<16x1xf32>
    %257 = arith.subf %244, %256 : vector<16x1xf32>
    %258 = math.exp %257 : vector<16x1xf32>
    %cst_116 = arith.constant 0.000000e+00 : f32
    %259 = vector.shape_cast %258 : vector<16x1xf32> to vector<16x1xf32>
    %260 = vector.broadcast %259 : vector<16x1xf32> to vector<16x3xf32>
    %261 = vector.broadcast %cst_116 : f32 to vector<16x3xf32>
    %262 = arith.select %193, %260, %261 : vector<16x3xi1>, vector<16x3xf32>
    %cst_117 = arith.constant dense<0.000000e+00> : vector<3xf32>
    %263 = vector.multi_reduction <add>, %262, %cst_117 [0] : vector<16x3xf32> to vector<3xf32>
    %264 = vector.shape_cast %263 : vector<3xf32> to vector<1x3xf32>
    %cst_118 = arith.constant 0.000000e+00 : f32
    %265 = vector.shape_cast %264 : vector<1x3xf32> to vector<1x3xf32>
    %266 = vector.broadcast %265 : vector<1x3xf32> to vector<16x3xf32>
    %267 = vector.broadcast %cst_118 : f32 to vector<16x3xf32>
    %268 = arith.select %193, %266, %267 : vector<16x3xi1>, vector<16x3xf32>
    %cst_119 = arith.constant dense<0.000000e+00> : vector<16xf32>
    %269 = vector.multi_reduction <add>, %268, %cst_119 [1] : vector<16x3xf32> to vector<16xf32>
    %270 = vector.shape_cast %269 : vector<16xf32> to vector<16x1xf32>
    %cst_120 = arith.constant 1.000000e-16 : f32
    %271 = vector.broadcast %cst_120 : f32 to vector<16x1xf32>
    %272 = arith.addf %270, %271 : vector<16x1xf32>
    %273 = arith.divf %258, %272 : vector<16x1xf32>
    %274 = vector.broadcast %273 : vector<16x1xf32> to vector<16x32xf32>
    %275 = arith.mulf %274, %189 : vector<16x32xf32>
    %276 = arith.truncf %275 : vector<16x32xf32> to vector<16x32xbf16>
    %cst_121 = arith.constant dense<0.000000e+00> : vector<3x32xf32>
    %277 = tpu.matmul %205, %276, %cst_121 {dimension_numbers = #tpu.dot_dimension_numbers<[1], [0], [0], [1], [0, 0, 1, 1], [], []>} : vector<3x16xbf16>, vector<16x32xbf16>, vector<3x32xf32> -> vector<3x32xf32>
    %c1_i32 = arith.constant 1 : i32
    %278 = tpu.concatenate %239, %277, %239 in 1 : vector<3x32xf32>, vector<3x32xf32>, vector<3x32xf32> -> vector<3x96xf32>
    %279 = arith.truncf %278 : vector<3x96xf32> to vector<3x96xbf16>
    %280 = arith.truncf %206 : vector<96x128xf32> to vector<96x128xbf16>
    %cst_122 = arith.constant dense<0.000000e+00> : vector<3x128xf32>
    %281 = tpu.matmul %279, %280, %cst_122 {dimension_numbers = #tpu.dot_dimension_numbers<[1], [0], [0], [1], [0, 0, 1, 1], [], []>} : vector<3x96xbf16>, vector<96x128xbf16>, vector<3x128xf32> -> vector<3x128xf32>
    %282 = vector.broadcast %207 : vector<1x128xf32> to vector<3x128xf32>
    %283 = arith.addf %281, %282 : vector<3x128xf32>
    %284 = vector.extract_strided_slice %283 {offsets = [0, 0], sizes = [3, 32], strides = [1, 1]} : vector<3x128xf32> to vector<3x32xf32>
    %285 = arith.negf %284 : vector<3x32xf32>
    %286 = math.exp %285 : vector<3x32xf32>
    %cst_123 = arith.constant 1.000000e+00 : f32
    %287 = vector.broadcast %cst_123 : f32 to vector<3x32xf32>
    %288 = arith.addf %287, %286 : vector<3x32xf32>
    %289 = arith.divf %287, %288 : vector<3x32xf32>
    %290 = vector.extract_strided_slice %283 {offsets = [0, 32], sizes = [3, 32], strides = [1, 1]} : vector<3x128xf32> to vector<3x32xf32>
    %291 = arith.negf %290 : vector<3x32xf32>
    %292 = math.exp %291 : vector<3x32xf32>
    %cst_124 = arith.constant 1.000000e+00 : f32
    %293 = vector.broadcast %cst_124 : f32 to vector<3x32xf32>
    %294 = arith.addf %293, %292 : vector<3x32xf32>
    %295 = arith.divf %293, %294 : vector<3x32xf32>
    %296 = vector.extract_strided_slice %283 {offsets = [0, 64], sizes = [3, 32], strides = [1, 1]} : vector<3x128xf32> to vector<3x32xf32>
    %297 = math.tanh %296 : vector<3x32xf32>
    %298 = vector.extract_strided_slice %283 {offsets = [0, 96], sizes = [3, 32], strides = [1, 1]} : vector<3x128xf32> to vector<3x32xf32>
    %299 = arith.negf %298 : vector<3x32xf32>
    %300 = math.exp %299 : vector<3x32xf32>
    %cst_125 = arith.constant 1.000000e+00 : f32
    %301 = vector.broadcast %cst_125 : f32 to vector<3x32xf32>
    %302 = arith.addf %301, %300 : vector<3x32xf32>
    %303 = arith.divf %301, %302 : vector<3x32xf32>
    %304 = arith.mulf %295, %237 : vector<3x32xf32>
    %305 = arith.mulf %289, %297 : vector<3x32xf32>
    %306 = arith.addf %304, %305 : vector<3x32xf32>
    %307 = math.tanh %306 : vector<3x32xf32>
    %308 = arith.mulf %303, %307 : vector<3x32xf32>
    %309 = arith.truncf %308 : vector<3x32xf32> to vector<3x32xbf16>
    %cst_126 = arith.constant dense<0.000000e+00> : vector<16x32xf32>
    %310 = tpu.matmul %197, %309, %cst_126 {dimension_numbers = #tpu.dot_dimension_numbers<[1], [0], [0], [1], [0, 0, 1, 1], [], []>} : vector<16x3xbf16>, vector<3x32xbf16>, vector<16x32xf32> -> vector<16x32xf32>
    %311 = arith.mulf %189, %310 : vector<16x32xf32>
    %cst_127 = arith.constant dense<0.000000e+00> : vector<16xf32>
    %312 = vector.multi_reduction <add>, %311, %cst_127 [1] : vector<16x32xf32> to vector<16xf32>
    %313 = vector.shape_cast %312 : vector<16xf32> to vector<16x1xf32>
    %cst_128 = arith.constant -1.000000e+30 : f32
    %314 = vector.shape_cast %313 : vector<16x1xf32> to vector<16x1xf32>
    %315 = vector.broadcast %314 : vector<16x1xf32> to vector<16x3xf32>
    %316 = vector.broadcast %cst_128 : f32 to vector<16x3xf32>
    %317 = arith.select %193, %315, %316 : vector<16x3xi1>, vector<16x3xf32>
    %cst_129 = arith.constant dense<0xFF800000> : vector<3xf32>
    %318 = vector.multi_reduction <maximumf>, %317, %cst_129 [0] : vector<16x3xf32> to vector<3xf32>
    %319 = vector.shape_cast %318 : vector<3xf32> to vector<1x3xf32>
    %cst_130 = arith.constant 0.000000e+00 : f32
    %320 = vector.shape_cast %319 : vector<1x3xf32> to vector<1x3xf32>
    %321 = vector.broadcast %320 : vector<1x3xf32> to vector<16x3xf32>
    %322 = vector.broadcast %cst_130 : f32 to vector<16x3xf32>
    %323 = arith.select %193, %321, %322 : vector<16x3xi1>, vector<16x3xf32>
    %cst_131 = arith.constant dense<0.000000e+00> : vector<16xf32>
    %324 = vector.multi_reduction <add>, %323, %cst_131 [1] : vector<16x3xf32> to vector<16xf32>
    %325 = vector.shape_cast %324 : vector<16xf32> to vector<16x1xf32>
    %326 = arith.subf %313, %325 : vector<16x1xf32>
    %327 = math.exp %326 : vector<16x1xf32>
    %cst_132 = arith.constant 0.000000e+00 : f32
    %328 = vector.shape_cast %327 : vector<16x1xf32> to vector<16x1xf32>
    %329 = vector.broadcast %328 : vector<16x1xf32> to vector<16x3xf32>
    %330 = vector.broadcast %cst_132 : f32 to vector<16x3xf32>
    %331 = arith.select %193, %329, %330 : vector<16x3xi1>, vector<16x3xf32>
    %cst_133 = arith.constant dense<0.000000e+00> : vector<3xf32>
    %332 = vector.multi_reduction <add>, %331, %cst_133 [0] : vector<16x3xf32> to vector<3xf32>
    %333 = vector.shape_cast %332 : vector<3xf32> to vector<1x3xf32>
    %cst_134 = arith.constant 0.000000e+00 : f32
    %334 = vector.shape_cast %333 : vector<1x3xf32> to vector<1x3xf32>
    %335 = vector.broadcast %334 : vector<1x3xf32> to vector<16x3xf32>
    %336 = vector.broadcast %cst_134 : f32 to vector<16x3xf32>
    %337 = arith.select %193, %335, %336 : vector<16x3xi1>, vector<16x3xf32>
    %cst_135 = arith.constant dense<0.000000e+00> : vector<16xf32>
    %338 = vector.multi_reduction <add>, %337, %cst_135 [1] : vector<16x3xf32> to vector<16xf32>
    %339 = vector.shape_cast %338 : vector<16xf32> to vector<16x1xf32>
    %cst_136 = arith.constant 1.000000e-16 : f32
    %340 = vector.broadcast %cst_136 : f32 to vector<16x1xf32>
    %341 = arith.addf %339, %340 : vector<16x1xf32>
    %342 = arith.divf %327, %341 : vector<16x1xf32>
    %343 = vector.broadcast %342 : vector<16x1xf32> to vector<16x32xf32>
    %344 = arith.mulf %343, %189 : vector<16x32xf32>
    %345 = arith.truncf %344 : vector<16x32xf32> to vector<16x32xbf16>
    %cst_137 = arith.constant dense<0.000000e+00> : vector<3x32xf32>
    %346 = tpu.matmul %205, %345, %cst_137 {dimension_numbers = #tpu.dot_dimension_numbers<[1], [0], [0], [1], [0, 0, 1, 1], [], []>} : vector<3x16xbf16>, vector<16x32xbf16>, vector<3x32xf32> -> vector<3x32xf32>
    %c2_i32 = arith.constant 2 : i32
    %347 = tpu.concatenate %308, %346, %308 in 1 : vector<3x32xf32>, vector<3x32xf32>, vector<3x32xf32> -> vector<3x96xf32>
    %348 = arith.truncf %347 : vector<3x96xf32> to vector<3x96xbf16>
    %349 = arith.truncf %206 : vector<96x128xf32> to vector<96x128xbf16>
    %cst_138 = arith.constant dense<0.000000e+00> : vector<3x128xf32>
    %350 = tpu.matmul %348, %349, %cst_138 {dimension_numbers = #tpu.dot_dimension_numbers<[1], [0], [0], [1], [0, 0, 1, 1], [], []>} : vector<3x96xbf16>, vector<96x128xbf16>, vector<3x128xf32> -> vector<3x128xf32>
    %351 = vector.broadcast %207 : vector<1x128xf32> to vector<3x128xf32>
    %352 = arith.addf %350, %351 : vector<3x128xf32>
    %353 = vector.extract_strided_slice %352 {offsets = [0, 0], sizes = [3, 32], strides = [1, 1]} : vector<3x128xf32> to vector<3x32xf32>
    %354 = arith.negf %353 : vector<3x32xf32>
    %355 = math.exp %354 : vector<3x32xf32>
    %cst_139 = arith.constant 1.000000e+00 : f32
    %356 = vector.broadcast %cst_139 : f32 to vector<3x32xf32>
    %357 = arith.addf %356, %355 : vector<3x32xf32>
    %358 = arith.divf %356, %357 : vector<3x32xf32>
    %359 = vector.extract_strided_slice %352 {offsets = [0, 32], sizes = [3, 32], strides = [1, 1]} : vector<3x128xf32> to vector<3x32xf32>
    %360 = arith.negf %359 : vector<3x32xf32>
    %361 = math.exp %360 : vector<3x32xf32>
    %cst_140 = arith.constant 1.000000e+00 : f32
    %362 = vector.broadcast %cst_140 : f32 to vector<3x32xf32>
    %363 = arith.addf %362, %361 : vector<3x32xf32>
    %364 = arith.divf %362, %363 : vector<3x32xf32>
    %365 = vector.extract_strided_slice %352 {offsets = [0, 64], sizes = [3, 32], strides = [1, 1]} : vector<3x128xf32> to vector<3x32xf32>
    %366 = math.tanh %365 : vector<3x32xf32>
    %367 = vector.extract_strided_slice %352 {offsets = [0, 96], sizes = [3, 32], strides = [1, 1]} : vector<3x128xf32> to vector<3x32xf32>
    %368 = arith.negf %367 : vector<3x32xf32>
    %369 = math.exp %368 : vector<3x32xf32>
    %cst_141 = arith.constant 1.000000e+00 : f32
    %370 = vector.broadcast %cst_141 : f32 to vector<3x32xf32>
    %371 = arith.addf %370, %369 : vector<3x32xf32>
    %372 = arith.divf %370, %371 : vector<3x32xf32>
    %373 = arith.mulf %364, %306 : vector<3x32xf32>
    %374 = arith.mulf %358, %366 : vector<3x32xf32>
    %375 = arith.addf %373, %374 : vector<3x32xf32>
    %376 = math.tanh %375 : vector<3x32xf32>
    %377 = arith.mulf %372, %376 : vector<3x32xf32>
    %378 = arith.truncf %377 : vector<3x32xf32> to vector<3x32xbf16>
    %cst_142 = arith.constant dense<0.000000e+00> : vector<16x32xf32>
    %379 = tpu.matmul %197, %378, %cst_142 {dimension_numbers = #tpu.dot_dimension_numbers<[1], [0], [0], [1], [0, 0, 1, 1], [], []>} : vector<16x3xbf16>, vector<3x32xbf16>, vector<16x32xf32> -> vector<16x32xf32>
    %380 = arith.mulf %189, %379 : vector<16x32xf32>
    %cst_143 = arith.constant dense<0.000000e+00> : vector<16xf32>
    %381 = vector.multi_reduction <add>, %380, %cst_143 [1] : vector<16x32xf32> to vector<16xf32>
    %382 = vector.shape_cast %381 : vector<16xf32> to vector<16x1xf32>
    %cst_144 = arith.constant -1.000000e+30 : f32
    %383 = vector.shape_cast %382 : vector<16x1xf32> to vector<16x1xf32>
    %384 = vector.broadcast %383 : vector<16x1xf32> to vector<16x3xf32>
    %385 = vector.broadcast %cst_144 : f32 to vector<16x3xf32>
    %386 = arith.select %193, %384, %385 : vector<16x3xi1>, vector<16x3xf32>
    %cst_145 = arith.constant dense<0xFF800000> : vector<3xf32>
    %387 = vector.multi_reduction <maximumf>, %386, %cst_145 [0] : vector<16x3xf32> to vector<3xf32>
    %388 = vector.shape_cast %387 : vector<3xf32> to vector<1x3xf32>
    %cst_146 = arith.constant 0.000000e+00 : f32
    %389 = vector.shape_cast %388 : vector<1x3xf32> to vector<1x3xf32>
    %390 = vector.broadcast %389 : vector<1x3xf32> to vector<16x3xf32>
    %391 = vector.broadcast %cst_146 : f32 to vector<16x3xf32>
    %392 = arith.select %193, %390, %391 : vector<16x3xi1>, vector<16x3xf32>
    %cst_147 = arith.constant dense<0.000000e+00> : vector<16xf32>
    %393 = vector.multi_reduction <add>, %392, %cst_147 [1] : vector<16x3xf32> to vector<16xf32>
    %394 = vector.shape_cast %393 : vector<16xf32> to vector<16x1xf32>
    %395 = arith.subf %382, %394 : vector<16x1xf32>
    %396 = math.exp %395 : vector<16x1xf32>
    %cst_148 = arith.constant 0.000000e+00 : f32
    %397 = vector.shape_cast %396 : vector<16x1xf32> to vector<16x1xf32>
    %398 = vector.broadcast %397 : vector<16x1xf32> to vector<16x3xf32>
    %399 = vector.broadcast %cst_148 : f32 to vector<16x3xf32>
    %400 = arith.select %193, %398, %399 : vector<16x3xi1>, vector<16x3xf32>
    %cst_149 = arith.constant dense<0.000000e+00> : vector<3xf32>
    %401 = vector.multi_reduction <add>, %400, %cst_149 [0] : vector<16x3xf32> to vector<3xf32>
    %402 = vector.shape_cast %401 : vector<3xf32> to vector<1x3xf32>
    %cst_150 = arith.constant 0.000000e+00 : f32
    %403 = vector.shape_cast %402 : vector<1x3xf32> to vector<1x3xf32>
    %404 = vector.broadcast %403 : vector<1x3xf32> to vector<16x3xf32>
    %405 = vector.broadcast %cst_150 : f32 to vector<16x3xf32>
    %406 = arith.select %193, %404, %405 : vector<16x3xi1>, vector<16x3xf32>
    %cst_151 = arith.constant dense<0.000000e+00> : vector<16xf32>
    %407 = vector.multi_reduction <add>, %406, %cst_151 [1] : vector<16x3xf32> to vector<16xf32>
    %408 = vector.shape_cast %407 : vector<16xf32> to vector<16x1xf32>
    %cst_152 = arith.constant 1.000000e-16 : f32
    %409 = vector.broadcast %cst_152 : f32 to vector<16x1xf32>
    %410 = arith.addf %408, %409 : vector<16x1xf32>
    %411 = arith.divf %396, %410 : vector<16x1xf32>
    %412 = vector.broadcast %411 : vector<16x1xf32> to vector<16x32xf32>
    %413 = arith.mulf %412, %189 : vector<16x32xf32>
    %414 = arith.truncf %413 : vector<16x32xf32> to vector<16x32xbf16>
    %cst_153 = arith.constant dense<0.000000e+00> : vector<3x32xf32>
    %415 = tpu.matmul %205, %414, %cst_153 {dimension_numbers = #tpu.dot_dimension_numbers<[1], [0], [0], [1], [0, 0, 1, 1], [], []>} : vector<3x16xbf16>, vector<16x32xbf16>, vector<3x32xf32> -> vector<3x32xf32>
    %c3_i32 = arith.constant 3 : i32
    %416 = tpu.concatenate %377, %415, %377 in 1 : vector<3x32xf32>, vector<3x32xf32>, vector<3x32xf32> -> vector<3x96xf32>
    %417 = arith.truncf %416 : vector<3x96xf32> to vector<3x96xbf16>
    %418 = arith.truncf %206 : vector<96x128xf32> to vector<96x128xbf16>
    %cst_154 = arith.constant dense<0.000000e+00> : vector<3x128xf32>
    %419 = tpu.matmul %417, %418, %cst_154 {dimension_numbers = #tpu.dot_dimension_numbers<[1], [0], [0], [1], [0, 0, 1, 1], [], []>} : vector<3x96xbf16>, vector<96x128xbf16>, vector<3x128xf32> -> vector<3x128xf32>
    %420 = vector.broadcast %207 : vector<1x128xf32> to vector<3x128xf32>
    %421 = arith.addf %419, %420 : vector<3x128xf32>
    %422 = vector.extract_strided_slice %421 {offsets = [0, 0], sizes = [3, 32], strides = [1, 1]} : vector<3x128xf32> to vector<3x32xf32>
    %423 = arith.negf %422 : vector<3x32xf32>
    %424 = math.exp %423 : vector<3x32xf32>
    %cst_155 = arith.constant 1.000000e+00 : f32
    %425 = vector.broadcast %cst_155 : f32 to vector<3x32xf32>
    %426 = arith.addf %425, %424 : vector<3x32xf32>
    %427 = arith.divf %425, %426 : vector<3x32xf32>
    %428 = vector.extract_strided_slice %421 {offsets = [0, 32], sizes = [3, 32], strides = [1, 1]} : vector<3x128xf32> to vector<3x32xf32>
    %429 = arith.negf %428 : vector<3x32xf32>
    %430 = math.exp %429 : vector<3x32xf32>
    %cst_156 = arith.constant 1.000000e+00 : f32
    %431 = vector.broadcast %cst_156 : f32 to vector<3x32xf32>
    %432 = arith.addf %431, %430 : vector<3x32xf32>
    %433 = arith.divf %431, %432 : vector<3x32xf32>
    %434 = vector.extract_strided_slice %421 {offsets = [0, 64], sizes = [3, 32], strides = [1, 1]} : vector<3x128xf32> to vector<3x32xf32>
    %435 = math.tanh %434 : vector<3x32xf32>
    %436 = vector.extract_strided_slice %421 {offsets = [0, 96], sizes = [3, 32], strides = [1, 1]} : vector<3x128xf32> to vector<3x32xf32>
    %437 = arith.negf %436 : vector<3x32xf32>
    %438 = math.exp %437 : vector<3x32xf32>
    %cst_157 = arith.constant 1.000000e+00 : f32
    %439 = vector.broadcast %cst_157 : f32 to vector<3x32xf32>
    %440 = arith.addf %439, %438 : vector<3x32xf32>
    %441 = arith.divf %439, %440 : vector<3x32xf32>
    %442 = arith.mulf %433, %375 : vector<3x32xf32>
    %443 = arith.mulf %427, %435 : vector<3x32xf32>
    %444 = arith.addf %442, %443 : vector<3x32xf32>
    %445 = math.tanh %444 : vector<3x32xf32>
    %446 = arith.mulf %441, %445 : vector<3x32xf32>
    %447 = arith.truncf %446 : vector<3x32xf32> to vector<3x32xbf16>
    %cst_158 = arith.constant dense<0.000000e+00> : vector<16x32xf32>
    %448 = tpu.matmul %197, %447, %cst_158 {dimension_numbers = #tpu.dot_dimension_numbers<[1], [0], [0], [1], [0, 0, 1, 1], [], []>} : vector<16x3xbf16>, vector<3x32xbf16>, vector<16x32xf32> -> vector<16x32xf32>
    %449 = arith.mulf %189, %448 : vector<16x32xf32>
    %cst_159 = arith.constant dense<0.000000e+00> : vector<16xf32>
    %450 = vector.multi_reduction <add>, %449, %cst_159 [1] : vector<16x32xf32> to vector<16xf32>
    %451 = vector.shape_cast %450 : vector<16xf32> to vector<16x1xf32>
    %cst_160 = arith.constant -1.000000e+30 : f32
    %452 = vector.shape_cast %451 : vector<16x1xf32> to vector<16x1xf32>
    %453 = vector.broadcast %452 : vector<16x1xf32> to vector<16x3xf32>
    %454 = vector.broadcast %cst_160 : f32 to vector<16x3xf32>
    %455 = arith.select %193, %453, %454 : vector<16x3xi1>, vector<16x3xf32>
    %cst_161 = arith.constant dense<0xFF800000> : vector<3xf32>
    %456 = vector.multi_reduction <maximumf>, %455, %cst_161 [0] : vector<16x3xf32> to vector<3xf32>
    %457 = vector.shape_cast %456 : vector<3xf32> to vector<1x3xf32>
    %cst_162 = arith.constant 0.000000e+00 : f32
    %458 = vector.shape_cast %457 : vector<1x3xf32> to vector<1x3xf32>
    %459 = vector.broadcast %458 : vector<1x3xf32> to vector<16x3xf32>
    %460 = vector.broadcast %cst_162 : f32 to vector<16x3xf32>
    %461 = arith.select %193, %459, %460 : vector<16x3xi1>, vector<16x3xf32>
    %cst_163 = arith.constant dense<0.000000e+00> : vector<16xf32>
    %462 = vector.multi_reduction <add>, %461, %cst_163 [1] : vector<16x3xf32> to vector<16xf32>
    %463 = vector.shape_cast %462 : vector<16xf32> to vector<16x1xf32>
    %464 = arith.subf %451, %463 : vector<16x1xf32>
    %465 = math.exp %464 : vector<16x1xf32>
    %cst_164 = arith.constant 0.000000e+00 : f32
    %466 = vector.shape_cast %465 : vector<16x1xf32> to vector<16x1xf32>
    %467 = vector.broadcast %466 : vector<16x1xf32> to vector<16x3xf32>
    %468 = vector.broadcast %cst_164 : f32 to vector<16x3xf32>
    %469 = arith.select %193, %467, %468 : vector<16x3xi1>, vector<16x3xf32>
    %cst_165 = arith.constant dense<0.000000e+00> : vector<3xf32>
    %470 = vector.multi_reduction <add>, %469, %cst_165 [0] : vector<16x3xf32> to vector<3xf32>
    %471 = vector.shape_cast %470 : vector<3xf32> to vector<1x3xf32>
    %cst_166 = arith.constant 0.000000e+00 : f32
    %472 = vector.shape_cast %471 : vector<1x3xf32> to vector<1x3xf32>
    %473 = vector.broadcast %472 : vector<1x3xf32> to vector<16x3xf32>
    %474 = vector.broadcast %cst_166 : f32 to vector<16x3xf32>
    %475 = arith.select %193, %473, %474 : vector<16x3xi1>, vector<16x3xf32>
    %cst_167 = arith.constant dense<0.000000e+00> : vector<16xf32>
    %476 = vector.multi_reduction <add>, %475, %cst_167 [1] : vector<16x3xf32> to vector<16xf32>
    %477 = vector.shape_cast %476 : vector<16xf32> to vector<16x1xf32>
    %cst_168 = arith.constant 1.000000e-16 : f32
    %478 = vector.broadcast %cst_168 : f32 to vector<16x1xf32>
    %479 = arith.addf %477, %478 : vector<16x1xf32>
    %480 = arith.divf %465, %479 : vector<16x1xf32>
    %481 = vector.broadcast %480 : vector<16x1xf32> to vector<16x32xf32>
    %482 = arith.mulf %481, %189 : vector<16x32xf32>
    %483 = arith.truncf %482 : vector<16x32xf32> to vector<16x32xbf16>
    %cst_169 = arith.constant dense<0.000000e+00> : vector<3x32xf32>
    %484 = tpu.matmul %205, %483, %cst_169 {dimension_numbers = #tpu.dot_dimension_numbers<[1], [0], [0], [1], [0, 0, 1, 1], [], []>} : vector<3x16xbf16>, vector<16x32xbf16>, vector<3x32xf32> -> vector<3x32xf32>
    %c4_i32 = arith.constant 4 : i32
    %485 = tpu.concatenate %446, %484, %446 in 1 : vector<3x32xf32>, vector<3x32xf32>, vector<3x32xf32> -> vector<3x96xf32>
    %486 = arith.truncf %485 : vector<3x96xf32> to vector<3x96xbf16>
    %487 = arith.truncf %206 : vector<96x128xf32> to vector<96x128xbf16>
    %cst_170 = arith.constant dense<0.000000e+00> : vector<3x128xf32>
    %488 = tpu.matmul %486, %487, %cst_170 {dimension_numbers = #tpu.dot_dimension_numbers<[1], [0], [0], [1], [0, 0, 1, 1], [], []>} : vector<3x96xbf16>, vector<96x128xbf16>, vector<3x128xf32> -> vector<3x128xf32>
    %489 = vector.broadcast %207 : vector<1x128xf32> to vector<3x128xf32>
    %490 = arith.addf %488, %489 : vector<3x128xf32>
    %491 = vector.extract_strided_slice %490 {offsets = [0, 0], sizes = [3, 32], strides = [1, 1]} : vector<3x128xf32> to vector<3x32xf32>
    %492 = arith.negf %491 : vector<3x32xf32>
    %493 = math.exp %492 : vector<3x32xf32>
    %cst_171 = arith.constant 1.000000e+00 : f32
    %494 = vector.broadcast %cst_171 : f32 to vector<3x32xf32>
    %495 = arith.addf %494, %493 : vector<3x32xf32>
    %496 = arith.divf %494, %495 : vector<3x32xf32>
    %497 = vector.extract_strided_slice %490 {offsets = [0, 32], sizes = [3, 32], strides = [1, 1]} : vector<3x128xf32> to vector<3x32xf32>
    %498 = arith.negf %497 : vector<3x32xf32>
    %499 = math.exp %498 : vector<3x32xf32>
    %cst_172 = arith.constant 1.000000e+00 : f32
    %500 = vector.broadcast %cst_172 : f32 to vector<3x32xf32>
    %501 = arith.addf %500, %499 : vector<3x32xf32>
    %502 = arith.divf %500, %501 : vector<3x32xf32>
    %503 = vector.extract_strided_slice %490 {offsets = [0, 64], sizes = [3, 32], strides = [1, 1]} : vector<3x128xf32> to vector<3x32xf32>
    %504 = math.tanh %503 : vector<3x32xf32>
    %505 = vector.extract_strided_slice %490 {offsets = [0, 96], sizes = [3, 32], strides = [1, 1]} : vector<3x128xf32> to vector<3x32xf32>
    %506 = arith.negf %505 : vector<3x32xf32>
    %507 = math.exp %506 : vector<3x32xf32>
    %cst_173 = arith.constant 1.000000e+00 : f32
    %508 = vector.broadcast %cst_173 : f32 to vector<3x32xf32>
    %509 = arith.addf %508, %507 : vector<3x32xf32>
    %510 = arith.divf %508, %509 : vector<3x32xf32>
    %511 = arith.mulf %502, %444 : vector<3x32xf32>
    %512 = arith.mulf %496, %504 : vector<3x32xf32>
    %513 = arith.addf %511, %512 : vector<3x32xf32>
    %514 = math.tanh %513 : vector<3x32xf32>
    %515 = arith.mulf %510, %514 : vector<3x32xf32>
    %516 = arith.truncf %515 : vector<3x32xf32> to vector<3x32xbf16>
    %cst_174 = arith.constant dense<0.000000e+00> : vector<16x32xf32>
    %517 = tpu.matmul %197, %516, %cst_174 {dimension_numbers = #tpu.dot_dimension_numbers<[1], [0], [0], [1], [0, 0, 1, 1], [], []>} : vector<16x3xbf16>, vector<3x32xbf16>, vector<16x32xf32> -> vector<16x32xf32>
    %518 = arith.mulf %189, %517 : vector<16x32xf32>
    %cst_175 = arith.constant dense<0.000000e+00> : vector<16xf32>
    %519 = vector.multi_reduction <add>, %518, %cst_175 [1] : vector<16x32xf32> to vector<16xf32>
    %520 = vector.shape_cast %519 : vector<16xf32> to vector<16x1xf32>
    %cst_176 = arith.constant -1.000000e+30 : f32
    %521 = vector.shape_cast %520 : vector<16x1xf32> to vector<16x1xf32>
    %522 = vector.broadcast %521 : vector<16x1xf32> to vector<16x3xf32>
    %523 = vector.broadcast %cst_176 : f32 to vector<16x3xf32>
    %524 = arith.select %193, %522, %523 : vector<16x3xi1>, vector<16x3xf32>
    %cst_177 = arith.constant dense<0xFF800000> : vector<3xf32>
    %525 = vector.multi_reduction <maximumf>, %524, %cst_177 [0] : vector<16x3xf32> to vector<3xf32>
    %526 = vector.shape_cast %525 : vector<3xf32> to vector<1x3xf32>
    %cst_178 = arith.constant 0.000000e+00 : f32
    %527 = vector.shape_cast %526 : vector<1x3xf32> to vector<1x3xf32>
    %528 = vector.broadcast %527 : vector<1x3xf32> to vector<16x3xf32>
    %529 = vector.broadcast %cst_178 : f32 to vector<16x3xf32>
    %530 = arith.select %193, %528, %529 : vector<16x3xi1>, vector<16x3xf32>
    %cst_179 = arith.constant dense<0.000000e+00> : vector<16xf32>
    %531 = vector.multi_reduction <add>, %530, %cst_179 [1] : vector<16x3xf32> to vector<16xf32>
    %532 = vector.shape_cast %531 : vector<16xf32> to vector<16x1xf32>
    %533 = arith.subf %520, %532 : vector<16x1xf32>
    %534 = math.exp %533 : vector<16x1xf32>
    %cst_180 = arith.constant 0.000000e+00 : f32
    %535 = vector.shape_cast %534 : vector<16x1xf32> to vector<16x1xf32>
    %536 = vector.broadcast %535 : vector<16x1xf32> to vector<16x3xf32>
    %537 = vector.broadcast %cst_180 : f32 to vector<16x3xf32>
    %538 = arith.select %193, %536, %537 : vector<16x3xi1>, vector<16x3xf32>
    %cst_181 = arith.constant dense<0.000000e+00> : vector<3xf32>
    %539 = vector.multi_reduction <add>, %538, %cst_181 [0] : vector<16x3xf32> to vector<3xf32>
    %540 = vector.shape_cast %539 : vector<3xf32> to vector<1x3xf32>
    %cst_182 = arith.constant 0.000000e+00 : f32
    %541 = vector.shape_cast %540 : vector<1x3xf32> to vector<1x3xf32>
    %542 = vector.broadcast %541 : vector<1x3xf32> to vector<16x3xf32>
    %543 = vector.broadcast %cst_182 : f32 to vector<16x3xf32>
    %544 = arith.select %193, %542, %543 : vector<16x3xi1>, vector<16x3xf32>
    %cst_183 = arith.constant dense<0.000000e+00> : vector<16xf32>
    %545 = vector.multi_reduction <add>, %544, %cst_183 [1] : vector<16x3xf32> to vector<16xf32>
    %546 = vector.shape_cast %545 : vector<16xf32> to vector<16x1xf32>
    %cst_184 = arith.constant 1.000000e-16 : f32
    %547 = vector.broadcast %cst_184 : f32 to vector<16x1xf32>
    %548 = arith.addf %546, %547 : vector<16x1xf32>
    %549 = arith.divf %534, %548 : vector<16x1xf32>
    %550 = vector.broadcast %549 : vector<16x1xf32> to vector<16x32xf32>
    %551 = arith.mulf %550, %189 : vector<16x32xf32>
    %552 = arith.truncf %551 : vector<16x32xf32> to vector<16x32xbf16>
    %cst_185 = arith.constant dense<0.000000e+00> : vector<3x32xf32>
    %553 = tpu.matmul %205, %552, %cst_185 {dimension_numbers = #tpu.dot_dimension_numbers<[1], [0], [0], [1], [0, 0, 1, 1], [], []>} : vector<3x16xbf16>, vector<16x32xbf16>, vector<3x32xf32> -> vector<3x32xf32>
    %c5_i32 = arith.constant 5 : i32
    %554 = tpu.concatenate %515, %553, %515 in 1 : vector<3x32xf32>, vector<3x32xf32>, vector<3x32xf32> -> vector<3x96xf32>
    %555 = arith.truncf %554 : vector<3x96xf32> to vector<3x96xbf16>
    %556 = arith.truncf %206 : vector<96x128xf32> to vector<96x128xbf16>
    %cst_186 = arith.constant dense<0.000000e+00> : vector<3x128xf32>
    %557 = tpu.matmul %555, %556, %cst_186 {dimension_numbers = #tpu.dot_dimension_numbers<[1], [0], [0], [1], [0, 0, 1, 1], [], []>} : vector<3x96xbf16>, vector<96x128xbf16>, vector<3x128xf32> -> vector<3x128xf32>
    %558 = vector.broadcast %207 : vector<1x128xf32> to vector<3x128xf32>
    %559 = arith.addf %557, %558 : vector<3x128xf32>
    %560 = vector.extract_strided_slice %559 {offsets = [0, 0], sizes = [3, 32], strides = [1, 1]} : vector<3x128xf32> to vector<3x32xf32>
    %561 = arith.negf %560 : vector<3x32xf32>
    %562 = math.exp %561 : vector<3x32xf32>
    %cst_187 = arith.constant 1.000000e+00 : f32
    %563 = vector.broadcast %cst_187 : f32 to vector<3x32xf32>
    %564 = arith.addf %563, %562 : vector<3x32xf32>
    %565 = arith.divf %563, %564 : vector<3x32xf32>
    %566 = vector.extract_strided_slice %559 {offsets = [0, 32], sizes = [3, 32], strides = [1, 1]} : vector<3x128xf32> to vector<3x32xf32>
    %567 = arith.negf %566 : vector<3x32xf32>
    %568 = math.exp %567 : vector<3x32xf32>
    %cst_188 = arith.constant 1.000000e+00 : f32
    %569 = vector.broadcast %cst_188 : f32 to vector<3x32xf32>
    %570 = arith.addf %569, %568 : vector<3x32xf32>
    %571 = arith.divf %569, %570 : vector<3x32xf32>
    %572 = vector.extract_strided_slice %559 {offsets = [0, 64], sizes = [3, 32], strides = [1, 1]} : vector<3x128xf32> to vector<3x32xf32>
    %573 = math.tanh %572 : vector<3x32xf32>
    %574 = vector.extract_strided_slice %559 {offsets = [0, 96], sizes = [3, 32], strides = [1, 1]} : vector<3x128xf32> to vector<3x32xf32>
    %575 = arith.negf %574 : vector<3x32xf32>
    %576 = math.exp %575 : vector<3x32xf32>
    %cst_189 = arith.constant 1.000000e+00 : f32
    %577 = vector.broadcast %cst_189 : f32 to vector<3x32xf32>
    %578 = arith.addf %577, %576 : vector<3x32xf32>
    %579 = arith.divf %577, %578 : vector<3x32xf32>
    %580 = arith.mulf %571, %513 : vector<3x32xf32>
    %581 = arith.mulf %565, %573 : vector<3x32xf32>
    %582 = arith.addf %580, %581 : vector<3x32xf32>
    %583 = math.tanh %582 : vector<3x32xf32>
    %584 = arith.mulf %579, %583 : vector<3x32xf32>
    %585 = arith.truncf %584 : vector<3x32xf32> to vector<3x32xbf16>
    %cst_190 = arith.constant dense<0.000000e+00> : vector<16x32xf32>
    %586 = tpu.matmul %197, %585, %cst_190 {dimension_numbers = #tpu.dot_dimension_numbers<[1], [0], [0], [1], [0, 0, 1, 1], [], []>} : vector<16x3xbf16>, vector<3x32xbf16>, vector<16x32xf32> -> vector<16x32xf32>
    %587 = arith.mulf %189, %586 : vector<16x32xf32>
    %cst_191 = arith.constant dense<0.000000e+00> : vector<16xf32>
    %588 = vector.multi_reduction <add>, %587, %cst_191 [1] : vector<16x32xf32> to vector<16xf32>
    %589 = vector.shape_cast %588 : vector<16xf32> to vector<16x1xf32>
    %cst_192 = arith.constant -1.000000e+30 : f32
    %590 = vector.shape_cast %589 : vector<16x1xf32> to vector<16x1xf32>
    %591 = vector.broadcast %590 : vector<16x1xf32> to vector<16x3xf32>
    %592 = vector.broadcast %cst_192 : f32 to vector<16x3xf32>
    %593 = arith.select %193, %591, %592 : vector<16x3xi1>, vector<16x3xf32>
    %cst_193 = arith.constant dense<0xFF800000> : vector<3xf32>
    %594 = vector.multi_reduction <maximumf>, %593, %cst_193 [0] : vector<16x3xf32> to vector<3xf32>
    %595 = vector.shape_cast %594 : vector<3xf32> to vector<1x3xf32>
    %cst_194 = arith.constant 0.000000e+00 : f32
    %596 = vector.shape_cast %595 : vector<1x3xf32> to vector<1x3xf32>
    %597 = vector.broadcast %596 : vector<1x3xf32> to vector<16x3xf32>
    %598 = vector.broadcast %cst_194 : f32 to vector<16x3xf32>
    %599 = arith.select %193, %597, %598 : vector<16x3xi1>, vector<16x3xf32>
    %cst_195 = arith.constant dense<0.000000e+00> : vector<16xf32>
    %600 = vector.multi_reduction <add>, %599, %cst_195 [1] : vector<16x3xf32> to vector<16xf32>
    %601 = vector.shape_cast %600 : vector<16xf32> to vector<16x1xf32>
    %602 = arith.subf %589, %601 : vector<16x1xf32>
    %603 = math.exp %602 : vector<16x1xf32>
    %cst_196 = arith.constant 0.000000e+00 : f32
    %604 = vector.shape_cast %603 : vector<16x1xf32> to vector<16x1xf32>
    %605 = vector.broadcast %604 : vector<16x1xf32> to vector<16x3xf32>
    %606 = vector.broadcast %cst_196 : f32 to vector<16x3xf32>
    %607 = arith.select %193, %605, %606 : vector<16x3xi1>, vector<16x3xf32>
    %cst_197 = arith.constant dense<0.000000e+00> : vector<3xf32>
    %608 = vector.multi_reduction <add>, %607, %cst_197 [0] : vector<16x3xf32> to vector<3xf32>
    %609 = vector.shape_cast %608 : vector<3xf32> to vector<1x3xf32>
    %cst_198 = arith.constant 0.000000e+00 : f32
    %610 = vector.shape_cast %609 : vector<1x3xf32> to vector<1x3xf32>
    %611 = vector.broadcast %610 : vector<1x3xf32> to vector<16x3xf32>
    %612 = vector.broadcast %cst_198 : f32 to vector<16x3xf32>
    %613 = arith.select %193, %611, %612 : vector<16x3xi1>, vector<16x3xf32>
    %cst_199 = arith.constant dense<0.000000e+00> : vector<16xf32>
    %614 = vector.multi_reduction <add>, %613, %cst_199 [1] : vector<16x3xf32> to vector<16xf32>
    %615 = vector.shape_cast %614 : vector<16xf32> to vector<16x1xf32>
    %cst_200 = arith.constant 1.000000e-16 : f32
    %616 = vector.broadcast %cst_200 : f32 to vector<16x1xf32>
    %617 = arith.addf %615, %616 : vector<16x1xf32>
    %618 = arith.divf %603, %617 : vector<16x1xf32>
    %619 = vector.broadcast %618 : vector<16x1xf32> to vector<16x32xf32>
    %620 = arith.mulf %619, %189 : vector<16x32xf32>
    %621 = arith.truncf %620 : vector<16x32xf32> to vector<16x32xbf16>
    %cst_201 = arith.constant dense<0.000000e+00> : vector<3x32xf32>
    %622 = tpu.matmul %205, %621, %cst_201 {dimension_numbers = #tpu.dot_dimension_numbers<[1], [0], [0], [1], [0, 0, 1, 1], [], []>} : vector<3x16xbf16>, vector<16x32xbf16>, vector<3x32xf32> -> vector<3x32xf32>
    %623 = tpu.concatenate %584, %622 in 1 : vector<3x32xf32>, vector<3x32xf32> -> vector<3x64xf32>
    %c0_202 = arith.constant 0 : index
    %c0_203 = arith.constant 0 : index
    %624 = vector.load %arg17[%c0_202, %c0_203] : memref<64x32xf32, #tpu.memory_space<vmem>>, vector<64x32xf32>
    %625 = arith.truncf %623 : vector<3x64xf32> to vector<3x64xbf16>
    %626 = arith.truncf %624 : vector<64x32xf32> to vector<64x32xbf16>
    %cst_204 = arith.constant dense<0.000000e+00> : vector<3x32xf32>
    %627 = tpu.matmul %625, %626, %cst_204 {dimension_numbers = #tpu.dot_dimension_numbers<[1], [0], [0], [1], [0, 0, 1, 1], [], []>} : vector<3x64xbf16>, vector<64x32xbf16>, vector<3x32xf32> -> vector<3x32xf32>
    %c0_205 = arith.constant 0 : index
    %c0_206 = arith.constant 0 : index
    %628 = vector.load %arg18[%c0_205, %c0_206] : memref<1x32xf32, #tpu.memory_space<vmem>>, vector<1x32xf32>
    %629 = vector.broadcast %628 : vector<1x32xf32> to vector<3x32xf32>
    %630 = arith.addf %627, %629 : vector<3x32xf32>
    %cst_207 = arith.constant dense<0.000000e+00> : vector<3xf32>
    %631 = vector.multi_reduction <add>, %630, %cst_207 [1] : vector<3x32xf32> to vector<3xf32>
    %632 = vector.shape_cast %631 : vector<3xf32> to vector<3x1xf32>
    %cst_208 = arith.constant 3.200000e+01 : f32
    %633 = vector.broadcast %cst_208 : f32 to vector<3x1xf32>
    %634 = arith.divf %632, %633 : vector<3x1xf32>
    %635 = vector.broadcast %634 : vector<3x1xf32> to vector<3x32xf32>
    %636 = arith.subf %630, %635 : vector<3x32xf32>
    %637 = arith.mulf %636, %636 : vector<3x32xf32>
    %cst_209 = arith.constant dense<0.000000e+00> : vector<3xf32>
    %638 = vector.multi_reduction <add>, %637, %cst_209 [1] : vector<3x32xf32> to vector<3xf32>
    %639 = vector.shape_cast %638 : vector<3xf32> to vector<3x1xf32>
    %cst_210 = arith.constant 3.200000e+01 : f32
    %640 = vector.broadcast %cst_210 : f32 to vector<3x1xf32>
    %641 = arith.divf %639, %640 : vector<3x1xf32>
    %642 = vector.broadcast %634 : vector<3x1xf32> to vector<3x32xf32>
    %643 = arith.subf %630, %642 : vector<3x32xf32>
    %cst_211 = arith.constant 9.99999974E-6 : f32
    %644 = vector.broadcast %cst_211 : f32 to vector<3x1xf32>
    %645 = arith.addf %641, %644 : vector<3x1xf32>
    %646 = math.rsqrt %645 : vector<3x1xf32>
    %647 = vector.broadcast %646 : vector<3x1xf32> to vector<3x32xf32>
    %648 = arith.mulf %643, %647 : vector<3x32xf32>
    %c0_212 = arith.constant 0 : index
    %c0_213 = arith.constant 0 : index
    %649 = vector.load %arg19[%c0_212, %c0_213] : memref<1x32xf32, #tpu.memory_space<vmem>>, vector<1x32xf32>
    %650 = vector.broadcast %649 : vector<1x32xf32> to vector<3x32xf32>
    %651 = arith.mulf %648, %650 : vector<3x32xf32>
    %c0_214 = arith.constant 0 : index
    %c0_215 = arith.constant 0 : index
    %652 = vector.load %arg20[%c0_214, %c0_215] : memref<1x32xf32, #tpu.memory_space<vmem>>, vector<1x32xf32>
    %653 = vector.broadcast %652 : vector<1x32xf32> to vector<3x32xf32>
    %654 = arith.addf %651, %653 : vector<3x32xf32>
    %cst_216 = arith.constant 0.000000e+00 : f32
    %655 = vector.broadcast %cst_216 : f32 to vector<3x32xf32>
    %656 = arith.maximumf %654, %655 : vector<3x32xf32>
    %c0_217 = arith.constant 0 : index
    %c0_218 = arith.constant 0 : index
    %657 = vector.load %arg21[%c0_217, %c0_218] : memref<32x4xf32, #tpu.memory_space<vmem>>, vector<32x4xf32>
    %658 = arith.truncf %656 : vector<3x32xf32> to vector<3x32xbf16>
    %659 = arith.truncf %657 : vector<32x4xf32> to vector<32x4xbf16>
    %cst_219 = arith.constant dense<0.000000e+00> : vector<3x4xf32>
    %660 = tpu.matmul %658, %659, %cst_219 {dimension_numbers = #tpu.dot_dimension_numbers<[1], [0], [0], [1], [0, 0, 1, 1], [], []>} : vector<3x32xbf16>, vector<32x4xbf16>, vector<3x4xf32> -> vector<3x4xf32>
    %c0_220 = arith.constant 0 : index
    %c0_221 = arith.constant 0 : index
    %661 = vector.load %arg22[%c0_220, %c0_221] : memref<1x4xf32, #tpu.memory_space<vmem>>, vector<1x4xf32>
    %662 = vector.broadcast %661 : vector<1x4xf32> to vector<3x4xf32>
    %663 = arith.addf %660, %662 : vector<3x4xf32>
    %c0_222 = arith.constant 0 : index
    %c0_223 = arith.constant 0 : index
    %664 = vector.load %arg23[%c0_222, %c0_223] : memref<3x4xf32, #tpu.memory_space<vmem>>, vector<3x4xf32>
    tpu.vector_store %arg23[%c0_222, %c0_223], %663 {strides = array<i32>} : memref<3x4xf32, #tpu.memory_space<vmem>>, vector<3x4xf32>,
    return
  }
}

</mosaic_0001>

<bundles_post_ra>
// kernel: _lambda_.1
= control target key start
LH: loop header
LB: loop body
LE: loop exit
PB: predicated region body
PF: predicated region fallthrough
CT: control target
= control target key end

     0   :  { %s5062_s0 = inlined_call_operand.vmem [shape: f32[16,8], index: 0, kind: input, shape index: {}]   ;;  %s5063_s1 = inlined_call_operand.vmem [shape: f32[24,6], index: 1, kind: input, shape index: {}]   ;;  %s5064_s2 = inlined_call_operand.vmem [shape: s32[24,1], index: 2, kind: input, shape index: {}]   ;;  %s5065_s3 = inlined_call_operand.vmem [shape: s32[24,1], index: 3, kind: input, shape index: {}]   ;;  %s5066_s4 = inlined_call_operand.vmem [shape: s32[1,24], index: 4, kind: input, shape index: {}]   ;;  %s5067_s5 = inlined_call_operand.vmem [shape: s32[16,1], index: 5, kind: input, shape index: {}]   ;;  %s5068_s6 = inlined_call_operand.vmem [shape: s32[1,16], index: 6, kind: input, shape index: {}]   ;;  %s5069_s7 = inlined_call_operand.vmem [shape: f32[8,32], index: 7, kind: input, shape index: {}]   ;;  %s5070_s8 = inlined_call_operand.vmem [shape: f32[1,32], index: 8, kind: input, shape index: {}]   ;;  %s5071_s9 = inlined_call_operand.vmem [shape: f32[2,32,32], index: 9, kind: input, shape index: {}]   ;;  %s5072_s10 = inlined_call_operand.vmem [shape: f32[2,6,32], index: 10, kind: input, shape index: {}]   ;;  %s5073_s11 = inlined_call_operand.vmem [shape: f32[2,32,2], index: 11, kind: input, shape index: {}]   ;;  %s5074_s12 = inlined_call_operand.vmem [shape: f32[2,32,1], index: 12, kind: input, shape index: {}]   ;;  %s5075_s13 = inlined_call_operand.vmem [shape: f32[2,64,32], index: 13, kind: input, shape index: {}]   ;;  %s5076_s14 = inlined_call_operand.vmem [shape: f32[2,1,32], index: 14, kind: input, shape index: {}]   ;;  %s5077_s15 = inlined_call_operand.vmem [shape: f32[96,128], index: 15, kind: input, shape index: {}]   ;;  %s5078_s16 = inlined_call_operand.vmem [shape: f32[1,128], index: 16, kind: input, shape index: {}]   ;;  %s5079_s17 = inlined_call_operand.vmem [shape: f32[64,32], index: 17, kind: input, shape index: {}]   ;;  %s5080_s18 = inlined_call_operand.vmem [shape: f32[1,32], index: 18, kind: input, shape index: {}]   ;;  %s5081_s19 = inlined_call_operand.vmem [shape: f32[1,32], index: 19, kind: input, shape index: {}]   ;;  %s5082_s20 = inlined_call_operand.vmem [shape: f32[1,32], index: 20, kind: input, shape index: {}]   ;;  %s5083_s21 = inlined_call_operand.vmem [shape: f32[32,4], index: 21, kind: input, shape index: {}]   ;;  %s5084_s22 = inlined_call_operand.vmem [shape: f32[1,4], index: 22, kind: input, shape index: {}]   ;;  %s5085_s23 = inlined_call_operand.hbm [shape: f32[3,4], index: 23, kind: output, shape index: {}]  }
   0x1   :  { %5091 = sst [smem:[#allocation5_spill]] %s5062_s0 }
   0x2   :  { %5092 = sst [smem:[#allocation6_spill]] %s5063_s1 }
   0x3   :  { %5093 = sst [smem:[#allocation7_spill]] %s5064_s2 }
   0x4   :  { %5094 = sst [smem:[#allocation8_spill]] %s5065_s3 }
   0x5   :  { %5095 = sst [smem:[#allocation9_spill]] %s5066_s4 }
   0x6   :  { %5096 = sst [smem:[#allocation10_spill]] %s5067_s5 }
   0x7   :  { %5097 = sst [smem:[#allocation11_spill]] %s5068_s6 }
   0x8   :  { %5098 = sst [smem:[#allocation12_spill]] %s5069_s7 }
   0x9   :  { %s5099_s24 = sld [smem:[#allocation12_spill]]  ;;  %vm147_vm0 = vcmask 1043456   ;;  %s5100_s1 = sld [smem:[#allocation5_spill]]  ;;  %v3863_v3 = vmov 0.0   ;;  %vm3864_vm1 = vmmov 0  }
   0xa   :  { %3314 = vmatprep.subr.bf16.mxu0 %v3863_v3  ;;  %3316 = vmatprep.mubr.msk.bf16.mxu0 %vm3864_vm1, %v3863_v3 }
   0xf   :  { %v133_v0 = vld [vmem:[%s5099_s24] sm:$0xff]  ;;  %v132_v2 = vld [vmem:[%s5100_s1 + $0x8] sm:$0xff] }
  0x10   :  { %v131_v1 = vld [vmem:[%s5100_s1] sm:$0xff]  ;;  %v135_v4 = vpack.c.bf16 %v133_v0, %v133_v0 }
  0x11   :  { %28 = vsyncpa [#allocation3], 0  ;;  %3320 = vmatprep.subr.bf16.mxu1 %v3863_v3  ;;  %3324 = vmatprep.mubr.msk.bf16.mxu1 %vm3864_vm1, %v3863_v3  ;;  %v134_v6 = vpack.c.bf16 %v132_v2, %v131_v1  ;;  %vm143_vm2 = vcmask 64512   ;;  %v207_v7 = vld [vmem:[%s5071_s9] sm:$0xff]  ;;  %v208_v8 = vld [vmem:[%s5071_s9 + $0x8] sm:$0xff]  ;;  %vm214_vm5 = vcmask 261120   ;;  %v76_v59 = vlaneseq }
  0x12   :  { %v149_v5 = vsel %vm147_vm0, %v135_v4, 0  ;;  %v212_v9 = vpack.c.bf16 %v208_v8, %v207_v7  ;;  %v209_v10 = vld [vmem:[%s5071_s9 + $0x10] sm:$0xff]  ;;  %v210_v11 = vld [vmem:[%s5071_s9 + $0x18] sm:$0xff]  ;;  %v3091_v13 = vld [vmem:[%s5070_s8] ss:$0 sm:$0xff]  ;;  %vm270_vm6 = vcmask 1042432  }
  0x13   :  { %3315 = vmatpush3.bf16.msra.mxu0 %v149_v5  ;;  %v213_v12 = vpack.c.bf16 %v210_v11, %v209_v10  ;;  %v322_v27 = vld [vmem:[%s5073_s11] sm:$0xff]  ;;  %v323_v28 = vld [vmem:[%s5073_s11 + $0x8] sm:$0xff]  ;;  %v324_v34 = vld [vmem:[%s5073_s11 + $0x10] sm:$0xff]  ;;  %s5101_s0 = sld [smem:[#allocation6_spill]]  ;;  %vm263_vm7 = vcmask 48128   ;;  %s5102_s1 = sld [smem:[#allocation7_spill]] }
  0x14   :  { %3321 = vmatpush3.bf16.msra.mxu1 %v212_v9  ;;  %v327_v32 = vpack.c.bf16 %v323_v28, %v322_v27  ;;  %v325_v35 = vld [vmem:[%s5073_s11 + $0x18] sm:$0xff]  ;;  %v259_v37 = vld [vmem:[%s5072_s10] sm:$0x3f]  ;;  %v3865_v44 = vmov 0   ;;  %s5103_s29 = sld [smem:[#allocation8_spill]]  ;;  %v4098_v62 = vand.u32 127, %v76_v59 }
  0x15   :  { %3322 = vmatprep.subr.bf16.mxu1 %v3863_v3  ;;  %v328_v36 = vpack.c.bf16 %v325_v35, %v324_v34  ;;  %v262_v40 = vpack.c.bf16 %v259_v37, %v259_v37  ;;  %3670 = vset.pattern.permute.xlu0 %v3865_v44  ;;  %vm374_vm12 = vcmask 130048   ;;  %s3866_s27 = smov 127   ;;  %s3867_s7 = smov 32  }
  0x16   :  { %3317 = vmatmul.mubr.msk.bf16.vlgmr.msra.gmra.mrb[0].mxu0 %vm143_vm2, %v134_v6  ;;  %3671 = vset.pattern.permute.xlu1 %v3865_v44  ;;  %s5110_s28 = sld [smem:[#allocation9_spill]]  ;;  %s3869_s26 = smov 64  }
  0x17   :  { %3658 = vmatprep.subr.msk.bf16.mxu0 %vm270_vm6, %v262_v40  ;;  %v272_v46 = vsel %vm270_vm6, %v262_v40, 0 }
  0x18   :  { %3323 = vmatpush3.bf16.msra.mxu1 %v213_v12  ;;  %3329 = vmatpush3.bf16.msra.mxu0 %v272_v46 }
  0x19   :  { %3334 = vmatprep.subr.bf16.mxu1 %v3863_v3  ;;  %v204_v38 = vld [vmem:[%s5101_s0] sm:$0xff]  ;;  %v205_v39 = vld [vmem:[%s5101_s0 + $0x8] sm:$0xff]  ;;  %v206_v42 = vld [vmem:[%s5101_s0 + $0x10] sm:$0xff] }
  0x1a   :  { %v4057_v41 = vpack.c.bf16 %v205_v39, %v204_v38  ;;  %v78_v43 = vld [vmem:[%s5102_s1] sm:$0xff]  ;;  %v80_v45 = vld [vmem:[%s5102_s1 + $0x10] sm:$0xff]  ;;  %v4072_v47 = vpack.c.bf16 %v206_v42, %v206_v42  ;;  %v79_v48 = vld [vmem:[%s5102_s1 + $0x8] sm:$0xff] }
  0x1b   :  { %82 = vperm.xlu0 %3670, %v78_v43   ;;  %88 = vperm.xlu1 %3671, %v80_v45   ;;  %v93_v49 = vld [vmem:[%s5103_s29] sm:$0xff]  ;;  %v94_v50 = vld [vmem:[%s5103_s29 + $0x8] sm:$0xff]  ;;  %v95_v51 = vld [vmem:[%s5103_s29 + $0x10] sm:$0xff]  ;;  %s3872_s29 = smov [#allocation2]  }
  0x1c   :  { %3330 = vmatprep.mubr.msk.bf16.mxu0 %vm263_vm7, %v4057_v41 }
  0x1e   :  { %3331 = vmatmul.mubr.msk.bf16.vlgmr.msra.gmra.mrb[4].mxu0 %vm263_vm7, %v4072_v47 }
  0x1f   :  { %85 = vperm.xlu0 %3670, %v79_v48   ;;  %97 = vperm.xlu1 %3671, %v93_v49  }
  0x23   :  { %100 = vperm.xlu0 %3670, %v94_v50   ;;  %103 = vperm.xlu1 %3671, %v95_v51  }
  0x9a   :  { %v83_v58 = vpop.permute.xlu0 %82  ;;  %v89_v60 = vpop.permute.xlu1 %88 }
  0x9b   :  { %vm90_vm8 = vcmp.eq.s32.totalorder %v83_v58, %v4098_v62  ;;  %vm92_vm13 = vcmp.eq.s32.totalorder %v89_v60, %v4098_v62 }
  0x9c   :  { %v108_v1 = vsel %vm90_vm8, 1.0, %v3863_v3 }
  0x9e   :  { %v86_v61 = vpop.permute.xlu0 %85  ;;  %v98_v63 = vpop.permute.xlu1 %97 }
  0x9f   :  { %vm91_vm9 = vcmp.eq.s32.totalorder %v86_v61, %v4098_v62  ;;  %vm4105_vm10 = vcmp.eq.s32.totalorder %v98_v63, %v4098_v62 }
  0xa0   :  { %v109_v2 = vsel %vm91_vm9, 1.0, %v3863_v3  ;;  %v113_v7 = vsel %vm4105_vm10, 1.0, %v3863_v3  ;;  %vm1607_vm9 = vcmask 23552  }
  0xa1   :  { %v4114_v6 = vpack.c.bf16 %v109_v2, %v108_v1 }
  0xa2   :  { %v101_v0 = vpop.permute.xlu0 %100 }
  0xa3   :  { %vm4110_vm11 = vcmp.eq.s32.totalorder %v101_v0, %v4098_v62 }
  0xa4   :  { %v114_v8 = vsel %vm4110_vm11, 1.0, %v3863_v3 }
  0xa5   :  { %v4122_v9 = vpack.c.bf16 %v114_v8, %v113_v7 }
  0xa7   :  { %3344 = vmatprep.mubr.msk.bf16.mxu0 %vm374_vm12, %v4122_v9 }
  0xe9   :  { %v185_v14 = vpop.f32.mrb[0].mxu0 }
  0xea   :  { %v186_v15 = vadd.f32 %v3091_v13, %v185_v14  ;;  %v3318_v16 = vpop.f32.mrb[1].mxu0 }
  0xeb   :  { %v188_v17 = vpop.f32.mrb[2].mxu0 }
  0xec   :  { %v194_v18 = vmin.f32 %v186_v15, 0.0  ;;  %v189_v19 = vadd.f32 %v3091_v13, %v188_v17  ;;  %v3319_v20 = vpop.f32.mrb[3].mxu0  ;;  %vm192_vm3 = vcmp.gt.f32.partialorder %v186_v15, 0.0 }
  0xee   :  { %v196_v21 = vmul.f32 1.442695, %v194_v18  ;;  %v195_v22 = vmin.f32 %v189_v19, 0.0  ;;  %vm193_vm4 = vcmp.gt.f32.partialorder %v189_v19, 0.0  ;;  %v498_v18 = vld [vmem:[%s5074_s12] sm:$0xff] }
  0xf0   :  { %3712 = vpow2.f32 %v196_v21  ;;  %v198_v23 = vmul.f32 1.442695, %v195_v22  ;;  %v110_v21 = vsel %vm92_vm13, 1.0, %v3863_v3 }
  0xf1   :  { %v3332_v10 = vpop.f32.mrb[4].mxu0  ;;  %v4144_v27 = vpack.c.bf16 %v110_v21, %v110_v21 }
  0xf2   :  { %3714 = vpow2.f32 %v198_v23  ;;  %v308_v11 = vpop.f32.mrb[5].mxu0  ;;  %v503_v34 = vpack.c.bf16 %v3332_v10, %v3332_v10 }
  0xf3   :  { %v3333_v12 = vpop.f32.mrb[6].mxu0 }
  0xf4   :  { %v311_v13 = vpop.f32.mrb[7].mxu0 }
  0xf5   :  { %v502_v14 = vpack.c.bf16 %v311_v13, %v308_v11 }
  0xfa   :  { %v3713_v24 = vpop.eup %3712 }
  0xfb   :  { %v3093_v25 = vadd.f32 -1.0, %v3713_v24 }
  0xfc   :  { %v3715_v26 = vpop.eup %3714 }
  0xfd   :  { %v3094_v29 = vadd.f32 -1.0, %v3715_v26  ;;  %v4032_v30 = vsel %vm192_vm3, %v186_v15, %v3093_v25  ;;  %v104_v15 = vpop.permute.xlu1 %103  ;;  %vm734_vm3 = vcmask 195584  }
  0xfe   :  { %vm4130_vm14 = vcmp.eq.s32.totalorder %v104_v15, %v4098_v62 }
  0xff   :  { %v4034_v31 = vsel %vm193_vm4, %v189_v19, %v3094_v29  ;;  %v499_v19 = vld [vmem:[%s5074_s12 + $0x8] sm:$0xff]  ;;  %v115_v23 = vsel %vm4130_vm14, 1.0, %v3863_v3  ;;  %v500_v29 = vld [vmem:[%s5074_s12 + $0x10] sm:$0xff]  ;;  %vm812_vm4 = vcmask 523264  }
 0x100   :  { %v211_v33 = vpack.c.bf16 %v4034_v31, %v4032_v30  ;;  %v504_v26 = vpack.c.bf16 %v499_v19, %v498_v18  ;;  %v4146_v28 = vpack.c.bf16 %v115_v23, %v115_v23 }
 0x102   :  { %3325 = vmatmul.mubr.msk.bf16.vlgmr.msra.gmra.mrb[0].mxu1 %vm214_vm5, %v211_v33 }
 0x103   :  { %3335 = vmatpush3.bf16.msra.mxu1 %v327_v32  ;;  %3338 = vmatprep.mubr.msk.bf16.mxu1 %vm3864_vm1, %v3863_v3  ;;  %v501_v32 = vld [vmem:[%s5074_s12 + $0x18] sm:$0xff] }
 0x104   :  { %3336 = vmatprep.subr.bf16.mxu1 %v3863_v3  ;;  %v505_v33 = vpack.c.bf16 %v501_v32, %v500_v29 }
 0x107   :  { %3337 = vmatpush3.bf16.msra.mxu1 %v328_v36 }
 0x1d5   :  { %v4088_v52 = vpop.f32.mrb[0].mxu1 }
 0x1d6   :  { %v3326_v53 = vpop.f32.mrb[1].mxu1 }
 0x1d7   :  { %v4090_v54 = vpop.f32.mrb[2].mxu1 }
 0x1d8   :  { %v3672_v55 = vpack.i.bf16 %v4090_v54, %v4088_v52  ;;  %v326_v56 = vpack.c.bf16 %v4090_v54, %v4088_v52  ;;  %v3327_v57 = vpop.f32.mrb[3].mxu1  ;;  %v796_v54 = vld [vmem:[%s5075_s13 + $0x20] sm:$0xff] }
 0x1da   :  { %3339 = vmatmul.mubr.msk.bf16.vlgmr.msra.gmra.mrb[4].mxu1 %vm214_vm5, %v326_v56 }
 0x1db   :  { %3350 = vmatprep.mubr.msk.bf16.mxu1 %vm374_vm12, %v4114_v6 }
 0x2ad   :  { %v366_v17 = vpop.f32.mrb[4].mxu1 }
 0x2ae   :  { %v3340_v20 = vpop.f32.mrb[5].mxu1 }
 0x2af   :  { %v369_v22 = vpop.f32.mrb[6].mxu1 }
 0x2b0   :  { %v373_v24 = vpack.c.bf16 %v369_v22, %v366_v17  ;;  %v3341_v25 = vpop.f32.mrb[7].mxu1 }
 0x2b2   :  { %3342 = vmatprep.subr.bf16.mxu0 %v373_v24  ;;  %3348 = vmatprep.subr.bf16.mxu1 %v373_v24 }
 0x2b3   :  { %3343 = vmatpush3.bf16.msra.mxu0 %v373_v24  ;;  %3349 = vmatpush3.bf16.msra.mxu1 %v373_v24 }
 0x2b4   :  { %3362 = vmatprep.subr.bf16.mxu1 %v326_v56  ;;  %3354 = vmatprep.subr.bf16.mxu0 %v504_v26 }
 0x2b6   :  { %3345 = vmatmul.mubr.msk.bf16.vlgmr.msra.gmra.mrb[8].mxu0 %vm374_vm12, %v4146_v28  ;;  %3351 = vmatmul.mubr.msk.bf16.vlgmr.msra.gmra.mrb[8].mxu1 %vm374_vm12, %v4144_v27 }
 0x2b7   :  { %3363 = vmatpush3.bf16.msra.mxu1 %v326_v56  ;;  %3364 = vmatprep.mubr.msk.bf16.mxu1 %vm374_vm12, %v4114_v6 }
 0x2b8   :  { %3355 = vmatpush3.bf16.msra.mxu0 %v504_v26  ;;  %3358 = vmatprep.mubr.msk.bf16.mxu0 %vm214_vm5, %v502_v14 }
 0x2b9   :  { %3356 = vmatprep.subr.bf16.mxu0 %v505_v33  ;;  %3376 = vmatprep.subr.bf16.mxu1 %v3863_v3 }
 0x2bc   :  { %3357 = vmatpush3.bf16.msra.mxu0 %v505_v33 }
 0x2bd   :  { %3368 = vmatprep.subr.bf16.mxu0 %v3863_v3 }
 0x2be   :  { %3365 = vmatmul.mubr.msk.bf16.vlgmr.msra.gmra.mrb[12].mxu1 %vm374_vm12, %v4144_v27 }
 0x2bf   :  { %3384 = vmatprep.mubr.msk.bf16.mxu1 %vm3864_vm1, %v3863_v3 }
 0x2c2   :  { %3359 = vmatmul.mubr.msk.bf16.vlgmr.msra.gmra.mrb[8].mxu0 %vm214_vm5, %v503_v34 }
 0x2c3   :  { %3372 = vmatprep.mubr.msk.bf16.mxu0 %vm3864_vm1, %v3863_v3 }
 0x389   :  { %v3352_v35 = vpop.f32.mrb[8].mxu1 }
 0x38a   :  { %v469_v36 = vpop.f32.mrb[9].mxu1 }
 0x38b   :  { %486 = vrot.lane.b32.xlu0 %v469_v36, %s3866_s27  ;;  %v3353_v37 = vpop.f32.mrb[10].mxu1 }
 0x38c   :  { %v472_v38 = vpop.f32.mrb[11].mxu1 }
 0x38d   :  { %488 = vrot.lane.b32.xlu1 %v472_v38, %s3866_s27 }
 0x38f   :  { %490 = vrot.lane.b32.xlu0 %v3352_v35, %s3866_s27 }
 0x391   :  { %v3366_v39 = vpop.f32.mrb[12].mxu1 }
 0x392   :  { %v4173_v40 = vmul.f32 %v3366_v39, %v3332_v10  ;;  %v697_v42 = vpop.f32.mrb[13].mxu1 }
 0x393   :  { %v4175_v43 = vmul.f32 %v697_v42, %v308_v11  ;;  %v3367_v44 = vpop.f32.mrb[14].mxu1 }
 0x394   :  { %v700_v45 = vpop.f32.mrb[15].mxu1 }
 0x395   :  { %v4177_v46 = vmul.f32 %v700_v45, %v311_v13  ;;  %v3360_v48 = vpop.f32.mrb[8].mxu0 }
 0x396   :  { %v546_v49 = vpop.f32.mrb[9].mxu0 }
 0x397   :  { %v3361_v50 = vpop.f32.mrb[10].mxu0 }
 0x398   :  { %v549_v51 = vpop.f32.mrb[11].mxu0 }
 0x3fd   :  { %v487_v53 = vpop.permute.xlu0 %486 }
 0x3fe   :  { %v3645_v56 = vadd.f32 %v546_v49, %v487_v53 }
 0x3ff   :  { %v489_v57 = vpop.permute.xlu1 %488 }
 0x400   :  { %v3646_v58 = vadd.f32 %v549_v51, %v489_v57  ;;  %565 = vperm.xlu1 %3671, %v3645_v56  }
 0x401   :  { %v491_v60 = vpop.permute.xlu0 %490 }
 0x402   :  { %v3644_v61 = vadd.f32 %v3360_v48, %v491_v60  ;;  %570 = vperm.xlu0 %3670, %v3646_v58  }
 0x404   :  { %575 = vperm.xlu1 %3671, %v3644_v61  }
 0x47f   :  { %v566_v63 = vpop.permute.xlu1 %565 }
 0x480   :  { %v578_v0 = vsel %vm4105_vm10, %v566_v63, -1e+30 }
 0x481   :  { %v571_v1 = vpop.permute.xlu0 %570  ;;  %v581_v7 = vsel %vm374_vm12, %v578_v0, -inf }
 0x482   :  { %v579_v2 = vsel %vm4110_vm11, %v571_v1, -1e+30 }
 0x483   :  { %v582_v8 = vsel %vm374_vm12, %v579_v2, -inf  ;;  %v576_v10 = vpop.permute.xlu1 %575 }
 0x484   :  { %v584_v11 = vmax.f32 %v581_v7, %v582_v8  ;;  %v580_v12 = vsel %vm4130_vm14, %v576_v10, -1e+30 }
 0x485   :  { %v583_v13 = vsel %vm374_vm12, %v580_v12, -inf }
 0x486   :  { %v585_v14 = vmax.f32 %v584_v11, %v583_v13 }
 0x488   :  { %v586_v15 = vrot.slane %v585_v14, 4 }
 0x48a   :  { %v587_v17 = vmax.f32 %v585_v14, %v586_v15 }
 0x48c   :  { %v588_v18 = vrot.slane %v587_v17, 2 }
 0x48e   :  { %v589_v19 = vmax.f32 %v587_v17, %v588_v18 }
 0x490   :  { %v590_v20 = vrot.slane %v589_v19, 1 }
 0x492   :  { %v591_v21 = vmax.f32 %v589_v19, %v590_v20 }
 0x494   :  { %v593_v22 = vsel %vm4110_vm11, %v591_v21, 0.0  ;;  %v592_v23 = vsel %vm4105_vm10, %v591_v21, 0.0  ;;  %v594_v26 = vsel %vm4130_vm14, %v591_v21, 0.0 }
 0x495   :  { %v598_v24 = vsel %vm374_vm12, %v593_v22, 0.0  ;;  %v595_v25 = vsel %vm374_vm12, %v592_v23, 0.0  ;;  %v601_v29 = vsel %vm374_vm12, %v594_v26, 0.0 }
 0x496   :  { %599 = vadd.xlane.f32.xlu1 %v598_v24  ;;  %596 = vadd.xlane.f32.xlu0 %v595_v25 }
 0x49a   :  { %602 = vadd.xlane.f32.xlu0 %v601_v29 }
 0x523   :  { %v600_v32 = vpop.xlane.xlu1 %599  ;;  %v597_v33 = vpop.xlane.xlu0 %596 }
 0x524   :  { %v605_v34 = vsub.f32 %v3646_v58, %v600_v32  ;;  %v604_v35 = vsub.f32 %v3645_v56, %v597_v33 }
 0x526   :  { %v609_v36 = vmul.f32 1.442695, %v605_v34  ;;  %v607_v37 = vmul.f32 1.442695, %v604_v35  ;;  %v792_v35 = vld [vmem:[%s5075_s13] sm:$0xff] }
 0x527   :  { %v603_v38 = vpop.xlane.xlu0 %602 }
 0x528   :  { %3716 = vpow2.f32 %v609_v36  ;;  %v606_v39 = vsub.f32 %v3644_v61, %v603_v38  ;;  %v793_v36 = vld [vmem:[%s5075_s13 + $0x8] sm:$0xff] }
 0x529   :  { %3718 = vpow2.f32 %v607_v37  ;;  %v794_v37 = vld [vmem:[%s5075_s13 + $0x10] sm:$0xff]  ;;  %v801_v38 = vpack.c.bf16 %v793_v36, %v792_v35 }
 0x52a   :  { %v611_v42 = vmul.f32 1.442695, %v606_v39  ;;  %v795_v39 = vld [vmem:[%s5075_s13 + $0x18] sm:$0xff] }
 0x52b   :  { %3377 = vmatpush3.bf16.msra.mxu1 %v801_v38  ;;  %v802_v52 = vpack.c.bf16 %v795_v39, %v794_v37 }
 0x52c   :  { %3720 = vpow2.f32 %v611_v42  ;;  %3378 = vmatprep.subr.bf16.mxu1 %v3863_v3 }
 0x52f   :  { %3379 = vmatpush3.bf16.msra.mxu1 %v802_v52 }
 0x530   :  { %3380 = vmatprep.subr.bf16.mxu1 %v3863_v3 }
 0x532   :  { %v3717_v44 = vpop.eup %3716 }
 0x533   :  { %v3719_v45 = vpop.eup %3718  ;;  %620 = vperm.xlu1 %3671, %v3717_v44  }
 0x534   :  { %615 = vperm.xlu0 %3670, %v3719_v45  }
 0x536   :  { %v3721_v48 = vpop.eup %3720 }
 0x537   :  { %625 = vperm.xlu1 %3671, %v3721_v48  }
 0x5b2   :  { %v621_v49 = vpop.permute.xlu1 %620 }
 0x5b3   :  { %v629_v50 = vsel %vm4110_vm11, %v621_v49, 0.0  ;;  %v616_v51 = vpop.permute.xlu0 %615  ;;  %v3090_v49 = vld [vmem:[%s5110_s28] ss:$0 sm:$0xff] }
 0x5b4   :  { %v632_v53 = vsel %vm374_vm12, %v629_v50, 0.0  ;;  %v628_v56 = vsel %vm4105_vm10, %v616_v51, 0.0 }
 0x5b5   :  { %v631_v57 = vsel %vm374_vm12, %v628_v56, 0.0 }
 0x5b6   :  { %v626_v58 = vpop.permute.xlu1 %625  ;;  %v633_v60 = vadd.f32 %v632_v53, %v631_v57 }
 0x5b7   :  { %v630_v61 = vsel %vm4130_vm14, %v626_v58, 0.0 }
 0x5b8   :  { %v634_v63 = vsel %vm374_vm12, %v630_v61, 0.0 }
 0x5b9   :  { %v635_v0 = vadd.f32 %v634_v63, %v633_v60 }
 0x5bb   :  { %v636_v1 = vrot.slane %v635_v0, 4 }
 0x5bd   :  { %v637_v2 = vadd.f32 %v636_v1, %v635_v0 }
 0x5bf   :  { %v638_v7 = vrot.slane %v637_v2, 2 }
 0x5c1   :  { %v639_v8 = vadd.f32 %v638_v7, %v637_v2 }
 0x5c3   :  { %v640_v10 = vrot.slane %v639_v8, 1 }
 0x5c5   :  { %v641_v11 = vadd.f32 %v640_v10, %v639_v8 }
 0x5c7   :  { %v643_v12 = vsel %vm4110_vm11, %v641_v11, 0.0  ;;  %v642_v13 = vsel %vm4105_vm10, %v641_v11, 0.0  ;;  %v644_v17 = vsel %vm4130_vm14, %v641_v11, 0.0 }
 0x5c8   :  { %v648_v14 = vsel %vm374_vm12, %v643_v12, 0.0  ;;  %v645_v15 = vsel %vm374_vm12, %v642_v13, 0.0  ;;  %v651_v18 = vsel %vm374_vm12, %v644_v17, 0.0  ;;  %v3110_v17 = vld [vmem:[%s5071_s9 + $0x20] sm:$0xff] }
 0x5c9   :  { %649 = vadd.xlane.f32.xlu1 %v648_v14  ;;  %646 = vadd.xlane.f32.xlu0 %v645_v15 }
 0x5cd   :  { %652 = vadd.xlane.f32.xlu0 %v651_v18  ;;  %v3111_v18 = vld [vmem:[%s5071_s9 + $0x28] sm:$0xff] }
 0x656   :  { %v650_v19 = vpop.xlane.xlu1 %649  ;;  %v647_v20 = vpop.xlane.xlu0 %646 }
 0x657   :  { %v655_v21 = vadd.f32 1e-16, %v650_v19  ;;  %v654_v22 = vadd.f32 1e-16, %v647_v20  ;;  %v865_v19 = vpack.c.bf16 %v3111_v18, %v3110_v17  ;;  %v3112_v20 = vld [vmem:[%s5071_s9 + $0x30] sm:$0xff] }
 0x659   :  { %3722 = vrcp.f32 %v655_v21  ;;  %v3113_v21 = vld [vmem:[%s5071_s9 + $0x38] sm:$0xff]  ;;  %s5111_s9 = sld [smem:[#allocation10_spill]] }
 0x65a   :  { %3724 = vrcp.f32 %v654_v22  ;;  %v653_v23 = vpop.xlane.xlu0 %652  ;;  %v866_v22 = vpack.c.bf16 %v3113_v21, %v3112_v20 }
 0x65b   :  { %v656_v24 = vadd.f32 1e-16, %v653_v23  ;;  %v3115_v23 = vld [vmem:[%s5072_s10 + $0x8] sm:$0x3f] }
 0x65d   :  { %3726 = vrcp.f32 %v656_v24  ;;  %v913_v24 = vpack.c.bf16 %v3115_v23, %v3115_v23 }
 0x663   :  { %v3723_v25 = vpop.eup %3722 }
 0x664   :  { %v3725_v26 = vpop.eup %3724  ;;  %v660_v29 = vmul.f32 %v3723_v25, %v3717_v44  ;;  %v4241_v44 = vshrl.u32 %v76_v59, 7  ;;  %v3118_v25 = vld [vmem:[%s5073_s11 + $0x20] sm:$0xff] }
 0x665   :  { %v658_v32 = vmul.f32 %v3725_v26, %v3719_v45  ;;  %v3119_v26 = vld [vmem:[%s5073_s11 + $0x28] sm:$0xff] }
 0x666   :  { %721 = vperm.xlu1 %3671, %v660_v29   ;;  %v121_v45 = vadd.s32 8, %v4241_v44  ;;  %vm126_vm15 = vcmp.eq.s32.totalorder %v3090_v49, %v4241_v44  ;;  %v971_v29 = vpack.c.bf16 %v3119_v26, %v3118_v25 }
 0x667   :  { %v3727_v33 = vpop.eup %3726  ;;  %716 = vperm.xlu0 %3670, %v658_v32   ;;  %v128_v58 = vsel %vm126_vm15, 1.0, %v3863_v3  ;;  %v3108_v32 = vld [vmem:[%s5076_s14] ss:$0 sm:$0xff] }
 0x668   :  { %v662_v34 = vmul.f32 %v3727_v33, %v3721_v48  ;;  %vm127_vm2 = vcmp.eq.s32.totalorder %v3090_v49, %v121_v45 }
 0x669   :  { %v129_v60 = vsel %vm127_vm2, 1.0, %v3863_v3 }
 0x66a   :  { %726 = vperm.xlu1 %3671, %v662_v34   ;;  %v4255_v63 = vpack.c.bf16 %v129_v60, %v128_v58  ;;  %v3127_v58 = vld [vmem:[%s5074_s12 + $0x20] sm:$0xff]  ;;  %v3128_v60 = vld [vmem:[%s5074_s12 + $0x28] sm:$0xff] }
 0x66b   :  { %3673 = vrot.lane.b32.xlu0 %v3672_v55, %s3867_s7  ;;  %v797_v55 = vld [vmem:[%s5075_s13 + $0x28] sm:$0xff] }
 0x66c   :  { %v803_v42 = vpack.c.bf16 %v797_v55, %v796_v54  ;;  %v915_v55 = vsel %vm270_vm6, %v913_v24, 0 }
 0x66e   :  { %3381 = vmatpush3.bf16.msra.mxu1 %v803_v42 }
 0x66f   :  { %3382 = vmatprep.subr.bf16.mxu1 %v3863_v3 }
 0x6e5   :  { %v722_v48 = vpop.permute.xlu1 %721 }
 0x6e6   :  { %v730_v50 = vmul.f32 %v722_v48, %v4177_v46  ;;  %v717_v51 = vpop.permute.xlu0 %716 }
 0x6e7   :  { %v729_v53 = vmul.f32 %v717_v51, %v4175_v43  ;;  %v799_v43 = vld [vmem:[%s5075_s13 + $0x38] sm:$0xff] }
 0x6e9   :  { %v732_v56 = vpack.c.bf16 %v730_v50, %v729_v53  ;;  %v727_v57 = vpop.permute.xlu1 %726 }
 0x6ea   :  { %v731_v59 = vmul.f32 %v727_v57, %v4173_v40  ;;  %v798_v40 = vld [vmem:[%s5075_s13 + $0x30] sm:$0xff]  ;;  %v3674_v1 = vpop.permute.xlu0 %3673 }
 0x6eb   :  { %3369 = vmatpush3.bf16.msra.mxu0 %v732_v56  ;;  %v804_v0 = vpack.c.bf16 %v799_v43, %v798_v40  ;;  %v3676_v7 = vunpack.i.h.bf16 %v3674_v1  ;;  %v3675_v8 = vunpack.i.l.bf16 %v3674_v1  ;;  %v3129_v1 = vld [vmem:[%s5074_s12 + $0x30] sm:$0xff] }
 0x6ec   :  { %v733_v61 = vpack.c.bf16 %v731_v59, %v731_v59  ;;  %3370 = vmatprep.subr.bf16.mxu0 %v3863_v3 }
 0x6ed   :  { %3383 = vmatpush3.bf16.msra.mxu1 %v804_v0  ;;  %v1136_v0 = vpack.c.bf16 %v3128_v60, %v3127_v58 }
 0x6ee   :  { %v739_v46 = vsel %vm147_vm0, %v733_v61, 0  ;;  %3402 = vmatprep.subr.bf16.mxu1 %v3863_v3 }
 0x6ef   :  { %3371 = vmatpush3.bf16.msra.mxu0 %v739_v46 }
 0x6f0   :  { %3388 = vmatprep.subr.bf16.mxu0 %v3863_v3 }
 0x6f2   :  { %3373 = vmatmul.mubr.msk.bf16.vlgmr.msra.gmra.mrb[12].mxu0 %vm734_vm3, %v4255_v63 }
 0x6f3   :  { %3392 = vmatprep.mubr.msk.bf16.mxu0 %vm3864_vm1, %v3863_v3  ;;  %3389 = vmatpush3.bf16.msra.mxu0 %v865_v19 }
 0x6f4   :  { %3390 = vmatprep.subr.bf16.mxu0 %v3863_v3 }
 0x6f7   :  { %3391 = vmatpush3.bf16.msra.mxu0 %v866_v22 }
 0x6f8   :  { %3659 = vmatprep.subr.msk.bf16.mxu0 %vm270_vm6, %v913_v24  ;;  %vm1612_vm6 = vcmask 1041408  }
 0x7c5   :  { %v775_v2 = vpop.f32.mrb[12].mxu0 }
 0x7c6   :  { %v3374_v10 = vpop.f32.mrb[13].mxu0  ;;  %v790_v12 = vsel %vm214_vm5, %v775_v2, %v3675_v8  ;;  %v3130_v2 = vld [vmem:[%s5074_s12 + $0x38] sm:$0xff]  ;;  %s3082_s12 = sshll.u32 %s3872_s29, 4  ;;  %s3083_s12 = int_to_ptr.vmem [resolvable:$true] %s3082_s12 }
 0x7c7   :  { %v778_v11 = vpop.f32.mrb[14].mxu0  ;;  %p3844_p1 = scmp.lt.s32.totalorder %s3083_s12, %s3083_s12 }
 0x7c8   :  { %v791_v13 = vsel %vm214_vm5, %v778_v11, %v3676_v7  ;;  %v3375_v14 = vpop.f32.mrb[15].mxu0  ;;  %v1137_v7 = vpack.c.bf16 %v3130_v2, %v3129_v1 }
 0x7c9   :  { %v800_v15 = vpack.c.bf16 %v791_v13, %v790_v12 }
 0x7cb   :  { %3385 = vmatmul.mubr.msk.bf16.vlgmr.msra.gmra.mrb[16].mxu1 %vm812_vm4, %v800_v15 }
 0x7cc   :  { %3406 = vmatprep.mubr.msk.bf16.mxu1 %vm3864_vm1, %v3863_v3  ;;  %3403 = vmatpush3.bf16.msra.mxu1 %v971_v29 }
 0x7cd   :  { %3404 = vmatprep.subr.bf16.mxu1 %v3863_v3 }
 0x89e   :  { %v850_v33 = vpop.f32.mrb[16].mxu1 }
 0x89f   :  { %v851_v34 = vadd.f32 %v3108_v32, %v850_v33  ;;  %v3386_v35 = vpop.f32.mrb[17].mxu1 }
 0x8a0   :  { %v853_v36 = vpop.f32.mrb[18].mxu1 }
 0x8a1   :  { %v854_v37 = vadd.f32 %v3108_v32, %v853_v36  ;;  %v3387_v38 = vpop.f32.mrb[19].mxu1  ;;  %v4302_v39 = vadd.f32 %v851_v34, %v4032_v30  ;;  %v3120_v30 = vld [vmem:[%s5073_s11 + $0x30] sm:$0xff] }
 0x8a3   :  { %v4305_v52 = vadd.f32 %v854_v37, %v4034_v31  ;;  %v3121_v31 = vld [vmem:[%s5073_s11 + $0x38] sm:$0xff]  ;;  %s5116_s11 = sld [smem:[#allocation11_spill]] }
 0x8a4   :  { %v972_v42 = vpack.c.bf16 %v3121_v31, %v3120_v30 }
 0x8a5   :  { %v864_v54 = vpack.c.bf16 %v4305_v52, %v4302_v39 }
 0x8a6   :  { %3405 = vmatpush3.bf16.msra.mxu1 %v972_v42 }
 0x8a7   :  { %3393 = vmatmul.mubr.msk.bf16.vlgmr.msra.gmra.mrb[16].mxu0 %vm214_vm5, %v864_v54 }
 0x8a8   :  { %3397 = vmatpush3.bf16.msra.mxu0 %v915_v55  ;;  %3398 = vmatprep.mubr.msk.bf16.mxu0 %vm263_vm7, %v4057_v41 }
 0x8af   :  { %3399 = vmatmul.mubr.msk.bf16.vlgmr.msra.gmra.mrb[20].mxu0 %vm263_vm7, %v4072_v47 }
 0x8b0   :  { %3412 = vmatprep.mubr.msk.bf16.mxu0 %vm374_vm12, %v4122_v9 }
 0x97a   :  { %v4323_v45 = vpop.f32.mrb[16].mxu0 }
 0x97b   :  { %v3394_v48 = vpop.f32.mrb[17].mxu0 }
 0x97c   :  { %v4325_v41 = vpop.f32.mrb[18].mxu0 }
 0x97d   :  { %v3677_v47 = vpack.i.bf16 %v4325_v41, %v4323_v45  ;;  %v970_v9 = vpack.c.bf16 %v4325_v41, %v4323_v45  ;;  %v3395_v49 = vpop.f32.mrb[19].mxu0 }
 0x97f   :  { %3407 = vmatmul.mubr.msk.bf16.vlgmr.msra.gmra.mrb[20].mxu1 %vm214_vm5, %v970_v9 }
 0x980   :  { %3418 = vmatprep.mubr.msk.bf16.mxu1 %vm374_vm12, %v4114_v6 }
 0x982   :  { %v3400_v50 = vpop.f32.mrb[20].mxu0 }
 0x983   :  { %v951_v51 = vpop.f32.mrb[21].mxu0  ;;  %v1135_v8 = vpack.c.bf16 %v3400_v50, %v3400_v50 }
 0x984   :  { %v3401_v53 = vpop.f32.mrb[22].mxu0 }
 0x985   :  { %v954_v56 = vpop.f32.mrb[23].mxu0 }
 0x986   :  { %v1134_v57 = vpack.c.bf16 %v954_v56, %v951_v51 }
 0xa52   :  { %v1010_v59 = vpop.f32.mrb[20].mxu1 }
 0xa53   :  { %v3408_v61 = vpop.f32.mrb[21].mxu1 }
 0xa54   :  { %v1013_v46 = vpop.f32.mrb[22].mxu1 }
 0xa55   :  { %v1017_v40 = vpack.c.bf16 %v1013_v46, %v1010_v59  ;;  %v3409_v43 = vpop.f32.mrb[23].mxu1 }
 0xa57   :  { %3410 = vmatprep.subr.bf16.mxu0 %v1017_v40  ;;  %3416 = vmatprep.subr.bf16.mxu1 %v1017_v40 }
 0xa58   :  { %3411 = vmatpush3.bf16.msra.mxu0 %v1017_v40  ;;  %3417 = vmatpush3.bf16.msra.mxu1 %v1017_v40 }
 0xa59   :  { %3430 = vmatprep.subr.bf16.mxu1 %v970_v9  ;;  %3422 = vmatprep.subr.bf16.mxu0 %v1136_v0 }
 0xa5b   :  { %3413 = vmatmul.mubr.msk.bf16.vlgmr.msra.gmra.mrb[24].mxu0 %vm374_vm12, %v4146_v28  ;;  %3419 = vmatmul.mubr.msk.bf16.vlgmr.msra.gmra.mrb[24].mxu1 %vm374_vm12, %v4144_v27 }
 0xa5c   :  { %3431 = vmatpush3.bf16.msra.mxu1 %v970_v9  ;;  %3432 = vmatprep.mubr.msk.bf16.mxu1 %vm374_vm12, %v4114_v6 }
 0xa5d   :  { %3423 = vmatpush3.bf16.msra.mxu0 %v1136_v0  ;;  %3426 = vmatprep.mubr.msk.bf16.mxu0 %vm214_vm5, %v1134_v57 }
 0xa5e   :  { %3424 = vmatprep.subr.bf16.mxu0 %v1137_v7  ;;  %3444 = vmatprep.subr.bf16.mxu1 %v3863_v3 }
 0xa61   :  { %3425 = vmatpush3.bf16.msra.mxu0 %v1137_v7 }
 0xa62   :  { %3436 = vmatprep.subr.bf16.mxu0 %v3863_v3 }
 0xa63   :  { %3433 = vmatmul.mubr.msk.bf16.vlgmr.msra.gmra.mrb[28].mxu1 %vm374_vm12, %v4144_v27 }
 0xa64   :  { %3452 = vmatprep.mubr.msk.bf16.mxu1 %vm3864_vm1, %v3863_v3 }
 0xa67   :  { %3427 = vmatmul.mubr.msk.bf16.vlgmr.msra.gmra.mrb[24].mxu0 %vm214_vm5, %v1135_v8 }
 0xa68   :  { %3440 = vmatprep.mubr.msk.bf16.mxu0 %vm3864_vm1, %v3863_v3 }
 0xb2e   :  { %v3420_v6 = vpop.f32.mrb[24].mxu1 }
 0xb2f   :  { %v1100_v28 = vpop.f32.mrb[25].mxu1 }
 0xb30   :  { %1117 = vrot.lane.b32.xlu1 %v1100_v28, %s3866_s27  ;;  %v3421_v10 = vpop.f32.mrb[26].mxu1 }
 0xb31   :  { %v1103_v11 = vpop.f32.mrb[27].mxu1 }
 0xb32   :  { %1119 = vrot.lane.b32.xlu0 %v1103_v11, %s3866_s27 }
 0xb34   :  { %1121 = vrot.lane.b32.xlu1 %v3420_v6, %s3866_s27 }
 0xb36   :  { %v3434_v12 = vpop.f32.mrb[28].mxu1 }
 0xb37   :  { %v4365_v27 = vmul.f32 %v3434_v12, %v3400_v50  ;;  %v1329_v13 = vpop.f32.mrb[29].mxu1 }
 0xb38   :  { %v4367_v14 = vmul.f32 %v1329_v13, %v951_v51  ;;  %v3435_v15 = vpop.f32.mrb[30].mxu1 }
 0xb39   :  { %v1332_v17 = vpop.f32.mrb[31].mxu1 }
 0xb3a   :  { %v4369_v18 = vmul.f32 %v1332_v17, %v954_v56  ;;  %v3428_v19 = vpop.f32.mrb[24].mxu0 }
 0xb3b   :  { %v1178_v20 = vpop.f32.mrb[25].mxu0 }
 0xb3c   :  { %v3429_v21 = vpop.f32.mrb[26].mxu0 }
 0xb3d   :  { %v1181_v22 = vpop.f32.mrb[27].mxu0 }
 0xba2   :  { %v1118_v23 = vpop.permute.xlu1 %1117 }
 0xba3   :  { %v3648_v24 = vadd.f32 %v1178_v20, %v1118_v23 }
 0xba4   :  { %v1120_v25 = vpop.permute.xlu0 %1119 }
 0xba5   :  { %v3649_v26 = vadd.f32 %v1181_v22, %v1120_v25  ;;  %1197 = vperm.xlu0 %3670, %v3648_v24  }
 0xba6   :  { %v1122_v29 = vpop.permute.xlu1 %1121 }
 0xba7   :  { %v3647_v32 = vadd.f32 %v3428_v19, %v1122_v29  ;;  %1202 = vperm.xlu1 %3671, %v3649_v26  }
 0xba9   :  { %1207 = vperm.xlu0 %3670, %v3647_v32  }
 0xc24   :  { %v1198_v33 = vpop.permute.xlu0 %1197 }
 0xc25   :  { %v1210_v34 = vsel %vm4105_vm10, %v1198_v33, -1e+30 }
 0xc26   :  { %v1203_v35 = vpop.permute.xlu1 %1202  ;;  %v1213_v37 = vsel %vm374_vm12, %v1210_v34, -inf }
 0xc27   :  { %v1211_v36 = vsel %vm4110_vm11, %v1203_v35, -1e+30 }
 0xc28   :  { %v1214_v38 = vsel %vm374_vm12, %v1211_v36, -inf  ;;  %v1208_v54 = vpop.permute.xlu0 %1207 }
 0xc29   :  { %v1216_v55 = vmax.f32 %v1213_v37, %v1214_v38  ;;  %v1212_v30 = vsel %vm4130_vm14, %v1208_v54, -1e+30 }
 0xc2a   :  { %v1215_v31 = vsel %vm374_vm12, %v1212_v30, -inf }
 0xc2b   :  { %v1217_v42 = vmax.f32 %v1216_v55, %v1215_v31 }
 0xc2d   :  { %v1218_v48 = vrot.slane %v1217_v42, 4 }
 0xc2f   :  { %v1219_v9 = vmax.f32 %v1217_v42, %v1218_v48 }
 0xc31   :  { %v1220_v49 = vrot.slane %v1219_v9, 2 }
 0xc33   :  { %v1221_v50 = vmax.f32 %v1219_v9, %v1220_v49 }
 0xc35   :  { %v1222_v51 = vrot.slane %v1221_v50, 1 }
 0xc37   :  { %v1223_v53 = vmax.f32 %v1221_v50, %v1222_v51 }
 0xc39   :  { %v1225_v56 = vsel %vm4110_vm11, %v1223_v53, 0.0  ;;  %v1224_v57 = vsel %vm4105_vm10, %v1223_v53, 0.0  ;;  %v1226_v60 = vsel %vm4130_vm14, %v1223_v53, 0.0 }
 0xc3a   :  { %v1230_v59 = vsel %vm374_vm12, %v1225_v56, 0.0  ;;  %v1227_v58 = vsel %vm374_vm12, %v1224_v57, 0.0  ;;  %v1233_v61 = vsel %vm374_vm12, %v1226_v60, 0.0 }
 0xc3b   :  { %1231 = vadd.xlane.f32.xlu0 %v1230_v59  ;;  %1228 = vadd.xlane.f32.xlu1 %v1227_v58 }
 0xc3f   :  { %1234 = vadd.xlane.f32.xlu0 %v1233_v61 }
 0xcc8   :  { %v1232_v46 = vpop.xlane.xlu0 %1231  ;;  %v1229_v40 = vpop.xlane.xlu1 %1228 }
 0xcc9   :  { %v1237_v43 = vsub.f32 %v3649_v26, %v1232_v46  ;;  %v1236_v0 = vsub.f32 %v3648_v24, %v1229_v40 }
 0xccb   :  { %v1241_v1 = vmul.f32 1.442695, %v1237_v43  ;;  %v1239_v2 = vmul.f32 1.442695, %v1236_v0  ;;  %v1509_v0 = vld [vmem:[%s5077_s15] sm:$0xff] }
 0xccc   :  { %v1235_v7 = vpop.xlane.xlu0 %1234 }
 0xccd   :  { %3728 = vpow2.f32 %v1241_v1  ;;  %v1238_v8 = vsub.f32 %v3647_v32, %v1235_v7  ;;  %v1510_v1 = vld [vmem:[%s5077_s15 + $0x8] sm:$0xff] }
 0xcce   :  { %3730 = vpow2.f32 %v1239_v2  ;;  %v1512_v2 = vld [vmem:[%s5077_s15 + $0x18] sm:$0xff] }
 0xccf   :  { %v1243_v6 = vmul.f32 1.442695, %v1238_v8  ;;  %v1513_v8 = vld [vmem:[%s5077_s15 + $0x20] sm:$0xff] }
 0xcd1   :  { %3732 = vpow2.f32 %v1243_v6  ;;  %v1514_v6 = vld [vmem:[%s5077_s15 + $0x28] sm:$0xff] }
 0xcd7   :  { %v3729_v28 = vpop.eup %3728 }
 0xcd8   :  { %v3731_v10 = vpop.eup %3730  ;;  %1252 = vperm.xlu0 %3670, %v3729_v28  }
 0xcd9   :  { %1247 = vperm.xlu1 %3671, %v3731_v10  }
 0xcdb   :  { %v3733_v11 = vpop.eup %3732 }
 0xcdd   :  { %1257 = vperm.xlu1 %3671, %v3733_v11  }
 0xd57   :  { %v1253_v12 = vpop.permute.xlu0 %1252 }
 0xd58   :  { %v1261_v13 = vsel %vm4110_vm11, %v1253_v12, 0.0  ;;  %v1248_v15 = vpop.permute.xlu1 %1247  ;;  %v1517_v12 = vld [vmem:[%s5077_s15 + $0x40] sm:$0xff] }
 0xd59   :  { %v1260_v17 = vsel %vm4105_vm10, %v1248_v15, 0.0  ;;  %v1264_v19 = vsel %vm374_vm12, %v1261_v13, 0.0  ;;  %v1518_v13 = vld [vmem:[%s5077_s15 + $0x48] sm:$0xff] }
 0xd5a   :  { %v1263_v20 = vsel %vm374_vm12, %v1260_v17, 0.0  ;;  %v4462_v15 = vpack.c.bf16 %v1518_v13, %v1517_v12  ;;  %v1519_v17 = vld [vmem:[%s5077_s15 + $0x50] sm:$0xff]  ;;  %v3870_v13 = vmov 65535  }
 0xd5b   :  { %v1265_v22 = vadd.f32 %v1264_v19, %v1263_v20  ;;  %v1520_v19 = vld [vmem:[%s5077_s15 + $0x58] sm:$0xff] }
 0xd5c   :  { %v1258_v21 = vpop.permute.xlu1 %1257  ;;  %v4472_v20 = vpack.c.bf16 %v1520_v19, %v1519_v17 }
 0xd5d   :  { %v1262_v23 = vsel %vm4130_vm14, %v1258_v21, 0.0  ;;  %v3868_v21 = vmov 0.0|0.0  }
 0xd5e   :  { %v1266_v24 = vsel %vm374_vm12, %v1262_v23, 0.0 }
 0xd5f   :  { %v1267_v25 = vadd.f32 %v1266_v24, %v1265_v22 }
 0xd61   :  { %v1268_v26 = vrot.slane %v1267_v25, 4 }
 0xd63   :  { %v1269_v29 = vadd.f32 %v1268_v26, %v1267_v25  ;;  %v4494_v26 = vld [vmem:[%s5078_s16] ss:$0 sm:$0xff] }
 0xd65   :  { %v1270_v32 = vrot.slane %v1269_v29, 2 }
 0xd67   :  { %v1271_v33 = vadd.f32 %v1270_v32, %v1269_v29 }
 0xd69   :  { %v1272_v34 = vrot.slane %v1271_v33, 1 }
 0xd6b   :  { %v1273_v35 = vadd.f32 %v1272_v34, %v1271_v33 }
 0xd6d   :  { %v1275_v36 = vsel %vm4110_vm11, %v1273_v35, 0.0  ;;  %v1274_v37 = vsel %vm4105_vm10, %v1273_v35, 0.0  ;;  %v1276_v55 = vsel %vm4130_vm14, %v1273_v35, 0.0  ;;  %vm1535_vm11 = vcmask 785408  }
 0xd6e   :  { %v1280_v38 = vsel %vm374_vm12, %v1275_v36, 0.0  ;;  %v1277_v54 = vsel %vm374_vm12, %v1274_v37, 0.0  ;;  %v1283_v30 = vsel %vm374_vm12, %v1276_v55, 0.0  ;;  %v3136_v36 = vld [vmem:[%s5075_s13 + $0x40] sm:$0xff]  ;;  %v3137_v37 = vld [vmem:[%s5075_s13 + $0x48] sm:$0xff]  ;;  %v3139_v55 = vld [vmem:[%s5075_s13 + $0x58] sm:$0xff] }
 0xd6f   :  { %1281 = vadd.xlane.f32.xlu0 %v1280_v38  ;;  %1278 = vadd.xlane.f32.xlu1 %v1277_v54  ;;  %v3138_v38 = vld [vmem:[%s5075_s13 + $0x50] sm:$0xff]  ;;  %v1430_v54 = vpack.c.bf16 %v3137_v37, %v3136_v36 }
 0xd71   :  { %3445 = vmatpush3.bf16.msra.mxu1 %v1430_v54 }
 0xd72   :  { %3446 = vmatprep.subr.bf16.mxu1 %v3863_v3 }
 0xd73   :  { %1284 = vadd.xlane.f32.xlu0 %v1283_v30 }
 0xdfc   :  { %v1282_v31 = vpop.xlane.xlu0 %1281  ;;  %v1279_v42 = vpop.xlane.xlu1 %1278 }
 0xdfd   :  { %v1287_v48 = vadd.f32 1e-16, %v1282_v31  ;;  %v1286_v5 = vadd.f32 1e-16, %v1279_v42  ;;  %v1431_v31 = vpack.c.bf16 %v3139_v55, %v3138_v38 }
 0xdff   :  { %3734 = vrcp.f32 %v1287_v48  ;;  %3447 = vmatpush3.bf16.msra.mxu1 %v1431_v31 }
 0xe00   :  { %3736 = vrcp.f32 %v1286_v5  ;;  %v1285_v4 = vpop.xlane.xlu0 %1284  ;;  %3448 = vmatprep.subr.bf16.mxu1 %v3863_v3 }
 0xe01   :  { %v1288_v9 = vadd.f32 1e-16, %v1285_v4  ;;  %v3140_v4 = vld [vmem:[%s5075_s13 + $0x60] sm:$0xff] }
 0xe03   :  { %3738 = vrcp.f32 %v1288_v9  ;;  %v3141_v9 = vld [vmem:[%s5075_s13 + $0x68] sm:$0xff] }
 0xe09   :  { %v3735_v49 = vpop.eup %3734 }
 0xe0a   :  { %v3737_v50 = vpop.eup %3736  ;;  %v1292_v51 = vmul.f32 %v3735_v49, %v3729_v28  ;;  %v1515_v28 = vld [vmem:[%s5077_s15 + $0x30] sm:$0xff]  ;;  %v1432_v49 = vpack.c.bf16 %v3141_v9, %v3140_v4 }
 0xe0b   :  { %v1290_v53 = vmul.f32 %v3737_v50, %v3731_v10  ;;  %v1516_v10 = vld [vmem:[%s5077_s15 + $0x38] sm:$0xff]  ;;  %v3142_v50 = vld [vmem:[%s5075_s13 + $0x70] sm:$0xff] }
 0xe0c   :  { %1353 = vperm.xlu0 %3670, %v1292_v51   ;;  %3449 = vmatpush3.bf16.msra.mxu1 %v1432_v49  ;;  %v3143_v51 = vld [vmem:[%s5075_s13 + $0x78] sm:$0xff] }
 0xe0d   :  { %v3739_v56 = vpop.eup %3738  ;;  %1348 = vperm.xlu1 %3671, %v1290_v53   ;;  %3450 = vmatprep.subr.bf16.mxu1 %v3863_v3  ;;  %v1433_v53 = vpack.c.bf16 %v3143_v51, %v3142_v50 }
 0xe0e   :  { %v1294_v16 = vmul.f32 %v3739_v56, %v3733_v11  ;;  %v4452_v11 = vpack.c.bf16 %v1516_v10, %v1515_v28 }
 0xe10   :  { %3451 = vmatpush3.bf16.msra.mxu1 %v1433_v53 }
 0xe11   :  { %1358 = vperm.xlu1 %3671, %v1294_v16   ;;  %3472 = vmatprep.subr.bf16.mxu1 %v3863_v3 }
 0xe8b   :  { %v1354_v57 = vpop.permute.xlu0 %1353 }
 0xe8c   :  { %v1362_v59 = vmul.f32 %v1354_v57, %v4369_v18  ;;  %v1349_v58 = vpop.permute.xlu1 %1348 }
 0xe8d   :  { %v1361_v60 = vmul.f32 %v1349_v58, %v4367_v14  ;;  %v4418_v14 = vpack.c.bf16 %v1510_v1, %v1509_v0 }
 0xe8f   :  { %v1364_v61 = vpack.c.bf16 %v1362_v59, %v1361_v60  ;;  %v1489_v59 = vld [vmem:[%s5111_s9 + $0x8] sm:$0xff] }
 0xe90   :  { %v1359_v46 = vpop.permute.xlu1 %1358 }
 0xe91   :  { %v1363_v40 = vmul.f32 %v1359_v46, %v4365_v27  ;;  %3437 = vmatpush3.bf16.msra.mxu0 %v1364_v61  ;;  %v1511_v27 = vld [vmem:[%s5077_s15 + $0x10] sm:$0xff] }
 0xe92   :  { %3438 = vmatprep.subr.bf16.mxu0 %v3863_v3  ;;  %v4430_v7 = vpack.c.bf16 %v1512_v2, %v1511_v27 }
 0xe93   :  { %v1365_v43 = vpack.c.bf16 %v1363_v40, %v1363_v40 }
 0xe95   :  { %v1367_v18 = vsel %vm147_vm0, %v1365_v43, 0  ;;  %vm1611_vm0 = vcmask 1040384  }
 0xe96   :  { %3439 = vmatpush3.bf16.msra.mxu0 %v1367_v18  ;;  %v1613_v17 = vsel %vm1611_vm0, 4294967295, %v3870_v13 }
 0xe97   :  { %3456 = vmatprep.subr.bf16.mxu0 %v3863_v3 }
 0xe99   :  { %3441 = vmatmul.mubr.msk.bf16.vlgmr.msra.gmra.mrb[28].mxu0 %vm734_vm3, %v4255_v63  ;;  %v4442_v63 = vpack.c.bf16 %v1514_v6, %v1513_v8 }
 0xe9a   :  { %3457 = vmatpush3.bf16.msra.mxu0 %v4418_v14  ;;  %3468 = vmatprep.mubr.msk.bf16.mxu0 %vm3864_vm1, %v3863_v3 }
 0xe9b   :  { %3458 = vmatprep.subr.bf16.mxu0 %v3863_v3 }
 0xe9e   :  { %3459 = vmatpush3.bf16.msra.mxu0 %v4430_v7 }
 0xe9f   :  { %3460 = vmatprep.subr.bf16.mxu0 %v3863_v3 }
 0xea2   :  { %3461 = vmatpush3.bf16.msra.mxu0 %v4442_v63 }
 0xea3   :  { %3462 = vmatprep.subr.bf16.mxu0 %v3863_v3 }
 0xea6   :  { %3463 = vmatpush3.bf16.msra.mxu0 %v4452_v11 }
 0xea7   :  { %3464 = vmatprep.subr.bf16.mxu0 %v3863_v3 }
 0xeaa   :  { %3465 = vmatpush3.bf16.msra.mxu0 %v4462_v15 }
 0xeab   :  { %3466 = vmatprep.subr.bf16.mxu0 %v3863_v3 }
 0xeae   :  { %3467 = vmatpush3.bf16.msra.mxu0 %v4472_v20 }
 0xeaf   :  { %3484 = vmatprep.subr.bf16.mxu0 %v3863_v3 }
 0xeb1   :  { %3469 = vmatmul.mubr.bf16.vlgmr.msra.gmra.mrb[32].mxu0 %v3868_v21 }
 0xeb2   :  { %3485 = vmatpush3.bf16.msra.mxu0 %v4418_v14  ;;  %3496 = vmatprep.mubr.msk.bf16.mxu0 %vm3864_vm1, %v3863_v3 }
 0xeb3   :  { %3486 = vmatprep.subr.bf16.mxu0 %v3863_v3 }
 0xeb6   :  { %3487 = vmatpush3.bf16.msra.mxu0 %v4430_v7 }
 0xeb7   :  { %3488 = vmatprep.subr.bf16.mxu0 %v3863_v3 }
 0xeba   :  { %3489 = vmatpush3.bf16.msra.mxu0 %v4442_v63 }
 0xebb   :  { %3490 = vmatprep.subr.bf16.mxu0 %v3863_v3 }
 0xebe   :  { %3491 = vmatpush3.bf16.msra.mxu0 %v4452_v11 }
 0xebf   :  { %3492 = vmatprep.subr.bf16.mxu0 %v3863_v3 }
 0xec2   :  { %3493 = vmatpush3.bf16.msra.mxu0 %v4462_v15 }
 0xec3   :  { %3494 = vmatprep.subr.bf16.mxu0 %v3863_v3 }
 0xec6   :  { %3495 = vmatpush3.bf16.msra.mxu0 %v4472_v20 }
 0xec7   :  { %3528 = vmatprep.subr.bf16.mxu0 %v3863_v3 }
 0xf6c   :  { %v1403_v22 = vpop.f32.mrb[28].mxu0 }
 0xf6d   :  { %v3442_v23 = vpop.f32.mrb[29].mxu0 }
 0xf6e   :  { %v1406_v24 = vpop.f32.mrb[30].mxu0 }
 0xf6f   :  { %v3443_v25 = vpop.f32.mrb[31].mxu0 }
 0xf84   :  { %v1573_v29 = vpop.f32.mrb[32].mxu0 }
 0xf85   :  { %v1574_v32 = vadd.f32 %v4494_v26, %v1573_v29  ;;  %v3470_v33 = vpop.f32.mrb[33].mxu0 }
 0xf86   :  { %v1576_v34 = vpop.f32.mrb[34].mxu0 }
 0xf87   :  { %3740 = vtanh.f32 %v1574_v32  ;;  %v3471_v35 = vpop.f32.mrb[35].mxu0  ;;  %v3149_v42 = vmul.f32 -1.442695, %v1574_v32 }
 0xf89   :  { %3742 = vpow2.f32 %v3149_v42 }
 0xf91   :  { %v3741_v30 = vpop.eup %3740 }
 0xf92   :  { %1588 = vrot.lane.b32.xlu1 %v3741_v30, %s3869_s26 }
 0xf93   :  { %v3743_v48 = vpop.eup %3742 }
 0xf94   :  { %v1582_v5 = vadd.f32 1.0, %v3743_v48 }
 0xf96   :  { %3744 = vrcp.f32 %v1582_v5 }
 0xfa0   :  { %v3745_v56 = vpop.eup %3744 }
 0xfa1   :  { %v1586_v58 = vmul.f32 0.0, %v3745_v56 }
0x1004   :  { %v1589_v16 = vpop.permute.xlu1 %1588 }
0x1005   :  { %v1591_v57 = vmul.f32 %v3745_v56, %v1589_v16 }
0x1007   :  { %1593 = vrot.lane.b32.xlu0 %v1591_v57, %s3867_s7 }
0x100b   :  { %3678 = vrot.lane.b32.xlu0 %v3677_v47, %s3867_s7  ;;  %v1488_v47 = vld [vmem:[%s5111_s9] sm:$0xff] }
0x100f   :  { %1494 = vperm.xlu0 %3670, %v1489_v59  }
0x1079   :  { %v1594_v60 = vpop.permute.xlu0 %1593 }
0x107a   :  { %v4534_v61 = vadd.f32 %v1594_v60, %v1586_v58 }
0x107c   :  { %3746 = vtanh.f32 %v4534_v61 }
0x107d   :  { %v3679_v46 = vpop.permute.xlu0 %3678 }
0x107e   :  { %v3681_v40 = vunpack.i.h.bf16 %v3679_v46  ;;  %v3680_v43 = vunpack.i.l.bf16 %v3679_v46 }
0x1080   :  { %v1419_v0 = vsel %vm214_vm5, %v1406_v24, %v3681_v40  ;;  %v1418_v1 = vsel %vm214_vm5, %v1403_v22, %v3680_v43  ;;  %v4556_v22 = vsel %vm1612_vm6, %v1613_v17, 0 }
0x1081   :  { %v1429_v45 = vpack.c.bf16 %v1419_v0, %v1418_v1 }
0x1083   :  { %3453 = vmatmul.mubr.msk.bf16.vlgmr.msra.gmra.mrb[32].mxu1 %vm812_vm4, %v1429_v45 }
0x1084   :  { %3474 = vmatprep.mubr.msk.bf16.mxu1 %vm3864_vm1, %v3863_v3 }
0x1086   :  { %v3747_v41 = vpop.eup %3746 }
0x1087   :  { %1599 = vrot.lane.b32.xlu1 %v3747_v41, %s3869_s26 }
0x108b   :  { %1491 = vperm.xlu1 %3671, %v1488_v47  }
0x108e   :  { %v1495_v19 = vpop.permute.xlu0 %1494 }
0x108f   :  { %vm4559_vm8 = vcmp.eq.s32.totalorder %v1495_v19, %v4098_v62 }
0x1090   :  { %v1499_v32 = vsel %vm4559_vm8, 1.0, %v3863_v3 }
0x10f9   :  { %v1600_v18 = vpop.permute.xlu1 %1599 }
0x10fa   :  { %v4546_v27 = vmul.f32 %v3745_v56, %v1600_v18 }
0x10fc   :  { %v1603_v2 = vpack.c.bf16 %v4546_v27, %v4546_v27 }
0x10fe   :  { %1605 = vrot.lane.b32.xlu1 %v1603_v2, %s3867_s7 }
0x110a   :  { %v1492_v12 = vpop.permute.xlu1 %1491 }
0x110b   :  { %vm4552_vm7 = vcmp.eq.s32.totalorder %v1492_v12, %v4098_v62  ;;  %v3145_v62 = vld [vmem:[%s5076_s14 + $0x1] ss:$0 sm:$0xff]  ;;  %s3871_s14 = smov 96  }
0x110c   :  { %v1498_v29 = vsel %vm4552_vm7, 1.0, %v3863_v3 }
0x110d   :  { %v4570_v33 = vpack.c.bf16 %v1499_v32, %v1498_v29 }
0x1156   :  { %v1479_v8 = vpop.f32.mrb[32].mxu1 }
0x1157   :  { %v3454_v6 = vpop.f32.mrb[33].mxu1  ;;  %v1480_v34 = vadd.f32 %v3145_v62, %v1479_v8 }
0x1158   :  { %v1482_v28 = vpop.f32.mrb[34].mxu1 }
0x1159   :  { %v3455_v10 = vpop.f32.mrb[35].mxu1  ;;  %v1483_v35 = vadd.f32 %v3145_v62, %v1482_v28  ;;  %v4581_v36 = vadd.f32 %v1480_v34, %v4302_v39 }
0x115b   :  { %v4584_v38 = vadd.f32 %v1483_v35, %v4305_v52 }
0x1170   :  { %v1606_v24 = vpop.permute.xlu1 %1605 }
0x1171   :  { %v1616_v25 = vand.u32 %v4556_v22, %v1606_v24 }
0x1173   :  { %3473 = vmatpush3.bf16.msra.mxu1 %v1616_v25 }
0x1174   :  { %3478 = vmatprep.subr.bf16.mxu1 %v3863_v3 }
0x1176   :  { %3475 = vmatmul.mubr.msk.bf16.vlgmr.msra.gmra.mrb[36].mxu1 %vm1607_vm9, %v4570_v33 }
0x1177   :  { %3480 = vmatprep.mubr.msk.bf16.mxu1 %vm3864_vm1, %v3863_v3 }
0x1249   :  { %v1652_v37 = vpop.f32.mrb[36].mxu1 }
0x124a   :  { %v1659_v54 = vmul.f32 %v1652_v37, %v4581_v36  ;;  %v3476_v55 = vpop.f32.mrb[37].mxu1 }
0x124b   :  { %v1655_v30 = vpop.f32.mrb[38].mxu1 }
0x124c   :  { %v1660_v31 = vmul.f32 %v1655_v30, %v4584_v38  ;;  %v3477_v42 = vpop.f32.mrb[39].mxu1  ;;  %v1661_v48 = vsel %vm214_vm5, %v1659_v54, 0.0 }
0x124d   :  { %1662 = vadd.xlane.f32.xlu0 %v1661_v48  ;;  %v3147_v42 = vld [vmem:[%s5116_s11] ss:$0 sm:$0xff] }
0x124e   :  { %v1664_v5 = vsel %vm214_vm5, %v1660_v31, 0.0  ;;  %vm1506_vm10 = vcmp.eq.s32.totalorder %v3147_v42, %v4241_v44 }
0x124f   :  { %1665 = vadd.xlane.f32.xlu1 %v1664_v5 }
0x12da   :  { %v1663_v4 = vpop.xlane.xlu0 %1662 }
0x12db   :  { %v1667_v39 = vsel %vm4552_vm7, %v1663_v4, -1e+30 }
0x12dc   :  { %v1666_v9 = vpop.xlane.xlu1 %1665  ;;  %v1669_v49 = vsel %vm1607_vm9, %v1667_v39, -inf }
0x12dd   :  { %v1668_v52 = vsel %vm4559_vm8, %v1666_v9, -1e+30 }
0x12de   :  { %v1670_v50 = vsel %vm1607_vm9, %v1668_v52, -inf }
0x12df   :  { %v1671_v51 = vmax.f32 %v1669_v49, %v1670_v50  ;;  %v1507_v49 = vsel %vm1506_vm10, 1.0, %v3863_v3 }
0x12e1   :  { %v1672_v53 = vrot.slane %v1671_v51, 4 }
0x12e3   :  { %v1673_v56 = vmax.f32 %v1671_v51, %v1672_v53  ;;  %v4623_v51 = vpack.c.bf16 %v1507_v49, %v1507_v49 }
0x12e5   :  { %v1674_v16 = vrot.slane %v1673_v56, 2 }
0x12e7   :  { %v1675_v57 = vmax.f32 %v1673_v56, %v1674_v16 }
0x12e9   :  { %v1676_v59 = vrot.slane %v1675_v57, 1 }
0x12eb   :  { %v1677_v58 = vmax.f32 %v1675_v57, %v1676_v59 }
0x12ed   :  { %v1678_v60 = vsel %vm4552_vm7, %v1677_v58, 0.0  ;;  %v1679_v40 = vsel %vm4559_vm8, %v1677_v58, 0.0 }
0x12ee   :  { %v1680_v46 = vsel %vm1607_vm9, %v1678_v60, 0.0  ;;  %v1683_v43 = vsel %vm1607_vm9, %v1679_v40, 0.0 }
0x12ef   :  { %1681 = vadd.xlane.f32.xlu0 %v1680_v46 }
0x12f3   :  { %1684 = vadd.xlane.f32.xlu0 %v1683_v43 }
0x137c   :  { %v1682_v0 = vpop.xlane.xlu0 %1681 }
0x137d   :  { %v1686_v1 = vsub.f32 %v1663_v4, %v1682_v0 }
0x137f   :  { %v1688_v45 = vmul.f32 1.442695, %v1686_v1 }
0x1380   :  { %v1685_v41 = vpop.xlane.xlu0 %1684 }
0x1381   :  { %3748 = vpow2.f32 %v1688_v45  ;;  %v1687_v47 = vsub.f32 %v1666_v9, %v1685_v41 }
0x1383   :  { %v1690_v18 = vmul.f32 1.442695, %v1687_v47 }
0x1385   :  { %3750 = vpow2.f32 %v1690_v18 }
0x138b   :  { %v3749_v2 = vpop.eup %3748 }
0x138c   :  { %v1692_v8 = vsel %vm4552_vm7, %v3749_v2, 0.0 }
0x138d   :  { %v1694_v10 = vsel %vm1607_vm9, %v1692_v8, 0.0 }
0x138f   :  { %v3751_v6 = vpop.eup %3750 }
0x1390   :  { %v1693_v28 = vsel %vm4559_vm8, %v3751_v6, 0.0 }
0x1391   :  { %v1695_v12 = vsel %vm1607_vm9, %v1693_v28, 0.0 }
0x1392   :  { %v1696_v13 = vadd.f32 %v1695_v12, %v1694_v10 }
0x1394   :  { %v1697_v17 = vrot.slane %v1696_v13, 4 }
0x1396   :  { %v1698_v19 = vadd.f32 %v1697_v17, %v1696_v13 }
0x1398   :  { %v1699_v24 = vrot.slane %v1698_v19, 2 }
0x139a   :  { %v1700_v25 = vadd.f32 %v1699_v24, %v1698_v19 }
0x139c   :  { %v1701_v29 = vrot.slane %v1700_v25, 1 }
0x139e   :  { %v1702_v32 = vadd.f32 %v1701_v29, %v1700_v25 }
0x13a0   :  { %v1704_v62 = vsel %vm4559_vm8, %v1702_v32, 0.0  ;;  %v1703_v34 = vsel %vm4552_vm7, %v1702_v32, 0.0 }
0x13a1   :  { %v1708_v35 = vsel %vm1607_vm9, %v1704_v62, 0.0  ;;  %v1705_v37 = vsel %vm1607_vm9, %v1703_v34, 0.0 }
0x13a2   :  { %1709 = vadd.xlane.f32.xlu0 %v1708_v35  ;;  %1706 = vadd.xlane.f32.xlu1 %v1705_v37 }
0x13b8   :  { %1771 = vrot.lane.b32.xlu0 %v4546_v27, %s3871_s14 }
0x142f   :  { %v1710_v54 = vpop.xlane.xlu0 %1709  ;;  %v1707_v55 = vpop.xlane.xlu1 %1706 }
0x1430   :  { %v1712_v30 = vadd.f32 1e-16, %v1710_v54  ;;  %v1711_v31 = vadd.f32 1e-16, %v1707_v55 }
0x1432   :  { %3752 = vrcp.f32 %v1712_v30 }
0x1433   :  { %3754 = vrcp.f32 %v1711_v31  ;;  %v1772_v46 = vpop.permute.xlu0 %1771 }
0x143c   :  { %v3753_v48 = vpop.eup %3752 }
0x143d   :  { %v3755_v5 = vpop.eup %3754  ;;  %v1716_v4 = vmul.f32 %v3753_v48, %v3751_v6 }
0x143e   :  { %v1714_v39 = vmul.f32 %v3755_v5, %v3749_v2 }
0x143f   :  { %v1718_v9 = vmul.f32 %v1716_v4, %v4584_v38 }
0x1440   :  { %v1717_v52 = vmul.f32 %v1714_v39, %v4581_v36 }
0x1442   :  { %v1719_v50 = vpack.c.bf16 %v1718_v9, %v1717_v52 }
0x1444   :  { %3479 = vmatpush3.bf16.msra.mxu1 %v1719_v50 }
0x1445   :  { %3500 = vmatprep.subr.bf16.mxu1 %v3863_v3 }
0x1447   :  { %3481 = vmatmul.mubr.msk.bf16.vlgmr.msra.gmra.mrb[40].mxu1 %vm374_vm12, %v4623_v51 }
0x1448   :  { %3502 = vmatprep.mubr.msk.bf16.mxu1 %vm3864_vm1, %v3863_v3 }
0x151a   :  { %v1757_v44 = vpop.f32.mrb[40].mxu1 }
0x151b   :  { %v3682_v53 = vpack.i.bf16 %v1757_v44, %v4546_v27  ;;  %v3482_v56 = vpop.f32.mrb[41].mxu1 }
0x151c   :  { %v1760_v16 = vpop.f32.mrb[42].mxu1 }
0x151d   :  { %3683 = vrot.lane.b32.xlu1 %v3682_v53, %s3867_s7  ;;  %v3483_v57 = vpop.f32.mrb[43].mxu1 }
0x158f   :  { %v3684_v59 = vpop.permute.xlu1 %3683 }
0x1590   :  { %v3686_v58 = vunpack.i.h.bf16 %v3684_v59  ;;  %v3685_v60 = vunpack.i.l.bf16 %v3684_v59 }
0x1592   :  { %v1774_v40 = vsel %vm214_vm5, %v3685_v60, %v3686_v58 }
0x1593   :  { %v1775_v43 = vsel %vm812_vm4, %v1774_v40, %v1772_v46 }
0x1594   :  { %v1776_v0 = vpack.c.bf16 %v1775_v43, %v1775_v43 }
0x1596   :  { %3497 = vmatmul.mubr.msk.bf16.vlgmr.msra.gmra.mrb[36].mxu0 %vm1535_vm11, %v1776_v0 }
0x1597   :  { %3530 = vmatprep.mubr.msk.bf16.mxu0 %vm3864_vm1, %v3863_v3 }
0x1669   :  { %v1814_v27 = vpop.f32.mrb[36].mxu0 }
0x166a   :  { %v1815_v1 = vadd.f32 %v4494_v26, %v1814_v27  ;;  %v3498_v45 = vpop.f32.mrb[37].mxu0 }
0x166b   :  { %v1817_v41 = vpop.f32.mrb[38].mxu0 }
0x166c   :  { %3756 = vtanh.f32 %v1815_v1  ;;  %v3499_v47 = vpop.f32.mrb[39].mxu0  ;;  %v3153_v2 = vmul.f32 -1.442695, %v1815_v1 }
0x166e   :  { %3758 = vpow2.f32 %v3153_v2 }
0x1676   :  { %v3757_v18 = vpop.eup %3756 }
0x1677   :  { %1829 = vrot.lane.b32.xlu1 %v3757_v18, %s3869_s26 }
0x1678   :  { %v3759_v8 = vpop.eup %3758 }
0x1679   :  { %v1823_v6 = vadd.f32 1.0, %v3759_v8 }
0x167b   :  { %3760 = vrcp.f32 %v1823_v6 }
0x1685   :  { %v3761_v28 = vpop.eup %3760 }
0x1686   :  { %v1827_v13 = vmul.f32 %v3761_v28, %v4534_v61 }
0x16e9   :  { %v1830_v10 = vpop.permute.xlu1 %1829 }
0x16ea   :  { %v1832_v12 = vmul.f32 %v3761_v28, %v1830_v10 }
0x16ec   :  { %1834 = vrot.lane.b32.xlu1 %v1832_v12, %s3867_s7 }
0x175e   :  { %v1835_v17 = vpop.permute.xlu1 %1834 }
0x175f   :  { %v4641_v19 = vadd.f32 %v1835_v17, %v1827_v13 }
0x1761   :  { %3762 = vtanh.f32 %v4641_v19 }
0x176b   :  { %v3763_v24 = vpop.eup %3762 }
0x176c   :  { %1840 = vrot.lane.b32.xlu0 %v3763_v24, %s3869_s26 }
0x17de   :  { %v1841_v25 = vpop.permute.xlu0 %1840 }
0x17df   :  { %v4645_v29 = vmul.f32 %v3761_v28, %v1841_v25 }
0x17e1   :  { %v1844_v32 = vpack.c.bf16 %v4645_v29, %v4645_v29 }
0x17e3   :  { %1846 = vrot.lane.b32.xlu1 %v1844_v32, %s3867_s7 }
0x1855   :  { %v1847_v62 = vpop.permute.xlu1 %1846 }
0x1856   :  { %v1849_v34 = vand.u32 %v1847_v62, %v4556_v22 }
0x1858   :  { %3501 = vmatpush3.bf16.msra.mxu1 %v1849_v34 }
0x1859   :  { %3506 = vmatprep.subr.bf16.mxu1 %v3863_v3 }
0x185b   :  { %3503 = vmatmul.mubr.msk.bf16.vlgmr.msra.gmra.mrb[44].mxu1 %vm1607_vm9, %v4570_v33 }
0x185c   :  { %3508 = vmatprep.mubr.msk.bf16.mxu1 %vm3864_vm1, %v3863_v3 }
0x192e   :  { %v1885_v61 = vpop.f32.mrb[44].mxu1 }
0x192f   :  { %v1892_v35 = vmul.f32 %v1885_v61, %v4581_v36  ;;  %v3504_v37 = vpop.f32.mrb[45].mxu1 }
0x1930   :  { %v1888_v54 = vpop.f32.mrb[46].mxu1 }
0x1931   :  { %v1893_v55 = vmul.f32 %v1888_v54, %v4584_v38  ;;  %v3505_v30 = vpop.f32.mrb[47].mxu1  ;;  %v1894_v31 = vsel %vm214_vm5, %v1892_v35, 0.0 }
0x1932   :  { %1895 = vadd.xlane.f32.xlu0 %v1894_v31 }
0x1933   :  { %v1897_v42 = vsel %vm214_vm5, %v1893_v55, 0.0 }
0x1934   :  { %1898 = vadd.xlane.f32.xlu1 %v1897_v42 }
0x19bf   :  { %v1896_v48 = vpop.xlane.xlu0 %1895 }
0x19c0   :  { %v1900_v5 = vsel %vm4552_vm7, %v1896_v48, -1e+30 }
0x19c1   :  { %v1899_v4 = vpop.xlane.xlu1 %1898  ;;  %v1902_v9 = vsel %vm1607_vm9, %v1900_v5, -inf }
0x19c2   :  { %v1901_v39 = vsel %vm4559_vm8, %v1899_v4, -1e+30 }
0x19c3   :  { %v1903_v52 = vsel %vm1607_vm9, %v1901_v39, -inf }
0x19c4   :  { %v1904_v49 = vmax.f32 %v1902_v9, %v1903_v52 }
0x19c6   :  { %v1905_v50 = vrot.slane %v1904_v49, 4 }
0x19c8   :  { %v1906_v44 = vmax.f32 %v1904_v49, %v1905_v50 }
0x19ca   :  { %v1907_v53 = vrot.slane %v1906_v44, 2 }
0x19cc   :  { %v1908_v56 = vmax.f32 %v1906_v44, %v1907_v53 }
0x19ce   :  { %v1909_v16 = vrot.slane %v1908_v56, 1 }
0x19d0   :  { %v1910_v57 = vmax.f32 %v1908_v56, %v1909_v16 }
0x19d2   :  { %v1911_v59 = vsel %vm4552_vm7, %v1910_v57, 0.0  ;;  %v1912_v60 = vsel %vm4559_vm8, %v1910_v57, 0.0 }
0x19d3   :  { %v1913_v58 = vsel %vm1607_vm9, %v1911_v59, 0.0  ;;  %v1916_v46 = vsel %vm1607_vm9, %v1912_v60, 0.0 }
0x19d4   :  { %1914 = vadd.xlane.f32.xlu0 %v1913_v58 }
0x19d8   :  { %1917 = vadd.xlane.f32.xlu0 %v1916_v46 }
0x1a61   :  { %v1915_v40 = vpop.xlane.xlu0 %1914 }
0x1a62   :  { %v1919_v43 = vsub.f32 %v1896_v48, %v1915_v40 }
0x1a64   :  { %v1921_v0 = vmul.f32 1.442695, %v1919_v43 }
0x1a65   :  { %v1918_v27 = vpop.xlane.xlu0 %1917 }
0x1a66   :  { %3764 = vpow2.f32 %v1921_v0  ;;  %v1920_v1 = vsub.f32 %v1899_v4, %v1918_v27 }
0x1a68   :  { %v1923_v45 = vmul.f32 1.442695, %v1920_v1 }
0x1a6a   :  { %3766 = vpow2.f32 %v1923_v45 }
0x1a70   :  { %v3765_v41 = vpop.eup %3764 }
0x1a71   :  { %v1925_v47 = vsel %vm4552_vm7, %v3765_v41, 0.0 }
0x1a72   :  { %v1927_v8 = vsel %vm1607_vm9, %v1925_v47, 0.0 }
0x1a74   :  { %v3767_v18 = vpop.eup %3766 }
0x1a75   :  { %v1926_v2 = vsel %vm4559_vm8, %v3767_v18, 0.0 }
0x1a76   :  { %v1928_v6 = vsel %vm1607_vm9, %v1926_v2, 0.0 }
0x1a77   :  { %v1929_v28 = vadd.f32 %v1928_v6, %v1927_v8 }
0x1a79   :  { %v1930_v10 = vrot.slane %v1929_v28, 4 }
0x1a7b   :  { %v1931_v12 = vadd.f32 %v1930_v10, %v1929_v28 }
0x1a7d   :  { %v1932_v13 = vrot.slane %v1931_v12, 2 }
0x1a7f   :  { %v1933_v17 = vadd.f32 %v1932_v13, %v1931_v12 }
0x1a81   :  { %v1934_v24 = vrot.slane %v1933_v17, 1 }
0x1a83   :  { %v1935_v25 = vadd.f32 %v1934_v24, %v1933_v17 }
0x1a85   :  { %v1937_v32 = vsel %vm4559_vm8, %v1935_v25, 0.0  ;;  %v1936_v62 = vsel %vm4552_vm7, %v1935_v25, 0.0 }
0x1a86   :  { %v1941_v34 = vsel %vm1607_vm9, %v1937_v32, 0.0  ;;  %v1938_v61 = vsel %vm1607_vm9, %v1936_v62, 0.0 }
0x1a87   :  { %1942 = vadd.xlane.f32.xlu0 %v1941_v34  ;;  %1939 = vadd.xlane.f32.xlu1 %v1938_v61 }
0x1a9d   :  { %2001 = vrot.lane.b32.xlu0 %v4645_v29, %s3871_s14 }
0x1b14   :  { %v1943_v35 = vpop.xlane.xlu0 %1942  ;;  %v1940_v37 = vpop.xlane.xlu1 %1939 }
0x1b15   :  { %v1945_v54 = vadd.f32 1e-16, %v1943_v35  ;;  %v1944_v55 = vadd.f32 1e-16, %v1940_v37 }
0x1b17   :  { %3768 = vrcp.f32 %v1945_v54 }
0x1b18   :  { %3770 = vrcp.f32 %v1944_v55  ;;  %v2002_v57 = vpop.permute.xlu0 %2001 }
0x1b21   :  { %v3769_v30 = vpop.eup %3768 }
0x1b22   :  { %v3771_v31 = vpop.eup %3770  ;;  %v1949_v42 = vmul.f32 %v3769_v30, %v3767_v18 }
0x1b23   :  { %v1947_v48 = vmul.f32 %v3771_v31, %v3765_v41 }
0x1b24   :  { %v1951_v5 = vmul.f32 %v1949_v42, %v4584_v38 }
0x1b25   :  { %v1950_v4 = vmul.f32 %v1947_v48, %v4581_v36 }
0x1b27   :  { %v1952_v39 = vpack.c.bf16 %v1951_v5, %v1950_v4 }
0x1b29   :  { %3507 = vmatpush3.bf16.msra.mxu1 %v1952_v39 }
0x1b2a   :  { %3512 = vmatprep.subr.bf16.mxu1 %v3863_v3 }
0x1b2c   :  { %3509 = vmatmul.mubr.msk.bf16.vlgmr.msra.gmra.mrb[48].mxu1 %vm374_vm12, %v4623_v51 }
0x1b2d   :  { %3513 = vmatpush3.bf16.msra.mxu1 %v4418_v14  ;;  %3524 = vmatprep.mubr.msk.bf16.mxu1 %vm3864_vm1, %v3863_v3 }
0x1b2e   :  { %3514 = vmatprep.subr.bf16.mxu1 %v3863_v3 }
0x1b31   :  { %3515 = vmatpush3.bf16.msra.mxu1 %v4430_v7 }
0x1b32   :  { %3516 = vmatprep.subr.bf16.mxu1 %v3863_v3 }
0x1b35   :  { %3517 = vmatpush3.bf16.msra.mxu1 %v4442_v63 }
0x1b36   :  { %3518 = vmatprep.subr.bf16.mxu1 %v3863_v3 }
0x1b39   :  { %3519 = vmatpush3.bf16.msra.mxu1 %v4452_v11 }
0x1b3a   :  { %3520 = vmatprep.subr.bf16.mxu1 %v3863_v3 }
0x1b3d   :  { %3521 = vmatpush3.bf16.msra.mxu1 %v4462_v15 }
0x1b3e   :  { %3522 = vmatprep.subr.bf16.mxu1 %v3863_v3 }
0x1b41   :  { %3523 = vmatpush3.bf16.msra.mxu1 %v4472_v20 }
0x1b42   :  { %3556 = vmatprep.subr.bf16.mxu1 %v3863_v3 }
0x1bff   :  { %v1987_v9 = vpop.f32.mrb[48].mxu1 }
0x1c00   :  { %v3687_v52 = vpack.i.bf16 %v1987_v9, %v4645_v29  ;;  %v3510_v49 = vpop.f32.mrb[49].mxu1 }
0x1c01   :  { %v1990_v50 = vpop.f32.mrb[50].mxu1 }
0x1c02   :  { %3688 = vrot.lane.b32.xlu1 %v3687_v52, %s3867_s7  ;;  %v3511_v44 = vpop.f32.mrb[51].mxu1 }
0x1c74   :  { %v3689_v53 = vpop.permute.xlu1 %3688 }
0x1c75   :  { %v3691_v56 = vunpack.i.h.bf16 %v3689_v53  ;;  %v3690_v16 = vunpack.i.l.bf16 %v3689_v53 }
0x1c77   :  { %v2004_v59 = vsel %vm214_vm5, %v3690_v16, %v3691_v56 }
0x1c78   :  { %v2005_v58 = vsel %vm812_vm4, %v2004_v59, %v2002_v57 }
0x1c79   :  { %v2006_v60 = vpack.c.bf16 %v2005_v58, %v2005_v58 }
0x1c7b   :  { %3525 = vmatmul.mubr.msk.bf16.vlgmr.msra.gmra.mrb[52].mxu1 %vm1535_vm11, %v2006_v60 }
0x1c7c   :  { %3558 = vmatprep.mubr.msk.bf16.mxu1 %vm3864_vm1, %v3863_v3 }
0x1d4e   :  { %v2044_v29 = vpop.f32.mrb[52].mxu1 }
0x1d4f   :  { %v2045_v46 = vadd.f32 %v4494_v26, %v2044_v29  ;;  %v3526_v40 = vpop.f32.mrb[53].mxu1 }
0x1d50   :  { %v2047_v43 = vpop.f32.mrb[54].mxu1 }
0x1d51   :  { %3772 = vtanh.f32 %v2045_v46  ;;  %v3527_v0 = vpop.f32.mrb[55].mxu1  ;;  %v3157_v1 = vmul.f32 -1.442695, %v2045_v46 }
0x1d53   :  { %3774 = vpow2.f32 %v3157_v1 }
0x1d5b   :  { %v3773_v27 = vpop.eup %3772 }
0x1d5c   :  { %2059 = vrot.lane.b32.xlu1 %v3773_v27, %s3869_s26 }
0x1d5d   :  { %v3775_v45 = vpop.eup %3774 }
0x1d5e   :  { %v2053_v41 = vadd.f32 1.0, %v3775_v45 }
0x1d60   :  { %3776 = vrcp.f32 %v2053_v41 }
0x1d6a   :  { %v3777_v47 = vpop.eup %3776 }
0x1d6b   :  { %v2057_v8 = vmul.f32 %v3777_v47, %v4641_v19 }
0x1dce   :  { %v2060_v18 = vpop.permute.xlu1 %2059 }
0x1dcf   :  { %v2062_v2 = vmul.f32 %v3777_v47, %v2060_v18 }
0x1dd1   :  { %2064 = vrot.lane.b32.xlu1 %v2062_v2, %s3867_s7 }
0x1e43   :  { %v2065_v6 = vpop.permute.xlu1 %2064 }
0x1e44   :  { %v4716_v28 = vadd.f32 %v2065_v6, %v2057_v8 }
0x1e46   :  { %3778 = vtanh.f32 %v4716_v28 }
0x1e50   :  { %v3779_v10 = vpop.eup %3778 }
0x1e51   :  { %2070 = vrot.lane.b32.xlu0 %v3779_v10, %s3869_s26 }
0x1ec3   :  { %v2071_v12 = vpop.permute.xlu0 %2070 }
0x1ec4   :  { %v4720_v13 = vmul.f32 %v3777_v47, %v2071_v12 }
0x1ec6   :  { %v2074_v17 = vpack.c.bf16 %v4720_v13, %v4720_v13 }
0x1ec8   :  { %2076 = vrot.lane.b32.xlu1 %v2074_v17, %s3867_s7 }
0x1f3a   :  { %v2077_v24 = vpop.permute.xlu1 %2076 }
0x1f3b   :  { %v2079_v25 = vand.u32 %v2077_v24, %v4556_v22 }
0x1f3d   :  { %3529 = vmatpush3.bf16.msra.mxu0 %v2079_v25 }
0x1f3e   :  { %3534 = vmatprep.subr.bf16.mxu0 %v3863_v3 }
0x1f40   :  { %3531 = vmatmul.mubr.msk.bf16.vlgmr.msra.gmra.mrb[40].mxu0 %vm1607_vm9, %v4570_v33 }
0x1f41   :  { %3536 = vmatprep.mubr.msk.bf16.mxu0 %vm3864_vm1, %v3863_v3 }
0x2013   :  { %v2115_v19 = vpop.f32.mrb[40].mxu0 }
0x2014   :  { %v2122_v32 = vmul.f32 %v2115_v19, %v4581_v36  ;;  %v3532_v62 = vpop.f32.mrb[41].mxu0 }
0x2015   :  { %v2118_v34 = vpop.f32.mrb[42].mxu0 }
0x2016   :  { %v2123_v61 = vmul.f32 %v2118_v34, %v4584_v38  ;;  %v3533_v35 = vpop.f32.mrb[43].mxu0  ;;  %v2124_v37 = vsel %vm214_vm5, %v2122_v32, 0.0 }
0x2017   :  { %2125 = vadd.xlane.f32.xlu0 %v2124_v37 }
0x2018   :  { %v2127_v54 = vsel %vm214_vm5, %v2123_v61, 0.0 }
0x2019   :  { %2128 = vadd.xlane.f32.xlu1 %v2127_v54 }
0x20a4   :  { %v2126_v55 = vpop.xlane.xlu0 %2125 }
0x20a5   :  { %v2130_v30 = vsel %vm4552_vm7, %v2126_v55, -1e+30 }
0x20a6   :  { %v2129_v31 = vpop.xlane.xlu1 %2128  ;;  %v2132_v48 = vsel %vm1607_vm9, %v2130_v30, -inf }
0x20a7   :  { %v2131_v42 = vsel %vm4559_vm8, %v2129_v31, -1e+30 }
0x20a8   :  { %v2133_v5 = vsel %vm1607_vm9, %v2131_v42, -inf }
0x20a9   :  { %v2134_v4 = vmax.f32 %v2132_v48, %v2133_v5 }
0x20ab   :  { %v2135_v39 = vrot.slane %v2134_v4, 4 }
0x20ad   :  { %v2136_v9 = vmax.f32 %v2134_v4, %v2135_v39 }
0x20af   :  { %v2137_v52 = vrot.slane %v2136_v9, 2 }
0x20b1   :  { %v2138_v49 = vmax.f32 %v2136_v9, %v2137_v52 }
0x20b3   :  { %v2139_v50 = vrot.slane %v2138_v49, 1 }
0x20b5   :  { %v2140_v44 = vmax.f32 %v2138_v49, %v2139_v50 }
0x20b7   :  { %v2141_v53 = vsel %vm4552_vm7, %v2140_v44, 0.0  ;;  %v2142_v16 = vsel %vm4559_vm8, %v2140_v44, 0.0 }
0x20b8   :  { %v2143_v56 = vsel %vm1607_vm9, %v2141_v53, 0.0  ;;  %v2146_v57 = vsel %vm1607_vm9, %v2142_v16, 0.0 }
0x20b9   :  { %2144 = vadd.xlane.f32.xlu0 %v2143_v56 }
0x20bd   :  { %2147 = vadd.xlane.f32.xlu0 %v2146_v57 }
0x2146   :  { %v2145_v59 = vpop.xlane.xlu0 %2144 }
0x2147   :  { %v2149_v58 = vsub.f32 %v2126_v55, %v2145_v59 }
0x2149   :  { %v2151_v60 = vmul.f32 1.442695, %v2149_v58 }
0x214a   :  { %v2148_v29 = vpop.xlane.xlu0 %2147 }
0x214b   :  { %3780 = vpow2.f32 %v2151_v60  ;;  %v2150_v46 = vsub.f32 %v2129_v31, %v2148_v29 }
0x214d   :  { %v2153_v40 = vmul.f32 1.442695, %v2150_v46 }
0x214f   :  { %3782 = vpow2.f32 %v2153_v40 }
0x2155   :  { %v3781_v43 = vpop.eup %3780 }
0x2156   :  { %v2155_v0 = vsel %vm4552_vm7, %v3781_v43, 0.0 }
0x2157   :  { %v2157_v45 = vsel %vm1607_vm9, %v2155_v0, 0.0 }
0x2159   :  { %v3783_v27 = vpop.eup %3782 }
0x215a   :  { %v2156_v1 = vsel %vm4559_vm8, %v3783_v27, 0.0 }
0x215b   :  { %v2158_v41 = vsel %vm1607_vm9, %v2156_v1, 0.0 }
0x215c   :  { %v2159_v47 = vadd.f32 %v2158_v41, %v2157_v45 }
0x215e   :  { %v2160_v18 = vrot.slane %v2159_v47, 4 }
0x2160   :  { %v2161_v2 = vadd.f32 %v2160_v18, %v2159_v47 }
0x2162   :  { %v2162_v8 = vrot.slane %v2161_v2, 2 }
0x2164   :  { %v2163_v6 = vadd.f32 %v2162_v8, %v2161_v2 }
0x2166   :  { %v2164_v10 = vrot.slane %v2163_v6, 1 }
0x2168   :  { %v2165_v12 = vadd.f32 %v2164_v10, %v2163_v6 }
0x216a   :  { %v2167_v17 = vsel %vm4559_vm8, %v2165_v12, 0.0  ;;  %v2166_v24 = vsel %vm4552_vm7, %v2165_v12, 0.0 }
0x216b   :  { %v2171_v25 = vsel %vm1607_vm9, %v2167_v17, 0.0  ;;  %v2168_v19 = vsel %vm1607_vm9, %v2166_v24, 0.0 }
0x216c   :  { %2172 = vadd.xlane.f32.xlu0 %v2171_v25  ;;  %2169 = vadd.xlane.f32.xlu1 %v2168_v19 }
0x2182   :  { %2231 = vrot.lane.b32.xlu0 %v4720_v13, %s3871_s14 }
0x21f9   :  { %v2173_v32 = vpop.xlane.xlu0 %2172  ;;  %v2170_v62 = vpop.xlane.xlu1 %2169 }
0x21fa   :  { %v2175_v34 = vadd.f32 1e-16, %v2173_v32  ;;  %v2174_v61 = vadd.f32 1e-16, %v2170_v62 }
0x21fc   :  { %3784 = vrcp.f32 %v2175_v34 }
0x21fd   :  { %3786 = vrcp.f32 %v2174_v61  ;;  %v2232_v44 = vpop.permute.xlu0 %2231 }
0x2206   :  { %v3785_v35 = vpop.eup %3784 }
0x2207   :  { %v3787_v37 = vpop.eup %3786  ;;  %v2179_v54 = vmul.f32 %v3785_v35, %v3783_v27 }
0x2208   :  { %v2177_v55 = vmul.f32 %v3787_v37, %v3781_v43 }
0x2209   :  { %v2181_v30 = vmul.f32 %v2179_v54, %v4584_v38 }
0x220a   :  { %v2180_v31 = vmul.f32 %v2177_v55, %v4581_v36 }
0x220c   :  { %v2182_v42 = vpack.c.bf16 %v2181_v30, %v2180_v31 }
0x220e   :  { %3535 = vmatpush3.bf16.msra.mxu0 %v2182_v42 }
0x220f   :  { %3540 = vmatprep.subr.bf16.mxu0 %v3863_v3 }
0x2211   :  { %3537 = vmatmul.mubr.msk.bf16.vlgmr.msra.gmra.mrb[44].mxu0 %vm374_vm12, %v4623_v51 }
0x2212   :  { %3541 = vmatpush3.bf16.msra.mxu0 %v4418_v14  ;;  %3552 = vmatprep.mubr.msk.bf16.mxu0 %vm3864_vm1, %v3863_v3 }
0x2213   :  { %3542 = vmatprep.subr.bf16.mxu0 %v3863_v3 }
0x2216   :  { %3543 = vmatpush3.bf16.msra.mxu0 %v4430_v7 }
0x2217   :  { %3544 = vmatprep.subr.bf16.mxu0 %v3863_v3 }
0x221a   :  { %3545 = vmatpush3.bf16.msra.mxu0 %v4442_v63 }
0x221b   :  { %3546 = vmatprep.subr.bf16.mxu0 %v3863_v3 }
0x221e   :  { %3547 = vmatpush3.bf16.msra.mxu0 %v4452_v11 }
0x221f   :  { %3548 = vmatprep.subr.bf16.mxu0 %v3863_v3 }
0x2222   :  { %3549 = vmatpush3.bf16.msra.mxu0 %v4462_v15 }
0x2223   :  { %3550 = vmatprep.subr.bf16.mxu0 %v3863_v3 }
0x2226   :  { %3551 = vmatpush3.bf16.msra.mxu0 %v4472_v20 }
0x2227   :  { %3584 = vmatprep.subr.bf16.mxu0 %v3863_v3 }
0x22e4   :  { %v2217_v48 = vpop.f32.mrb[44].mxu0 }
0x22e5   :  { %v3692_v5 = vpack.i.bf16 %v2217_v48, %v4720_v13  ;;  %v3538_v4 = vpop.f32.mrb[45].mxu0 }
0x22e6   :  { %v2220_v39 = vpop.f32.mrb[46].mxu0 }
0x22e7   :  { %3693 = vrot.lane.b32.xlu1 %v3692_v5, %s3867_s7  ;;  %v3539_v9 = vpop.f32.mrb[47].mxu0 }
0x2359   :  { %v3694_v52 = vpop.permute.xlu1 %3693 }
0x235a   :  { %v3696_v49 = vunpack.i.h.bf16 %v3694_v52  ;;  %v3695_v50 = vunpack.i.l.bf16 %v3694_v52 }
0x235c   :  { %v2234_v53 = vsel %vm214_vm5, %v3695_v50, %v3696_v49 }
0x235d   :  { %v2235_v56 = vsel %vm812_vm4, %v2234_v53, %v2232_v44 }
0x235e   :  { %v2236_v16 = vpack.c.bf16 %v2235_v56, %v2235_v56 }
0x2360   :  { %3553 = vmatmul.mubr.msk.bf16.vlgmr.msra.gmra.mrb[48].mxu0 %vm1535_vm11, %v2236_v16 }
0x2361   :  { %3586 = vmatprep.mubr.msk.bf16.mxu0 %vm3864_vm1, %v3863_v3 }
0x2433   :  { %v2274_v13 = vpop.f32.mrb[48].mxu0 }
0x2434   :  { %v2275_v57 = vadd.f32 %v4494_v26, %v2274_v13  ;;  %v3554_v59 = vpop.f32.mrb[49].mxu0 }
0x2435   :  { %v2277_v58 = vpop.f32.mrb[50].mxu0 }
0x2436   :  { %3788 = vtanh.f32 %v2275_v57  ;;  %v3555_v60 = vpop.f32.mrb[51].mxu0  ;;  %v3161_v46 = vmul.f32 -1.442695, %v2275_v57 }
0x2438   :  { %3790 = vpow2.f32 %v3161_v46 }
0x2440   :  { %v3789_v29 = vpop.eup %3788 }
0x2441   :  { %2289 = vrot.lane.b32.xlu1 %v3789_v29, %s3869_s26 }
0x2442   :  { %v3791_v40 = vpop.eup %3790 }
0x2443   :  { %v2283_v43 = vadd.f32 1.0, %v3791_v40 }
0x2445   :  { %3792 = vrcp.f32 %v2283_v43 }
0x244f   :  { %v3793_v0 = vpop.eup %3792 }
0x2450   :  { %v2287_v45 = vmul.f32 %v3793_v0, %v4716_v28 }
0x24b3   :  { %v2290_v27 = vpop.permute.xlu1 %2289 }
0x24b4   :  { %v2292_v1 = vmul.f32 %v3793_v0, %v2290_v27 }
0x24b6   :  { %2294 = vrot.lane.b32.xlu1 %v2292_v1, %s3867_s7 }
0x2528   :  { %v2295_v26 = vpop.permute.xlu1 %2294 }
0x2529   :  { %v4791_v41 = vadd.f32 %v2295_v26, %v2287_v45 }
0x252b   :  { %3794 = vtanh.f32 %v4791_v41 }
0x2535   :  { %v3795_v47 = vpop.eup %3794 }
0x2536   :  { %2300 = vrot.lane.b32.xlu0 %v3795_v47, %s3869_s26 }
0x25a8   :  { %v2301_v18 = vpop.permute.xlu0 %2300 }
0x25a9   :  { %v4795_v2 = vmul.f32 %v3793_v0, %v2301_v18 }
0x25ab   :  { %v2304_v8 = vpack.c.bf16 %v4795_v2, %v4795_v2 }
0x25ad   :  { %2306 = vrot.lane.b32.xlu1 %v2304_v8, %s3867_s7 }
0x261f   :  { %v2307_v6 = vpop.permute.xlu1 %2306 }
0x2620   :  { %v2309_v10 = vand.u32 %v2307_v6, %v4556_v22 }
0x2622   :  { %3557 = vmatpush3.bf16.msra.mxu1 %v2309_v10 }
0x2623   :  { %3562 = vmatprep.subr.bf16.mxu1 %v3863_v3 }
0x2625   :  { %3559 = vmatmul.mubr.msk.bf16.vlgmr.msra.gmra.mrb[56].mxu1 %vm1607_vm9, %v4570_v33 }
0x2626   :  { %3564 = vmatprep.mubr.msk.bf16.mxu1 %vm3864_vm1, %v3863_v3 }
0x26f8   :  { %v2345_v28 = vpop.f32.mrb[56].mxu1 }
0x26f9   :  { %v2352_v12 = vmul.f32 %v2345_v28, %v4581_v36  ;;  %v3560_v17 = vpop.f32.mrb[57].mxu1 }
0x26fa   :  { %v2348_v24 = vpop.f32.mrb[58].mxu1 }
0x26fb   :  { %v2353_v25 = vmul.f32 %v2348_v24, %v4584_v38  ;;  %v3561_v19 = vpop.f32.mrb[59].mxu1  ;;  %v2354_v32 = vsel %vm214_vm5, %v2352_v12, 0.0 }
0x26fc   :  { %2355 = vadd.xlane.f32.xlu0 %v2354_v32 }
0x26fd   :  { %v2357_v62 = vsel %vm214_vm5, %v2353_v25, 0.0 }
0x26fe   :  { %2358 = vadd.xlane.f32.xlu1 %v2357_v62 }
0x2789   :  { %v2356_v34 = vpop.xlane.xlu0 %2355 }
0x278a   :  { %v2360_v61 = vsel %vm4552_vm7, %v2356_v34, -1e+30 }
0x278b   :  { %v2359_v35 = vpop.xlane.xlu1 %2358  ;;  %v2362_v54 = vsel %vm1607_vm9, %v2360_v61, -inf }
0x278c   :  { %v2361_v37 = vsel %vm4559_vm8, %v2359_v35, -1e+30 }
0x278d   :  { %v2363_v55 = vsel %vm1607_vm9, %v2361_v37, -inf }
0x278e   :  { %v2364_v30 = vmax.f32 %v2362_v54, %v2363_v55 }
0x2790   :  { %v2365_v31 = vrot.slane %v2364_v30, 4 }
0x2792   :  { %v2366_v42 = vmax.f32 %v2364_v30, %v2365_v31 }
0x2794   :  { %v2367_v48 = vrot.slane %v2366_v42, 2 }
0x2796   :  { %v2368_v5 = vmax.f32 %v2366_v42, %v2367_v48 }
0x2798   :  { %v2369_v4 = vrot.slane %v2368_v5, 1 }
0x279a   :  { %v2370_v39 = vmax.f32 %v2368_v5, %v2369_v4 }
0x279c   :  { %v2371_v9 = vsel %vm4552_vm7, %v2370_v39, 0.0  ;;  %v2372_v49 = vsel %vm4559_vm8, %v2370_v39, 0.0 }
0x279d   :  { %v2373_v52 = vsel %vm1607_vm9, %v2371_v9, 0.0  ;;  %v2376_v50 = vsel %vm1607_vm9, %v2372_v49, 0.0  ;;  %v4865_v49 = vld [vmem:[%s5078_s16] ss:$0 sm:$0xff] }
0x279e   :  { %2374 = vadd.xlane.f32.xlu0 %v2373_v52 }
0x27a2   :  { %2377 = vadd.xlane.f32.xlu0 %v2376_v50 }
0x282b   :  { %v2375_v44 = vpop.xlane.xlu0 %2374 }
0x282c   :  { %v2379_v53 = vsub.f32 %v2356_v34, %v2375_v44 }
0x282e   :  { %v2381_v56 = vmul.f32 1.442695, %v2379_v53 }
0x282f   :  { %v2378_v16 = vpop.xlane.xlu0 %2377 }
0x2830   :  { %3796 = vpow2.f32 %v2381_v56  ;;  %v2380_v13 = vsub.f32 %v2359_v35, %v2378_v16 }
0x2832   :  { %v2383_v57 = vmul.f32 1.442695, %v2380_v13 }
0x2834   :  { %3798 = vpow2.f32 %v2383_v57 }
0x283a   :  { %v3797_v59 = vpop.eup %3796 }
0x283b   :  { %v2385_v58 = vsel %vm4552_vm7, %v3797_v59, 0.0 }
0x283c   :  { %v2387_v46 = vsel %vm1607_vm9, %v2385_v58, 0.0 }
0x283e   :  { %v3799_v60 = vpop.eup %3798 }
0x283f   :  { %v2386_v29 = vsel %vm4559_vm8, %v3799_v60, 0.0 }
0x2840   :  { %v2388_v40 = vsel %vm1607_vm9, %v2386_v29, 0.0 }
0x2841   :  { %v2389_v43 = vadd.f32 %v2388_v40, %v2387_v46 }
0x2843   :  { %v2390_v0 = vrot.slane %v2389_v43, 4 }
0x2845   :  { %v2391_v27 = vadd.f32 %v2390_v0, %v2389_v43 }
0x2847   :  { %v2392_v1 = vrot.slane %v2391_v27, 2 }
0x2849   :  { %v2393_v45 = vadd.f32 %v2392_v1, %v2391_v27 }
0x284b   :  { %v2394_v26 = vrot.slane %v2393_v45, 1 }
0x284d   :  { %v2395_v47 = vadd.f32 %v2394_v26, %v2393_v45 }
0x284f   :  { %v2397_v18 = vsel %vm4559_vm8, %v2395_v47, 0.0  ;;  %v2396_v8 = vsel %vm4552_vm7, %v2395_v47, 0.0 }
0x2850   :  { %v2401_v6 = vsel %vm1607_vm9, %v2397_v18, 0.0  ;;  %v2398_v10 = vsel %vm1607_vm9, %v2396_v8, 0.0 }
0x2851   :  { %2402 = vadd.xlane.f32.xlu0 %v2401_v6  ;;  %2399 = vadd.xlane.f32.xlu1 %v2398_v10 }
0x2867   :  { %2461 = vrot.lane.b32.xlu0 %v4795_v2, %s3871_s14 }
0x28de   :  { %v2403_v28 = vpop.xlane.xlu0 %2402  ;;  %v2400_v12 = vpop.xlane.xlu1 %2399 }
0x28df   :  { %v2405_v17 = vadd.f32 1e-16, %v2403_v28  ;;  %v2404_v24 = vadd.f32 1e-16, %v2400_v12 }
0x28e1   :  { %3800 = vrcp.f32 %v2405_v17 }
0x28e2   :  { %3802 = vrcp.f32 %v2404_v24  ;;  %v2462_v4 = vpop.permute.xlu0 %2461 }
0x28eb   :  { %v3801_v25 = vpop.eup %3800 }
0x28ec   :  { %v3803_v19 = vpop.eup %3802  ;;  %v2409_v32 = vmul.f32 %v3801_v25, %v3799_v60 }
0x28ed   :  { %v2407_v62 = vmul.f32 %v3803_v19, %v3797_v59 }
0x28ee   :  { %v2411_v34 = vmul.f32 %v2409_v32, %v4584_v38 }
0x28ef   :  { %v2410_v61 = vmul.f32 %v2407_v62, %v4581_v36 }
0x28f1   :  { %v2412_v35 = vpack.c.bf16 %v2411_v34, %v2410_v61 }
0x28f3   :  { %3563 = vmatpush3.bf16.msra.mxu1 %v2412_v35 }
0x28f4   :  { %3568 = vmatprep.subr.bf16.mxu1 %v3863_v3 }
0x28f6   :  { %3565 = vmatmul.mubr.msk.bf16.vlgmr.msra.gmra.mrb[60].mxu1 %vm374_vm12, %v4623_v51 }
0x28f7   :  { %3569 = vmatpush3.bf16.msra.mxu1 %v4418_v14  ;;  %3580 = vmatprep.mubr.msk.bf16.mxu1 %vm3864_vm1, %v3863_v3 }
0x28f8   :  { %3570 = vmatprep.subr.bf16.mxu1 %v3863_v3 }
0x28fb   :  { %3571 = vmatpush3.bf16.msra.mxu1 %v4430_v7 }
0x28fc   :  { %3572 = vmatprep.subr.bf16.mxu1 %v3863_v3 }
0x28ff   :  { %3573 = vmatpush3.bf16.msra.mxu1 %v4442_v63 }
0x2900   :  { %3574 = vmatprep.subr.bf16.mxu1 %v3863_v3 }
0x2903   :  { %3575 = vmatpush3.bf16.msra.mxu1 %v4452_v11 }
0x2904   :  { %3576 = vmatprep.subr.bf16.mxu1 %v3863_v3 }
0x2907   :  { %3577 = vmatpush3.bf16.msra.mxu1 %v4462_v15 }
0x2908   :  { %3578 = vmatprep.subr.bf16.mxu1 %v3863_v3 }
0x290b   :  { %3579 = vmatpush3.bf16.msra.mxu1 %v4472_v20 }
0x290c   :  { %3612 = vmatprep.subr.bf16.mxu1 %v3863_v3 }
0x29c9   :  { %v2447_v37 = vpop.f32.mrb[60].mxu1 }
0x29ca   :  { %v3697_v54 = vpack.i.bf16 %v2447_v37, %v4795_v2  ;;  %v3566_v55 = vpop.f32.mrb[61].mxu1 }
0x29cb   :  { %v2450_v30 = vpop.f32.mrb[62].mxu1 }
0x29cc   :  { %3698 = vrot.lane.b32.xlu1 %v3697_v54, %s3867_s7  ;;  %v3567_v31 = vpop.f32.mrb[63].mxu1 }
0x2a3e   :  { %v3699_v42 = vpop.permute.xlu1 %3698 }
0x2a3f   :  { %v3701_v48 = vunpack.i.h.bf16 %v3699_v42  ;;  %v3700_v5 = vunpack.i.l.bf16 %v3699_v42 }
0x2a41   :  { %v2464_v39 = vsel %vm214_vm5, %v3700_v5, %v3701_v48 }
0x2a42   :  { %v2465_v9 = vsel %vm812_vm4, %v2464_v39, %v2462_v4 }
0x2a43   :  { %v2466_v52 = vpack.c.bf16 %v2465_v9, %v2465_v9 }
0x2a45   :  { %3581 = vmatmul.mubr.msk.bf16.vlgmr.msra.gmra.mrb[64].mxu1 %vm1535_vm11, %v2466_v52 }
0x2a46   :  { %3614 = vmatprep.mubr.msk.bf16.mxu1 %vm3864_vm1, %v3863_v3 }
0x2b18   :  { %v2504_v2 = vpop.f32.mrb[64].mxu1 }
0x2b19   :  { %v2505_v50 = vadd.f32 %v4865_v49, %v2504_v2  ;;  %v3582_v44 = vpop.f32.mrb[65].mxu1 }
0x2b1a   :  { %v2507_v53 = vpop.f32.mrb[66].mxu1 }
0x2b1b   :  { %3804 = vtanh.f32 %v2505_v50  ;;  %v3583_v56 = vpop.f32.mrb[67].mxu1  ;;  %v3165_v13 = vmul.f32 -1.442695, %v2505_v50 }
0x2b1d   :  { %3806 = vpow2.f32 %v3165_v13 }
0x2b25   :  { %v3805_v16 = vpop.eup %3804 }
0x2b26   :  { %2519 = vrot.lane.b32.xlu1 %v3805_v16, %s3869_s26 }
0x2b27   :  { %v3807_v57 = vpop.eup %3806 }
0x2b28   :  { %v2513_v59 = vadd.f32 1.0, %v3807_v57 }
0x2b2a   :  { %3808 = vrcp.f32 %v2513_v59 }
0x2b34   :  { %v3809_v58 = vpop.eup %3808 }
0x2b35   :  { %v2517_v46 = vmul.f32 %v3809_v58, %v4791_v41 }
0x2b98   :  { %v2520_v60 = vpop.permute.xlu1 %2519 }
0x2b99   :  { %v2522_v29 = vmul.f32 %v3809_v58, %v2520_v60 }
0x2b9b   :  { %2524 = vrot.lane.b32.xlu1 %v2522_v29, %s3867_s7 }
0x2c0d   :  { %v2525_v40 = vpop.permute.xlu1 %2524 }
0x2c0e   :  { %v4871_v43 = vadd.f32 %v2525_v40, %v2517_v46 }
0x2c10   :  { %3810 = vtanh.f32 %v4871_v43 }
0x2c1a   :  { %v3811_v0 = vpop.eup %3810 }
0x2c1b   :  { %2530 = vrot.lane.b32.xlu0 %v3811_v0, %s3869_s26 }
0x2c8d   :  { %v2531_v27 = vpop.permute.xlu0 %2530 }
0x2c8e   :  { %v4875_v1 = vmul.f32 %v3809_v58, %v2531_v27 }
0x2c90   :  { %v2534_v45 = vpack.c.bf16 %v4875_v1, %v4875_v1 }
0x2c92   :  { %2536 = vrot.lane.b32.xlu1 %v2534_v45, %s3867_s7 }
0x2d04   :  { %v2537_v26 = vpop.permute.xlu1 %2536 }
0x2d05   :  { %v2539_v47 = vand.u32 %v2537_v26, %v4556_v22 }
0x2d07   :  { %3585 = vmatpush3.bf16.msra.mxu0 %v2539_v47 }
0x2d08   :  { %3590 = vmatprep.subr.bf16.mxu0 %v3863_v3 }
0x2d0a   :  { %3587 = vmatmul.mubr.msk.bf16.vlgmr.msra.gmra.mrb[52].mxu0 %vm1607_vm9, %v4570_v33 }
0x2d0b   :  { %3592 = vmatprep.mubr.msk.bf16.mxu0 %vm3864_vm1, %v3863_v3 }
0x2ddd   :  { %v2575_v41 = vpop.f32.mrb[52].mxu0 }
0x2dde   :  { %v2582_v18 = vmul.f32 %v2575_v41, %v4581_v36  ;;  %v3588_v8 = vpop.f32.mrb[53].mxu0 }
0x2ddf   :  { %v2578_v6 = vpop.f32.mrb[54].mxu0 }
0x2de0   :  { %v2583_v10 = vmul.f32 %v2578_v6, %v4584_v38  ;;  %v3589_v28 = vpop.f32.mrb[55].mxu0  ;;  %v2584_v12 = vsel %vm214_vm5, %v2582_v18, 0.0 }
0x2de1   :  { %2585 = vadd.xlane.f32.xlu0 %v2584_v12 }
0x2de2   :  { %v2587_v17 = vsel %vm214_vm5, %v2583_v10, 0.0 }
0x2de3   :  { %2588 = vadd.xlane.f32.xlu1 %v2587_v17 }
0x2e6e   :  { %v2586_v24 = vpop.xlane.xlu0 %2585 }
0x2e6f   :  { %v2590_v25 = vsel %vm4552_vm7, %v2586_v24, -1e+30 }
0x2e70   :  { %v2589_v19 = vpop.xlane.xlu1 %2588  ;;  %v2592_v62 = vsel %vm1607_vm9, %v2590_v25, -inf }
0x2e71   :  { %v2591_v32 = vsel %vm4559_vm8, %v2589_v19, -1e+30 }
0x2e72   :  { %v2593_v34 = vsel %vm1607_vm9, %v2591_v32, -inf }
0x2e73   :  { %v2594_v61 = vmax.f32 %v2592_v62, %v2593_v34 }
0x2e75   :  { %v2595_v35 = vrot.slane %v2594_v61, 4 }
0x2e77   :  { %v2596_v37 = vmax.f32 %v2594_v61, %v2595_v35 }
0x2e79   :  { %v2597_v54 = vrot.slane %v2596_v37, 2 }
0x2e7b   :  { %v2598_v55 = vmax.f32 %v2596_v37, %v2597_v54 }
0x2e7d   :  { %v2599_v30 = vrot.slane %v2598_v55, 1 }
0x2e7f   :  { %v2600_v31 = vmax.f32 %v2598_v55, %v2599_v30 }
0x2e81   :  { %v2601_v42 = vsel %vm4552_vm7, %v2600_v31, 0.0  ;;  %v2602_v5 = vsel %vm4559_vm8, %v2600_v31, 0.0 }
0x2e82   :  { %v2603_v48 = vsel %vm1607_vm9, %v2601_v42, 0.0  ;;  %v2606_v4 = vsel %vm1607_vm9, %v2602_v5, 0.0 }
0x2e83   :  { %2604 = vadd.xlane.f32.xlu0 %v2603_v48 }
0x2e87   :  { %2607 = vadd.xlane.f32.xlu0 %v2606_v4 }
0x2f10   :  { %v2605_v39 = vpop.xlane.xlu0 %2604 }
0x2f11   :  { %v2609_v9 = vsub.f32 %v2586_v24, %v2605_v39 }
0x2f13   :  { %v2611_v52 = vmul.f32 1.442695, %v2609_v9 }
0x2f14   :  { %v2608_v2 = vpop.xlane.xlu0 %2607 }
0x2f15   :  { %3812 = vpow2.f32 %v2611_v52  ;;  %v2610_v50 = vsub.f32 %v2589_v19, %v2608_v2 }
0x2f17   :  { %v2613_v44 = vmul.f32 1.442695, %v2610_v50 }
0x2f19   :  { %3814 = vpow2.f32 %v2613_v44 }
0x2f1f   :  { %v3813_v53 = vpop.eup %3812 }
0x2f20   :  { %v2615_v56 = vsel %vm4552_vm7, %v3813_v53, 0.0 }
0x2f21   :  { %v2617_v57 = vsel %vm1607_vm9, %v2615_v56, 0.0 }
0x2f23   :  { %v3815_v16 = vpop.eup %3814 }
0x2f24   :  { %v2616_v13 = vsel %vm4559_vm8, %v3815_v16, 0.0 }
0x2f25   :  { %v2618_v59 = vsel %vm1607_vm9, %v2616_v13, 0.0 }
0x2f26   :  { %v2619_v58 = vadd.f32 %v2618_v59, %v2617_v57 }
0x2f28   :  { %v2620_v60 = vrot.slane %v2619_v58, 4 }
0x2f2a   :  { %v2621_v29 = vadd.f32 %v2620_v60, %v2619_v58 }
0x2f2c   :  { %v2622_v46 = vrot.slane %v2621_v29, 2 }
0x2f2e   :  { %v2623_v40 = vadd.f32 %v2622_v46, %v2621_v29 }
0x2f30   :  { %v2624_v0 = vrot.slane %v2623_v40, 1 }
0x2f32   :  { %v2625_v27 = vadd.f32 %v2624_v0, %v2623_v40 }
0x2f34   :  { %v2627_v45 = vsel %vm4559_vm8, %v2625_v27, 0.0  ;;  %v2626_v26 = vsel %vm4552_vm7, %v2625_v27, 0.0 }
0x2f35   :  { %v2631_v47 = vsel %vm1607_vm9, %v2627_v45, 0.0  ;;  %v2628_v41 = vsel %vm1607_vm9, %v2626_v26, 0.0 }
0x2f36   :  { %2632 = vadd.xlane.f32.xlu0 %v2631_v47  ;;  %2629 = vadd.xlane.f32.xlu1 %v2628_v41 }
0x2f4c   :  { %2691 = vrot.lane.b32.xlu0 %v4875_v1, %s3871_s14 }
0x2fc3   :  { %v2633_v18 = vpop.xlane.xlu0 %2632  ;;  %v2630_v8 = vpop.xlane.xlu1 %2629 }
0x2fc4   :  { %v2635_v6 = vadd.f32 1e-16, %v2633_v18  ;;  %v2634_v10 = vadd.f32 1e-16, %v2630_v8 }
0x2fc6   :  { %3816 = vrcp.f32 %v2635_v6 }
0x2fc7   :  { %3818 = vrcp.f32 %v2634_v10  ;;  %v2692_v37 = vpop.permute.xlu0 %2691 }
0x2fd0   :  { %v3817_v28 = vpop.eup %3816 }
0x2fd1   :  { %v3819_v12 = vpop.eup %3818  ;;  %v2639_v17 = vmul.f32 %v3817_v28, %v3815_v16 }
0x2fd2   :  { %v2637_v24 = vmul.f32 %v3819_v12, %v3813_v53 }
0x2fd3   :  { %v2641_v25 = vmul.f32 %v2639_v17, %v4584_v38 }
0x2fd4   :  { %v2640_v19 = vmul.f32 %v2637_v24, %v4581_v36 }
0x2fd6   :  { %v2642_v32 = vpack.c.bf16 %v2641_v25, %v2640_v19 }
0x2fd8   :  { %3591 = vmatpush3.bf16.msra.mxu0 %v2642_v32 }
0x2fd9   :  { %3596 = vmatprep.subr.bf16.mxu0 %v3863_v3 }
0x2fdb   :  { %3593 = vmatmul.mubr.msk.bf16.vlgmr.msra.gmra.mrb[56].mxu0 %vm374_vm12, %v4623_v51 }
0x2fdc   :  { %3597 = vmatpush3.bf16.msra.mxu0 %v4418_v14  ;;  %3608 = vmatprep.mubr.msk.bf16.mxu0 %vm3864_vm1, %v3863_v3 }
0x2fdd   :  { %3598 = vmatprep.subr.bf16.mxu0 %v3863_v3 }
0x2fe0   :  { %3599 = vmatpush3.bf16.msra.mxu0 %v4430_v7 }
0x2fe1   :  { %3600 = vmatprep.subr.bf16.mxu0 %v3863_v3 }
0x2fe4   :  { %3601 = vmatpush3.bf16.msra.mxu0 %v4442_v63 }
0x2fe5   :  { %3602 = vmatprep.subr.bf16.mxu0 %v3863_v3 }
0x2fe8   :  { %3603 = vmatpush3.bf16.msra.mxu0 %v4452_v11 }
0x2fe9   :  { %3604 = vmatprep.subr.bf16.mxu0 %v3863_v3 }
0x2fec   :  { %3605 = vmatpush3.bf16.msra.mxu0 %v4462_v15 }
0x2fed   :  { %3606 = vmatprep.subr.bf16.mxu0 %v3863_v3 }
0x2ff0   :  { %3607 = vmatpush3.bf16.msra.mxu0 %v4472_v20 }
0x2ff1   :  { %3636 = vmatprep.subr.bf16.mxu0 %v3863_v3 }
0x30ae   :  { %v2677_v14 = vpop.f32.mrb[56].mxu0 }
0x30af   :  { %v3702_v7 = vpack.i.bf16 %v2677_v14, %v4875_v1  ;;  %v3594_v62 = vpop.f32.mrb[57].mxu0 }
0x30b0   :  { %v2680_v34 = vpop.f32.mrb[58].mxu0 }
0x30b1   :  { %3703 = vrot.lane.b32.xlu1 %v3702_v7, %s3867_s7  ;;  %v3595_v63 = vpop.f32.mrb[59].mxu0 }
0x3123   :  { %v3704_v61 = vpop.permute.xlu1 %3703 }
0x3124   :  { %v3706_v11 = vunpack.i.h.bf16 %v3704_v61  ;;  %v3705_v35 = vunpack.i.l.bf16 %v3704_v61 }
0x3126   :  { %v2694_v15 = vsel %vm214_vm5, %v3705_v35, %v3706_v11 }
0x3127   :  { %v2695_v54 = vsel %vm812_vm4, %v2694_v15, %v2692_v37 }
0x3128   :  { %v2696_v55 = vpack.c.bf16 %v2695_v54, %v2695_v54 }
0x312a   :  { %3609 = vmatmul.mubr.msk.bf16.vlgmr.msra.gmra.mrb[60].mxu0 %vm1535_vm11, %v2696_v55 }
0x312b   :  { %3640 = vmatprep.mubr.msk.bf16.mxu0 %vm3864_vm1, %v3863_v3 }
0x31fd   :  { %v2734_v20 = vpop.f32.mrb[60].mxu0 }
0x31fe   :  { %v2735_v1 = vadd.f32 %v4865_v49, %v2734_v20  ;;  %v3610_v30 = vpop.f32.mrb[61].mxu0 }
0x31ff   :  { %v2737_v31 = vpop.f32.mrb[62].mxu0 }
0x3200   :  { %3820 = vtanh.f32 %v2735_v1  ;;  %v3611_v42 = vpop.f32.mrb[63].mxu0  ;;  %v3169_v5 = vmul.f32 -1.442695, %v2735_v1 }
0x3202   :  { %3822 = vpow2.f32 %v3169_v5 }
0x320a   :  { %v3821_v48 = vpop.eup %3820 }
0x320b   :  { %2749 = vrot.lane.b32.xlu1 %v3821_v48, %s3869_s26 }
0x320c   :  { %v3823_v4 = vpop.eup %3822 }
0x320d   :  { %v2743_v39 = vadd.f32 1.0, %v3823_v4 }
0x320f   :  { %3824 = vrcp.f32 %v2743_v39 }
0x3219   :  { %v3825_v9 = vpop.eup %3824 }
0x321a   :  { %v2747_v50 = vmul.f32 %v3825_v9, %v4871_v43 }
0x327d   :  { %v2750_v52 = vpop.permute.xlu1 %2749 }
0x327e   :  { %v2752_v2 = vmul.f32 %v3825_v9, %v2750_v52 }
0x3280   :  { %2754 = vrot.lane.b32.xlu1 %v2752_v2, %s3867_s7 }
0x32f2   :  { %v2755_v49 = vpop.permute.xlu1 %2754 }
0x32f3   :  { %v2757_v44 = vadd.f32 %v2755_v49, %v2747_v50 }
0x32f5   :  { %3826 = vtanh.f32 %v2757_v44 }
0x32ff   :  { %v3827_v53 = vpop.eup %3826 }
0x3300   :  { %2760 = vrot.lane.b32.xlu0 %v3827_v53, %s3869_s26 }
0x3372   :  { %v2761_v56 = vpop.permute.xlu0 %2760 }
0x3373   :  { %v4947_v16 = vmul.f32 %v3825_v9, %v2761_v56 }
0x3375   :  { %v2764_v13 = vpack.c.bf16 %v4947_v16, %v4947_v16 }
0x3377   :  { %2766 = vrot.lane.b32.xlu1 %v2764_v13, %s3867_s7 }
0x33e9   :  { %v2767_v57 = vpop.permute.xlu1 %2766 }
0x33ea   :  { %v2769_v59 = vand.u32 %v2767_v57, %v4556_v22 }
0x33ec   :  { %3613 = vmatpush3.bf16.msra.mxu1 %v2769_v59 }
0x33ed   :  { %3618 = vmatprep.subr.bf16.mxu1 %v3863_v3 }
0x33ef   :  { %3615 = vmatmul.mubr.msk.bf16.vlgmr.msra.gmra.mrb[68].mxu1 %vm1607_vm9, %v4570_v33 }
0x33f0   :  { %3620 = vmatprep.mubr.msk.bf16.mxu1 %vm3864_vm1, %v3863_v3 }
0x34c2   :  { %v2805_v43 = vpop.f32.mrb[68].mxu1 }
0x34c3   :  { %v2812_v58 = vmul.f32 %v2805_v43, %v4581_v36  ;;  %v3616_v60 = vpop.f32.mrb[69].mxu1  ;;  %v2922_v43 = vld [vmem:[%s5079_s17] sm:$0xff] }
0x34c4   :  { %v2808_v29 = vpop.f32.mrb[70].mxu1 }
0x34c5   :  { %v2813_v46 = vmul.f32 %v2808_v29, %v4584_v38  ;;  %v3617_v40 = vpop.f32.mrb[71].mxu1  ;;  %v2814_v0 = vsel %vm214_vm5, %v2812_v58, 0.0  ;;  %v2926_v29 = vld [vmem:[%s5079_s17 + $0x20] sm:$0xff] }
0x34c6   :  { %2815 = vadd.xlane.f32.xlu0 %v2814_v0  ;;  %v2928_v0 = vld [vmem:[%s5079_s17 + $0x30] sm:$0xff] }
0x34c7   :  { %v2817_v22 = vsel %vm214_vm5, %v2813_v46, 0.0  ;;  %v2927_v46 = vld [vmem:[%s5079_s17 + $0x28] sm:$0xff] }
0x34c8   :  { %2818 = vadd.xlane.f32.xlu1 %v2817_v22  ;;  %v2933_v40 = vpack.c.bf16 %v2927_v46, %v2926_v29  ;;  %v2929_v22 = vld [vmem:[%s5079_s17 + $0x38] sm:$0xff] }
0x3553   :  { %v2816_v27 = vpop.xlane.xlu0 %2815 }
0x3554   :  { %v2820_v33 = vsel %vm4552_vm7, %v2816_v27, -1e+30 }
0x3555   :  { %v2819_v45 = vpop.xlane.xlu1 %2818  ;;  %v2822_v47 = vsel %vm1607_vm9, %v2820_v33, -inf }
0x3556   :  { %v2821_v26 = vsel %vm4559_vm8, %v2819_v45, -1e+30 }
0x3557   :  { %v2823_v41 = vsel %vm1607_vm9, %v2821_v26, -inf }
0x3558   :  { %v2824_v18 = vmax.f32 %v2822_v47, %v2823_v41 }
0x355a   :  { %v2825_v8 = vrot.slane %v2824_v18, 4 }
0x355c   :  { %v2826_v6 = vmax.f32 %v2824_v18, %v2825_v8 }
0x355e   :  { %v2827_v10 = vrot.slane %v2826_v6, 2 }
0x3560   :  { %v2828_v28 = vmax.f32 %v2826_v6, %v2827_v10 }
0x3562   :  { %v2829_v12 = vrot.slane %v2828_v28, 1 }
0x3564   :  { %v2830_v17 = vmax.f32 %v2828_v28, %v2829_v12  ;;  %v3172_v12 = vld [vmem:[%s5080_s18] ss:$0 sm:$0xff] }
0x3566   :  { %v2831_v24 = vsel %vm4552_vm7, %v2830_v17, 0.0  ;;  %v2832_v19 = vsel %vm4559_vm8, %v2830_v17, 0.0 }
0x3567   :  { %v2833_v25 = vsel %vm1607_vm9, %v2831_v24, 0.0  ;;  %v2836_v32 = vsel %vm1607_vm9, %v2832_v19, 0.0 }
0x3568   :  { %2834 = vadd.xlane.f32.xlu0 %v2833_v25 }
0x356c   :  { %2837 = vadd.xlane.f32.xlu0 %v2836_v32 }
0x35f5   :  { %v2835_v14 = vpop.xlane.xlu0 %2834 }
0x35f6   :  { %v2839_v7 = vsub.f32 %v2816_v27, %v2835_v14  ;;  %v2934_v27 = vpack.c.bf16 %v2929_v22, %v2928_v0 }
0x35f8   :  { %v2841_v62 = vmul.f32 1.442695, %v2839_v7 }
0x35f9   :  { %v2838_v34 = vpop.xlane.xlu0 %2837 }
0x35fa   :  { %3828 = vpow2.f32 %v2841_v62  ;;  %v2840_v63 = vsub.f32 %v2819_v45, %v2838_v34 }
0x35fc   :  { %v2843_v61 = vmul.f32 1.442695, %v2840_v63 }
0x35fe   :  { %3830 = vpow2.f32 %v2843_v61  ;;  %v3017_v61 = vld [vmem:[%s5083_s21] sm:$0xff] }
0x3604   :  { %v3829_v11 = vpop.eup %3828 }
0x3605   :  { %v2845_v35 = vsel %vm4552_vm7, %v3829_v11, 0.0 }
0x3606   :  { %v2847_v54 = vsel %vm1607_vm9, %v2845_v35, 0.0 }
0x3608   :  { %v3831_v37 = vpop.eup %3830 }
0x3609   :  { %v2846_v15 = vsel %vm4559_vm8, %v3831_v37, 0.0 }
0x360a   :  { %v2848_v55 = vsel %vm1607_vm9, %v2846_v15, 0.0  ;;  %v3020_v15 = vld [vmem:[%s5083_s21 + $0x18] sm:$0xff] }
0x360b   :  { %v2849_v20 = vadd.f32 %v2848_v55, %v2847_v54 }
0x360d   :  { %v2850_v1 = vrot.slane %v2849_v20, 4 }
0x360f   :  { %v2851_v30 = vadd.f32 %v2850_v1, %v2849_v20 }
0x3611   :  { %v2852_v31 = vrot.slane %v2851_v30, 2 }
0x3613   :  { %v2853_v42 = vadd.f32 %v2852_v31, %v2851_v30  ;;  %v3174_v31 = vld [vmem:[%s5081_s19] ss:$0 sm:$0xff]  ;;  %s3839_s19 = scalar_lea.vmem %s3083_s12, 64 }
0x3614   :  { %p3840_p0 = scmp.ne.s32.totalorder %s3083_s12, %s3839_s19  ;;  %p3845_p2 = scmp.lt.s32.totalorder %s3839_s19, %s3839_s19 }
0x3615   :  { %v2854_v48 = vrot.slane %v2853_v42, 1 }
0x3616   :  { %p3846_p3 = por %p3845_p2, %p3844_p1 }
0x3617   :  { %v2855_v5 = vadd.f32 %v2854_v48, %v2853_v42  ;;  %v3175_v48 = vld [vmem:[%s5082_s20] ss:$0 sm:$0xff] }
0x3618   :  { %p3847_p4 = pnand %p3846_p3, %p3840_p0 }
0x3619   :  { %v2857_v4 = vsel %vm4559_vm8, %v2855_v5, 0.0  ;;  %v2856_v39 = vsel %vm4552_vm7, %v2855_v5, 0.0 }
0x361a   :  { %v2861_v9 = vsel %vm1607_vm9, %v2857_v4, 0.0  ;;  %v2858_v52 = vsel %vm1607_vm9, %v2856_v39, 0.0 }
0x361b   :  { %2862 = vadd.xlane.f32.xlu0 %v2861_v9  ;;  %2859 = vadd.xlane.f32.xlu1 %v2858_v52 }
0x36a8   :  { %v2863_v2 = vpop.xlane.xlu0 %2862  ;;  %v2860_v50 = vpop.xlane.xlu1 %2859 }
0x36a9   :  { %v2865_v49 = vadd.f32 1e-16, %v2863_v2  ;;  %v2864_v44 = vadd.f32 1e-16, %v2860_v50 }
0x36ab   :  { %3832 = vrcp.f32 %v2865_v49 }
0x36ac   :  { %3834 = vrcp.f32 %v2864_v44 }
0x36b5   :  { %v3833_v53 = vpop.eup %3832 }
0x36b6   :  { %v3835_v56 = vpop.eup %3834  ;;  %v2869_v13 = vmul.f32 %v3833_v53, %v3831_v37  ;;  %v3019_v37 = vld [vmem:[%s5083_s21 + $0x10] sm:$0xff] }
0x36b7   :  { %v2867_v23 = vmul.f32 %v3835_v56, %v3829_v11  ;;  %v3018_v11 = vld [vmem:[%s5083_s21 + $0x8] sm:$0xff]  ;;  %v3023_v54 = vpack.c.bf16 %v3020_v15, %v3019_v37 }
0x36b8   :  { %v2871_v57 = vmul.f32 %v2869_v13, %v4584_v38  ;;  %v2923_v38 = vld [vmem:[%s5079_s17 + $0x8] sm:$0xff]  ;;  %v3022_v35 = vpack.c.bf16 %v3018_v11, %v3017_v61 }
0x36b9   :  { %v2870_v21 = vmul.f32 %v2867_v23, %v4581_v36  ;;  %v2924_v36 = vld [vmem:[%s5079_s17 + $0x10] sm:$0xff]  ;;  %v2931_v58 = vpack.c.bf16 %v2923_v38, %v2922_v43 }
0x36ba   :  { %3637 = vmatpush3.bf16.msra.mxu0 %v3022_v35 }
0x36bb   :  { %v2872_v59 = vpack.c.bf16 %v2871_v57, %v2870_v21  ;;  %3638 = vmatprep.subr.bf16.mxu0 %v3863_v3 }
0x36bd   :  { %3619 = vmatpush3.bf16.msra.mxu1 %v2872_v59 }
0x36be   :  { %3624 = vmatprep.subr.bf16.mxu1 %v3863_v3  ;;  %3639 = vmatpush3.bf16.msra.mxu0 %v3023_v54 }
0x36c0   :  { %3621 = vmatmul.mubr.msk.bf16.vlgmr.msra.gmra.mrb[72].mxu1 %vm374_vm12, %v4623_v51  ;;  %v2925_v51 = vld [vmem:[%s5079_s17 + $0x18] sm:$0xff]  ;;  %vm3074_vm12 = vcmask 26624  }
0x36c1   :  { %3632 = vmatprep.mubr.msk.bf16.mxu1 %vm3864_vm1, %v3863_v3  ;;  %3625 = vmatpush3.bf16.msra.mxu1 %v2931_v58  ;;  %v2932_v60 = vpack.c.bf16 %v2925_v51, %v2924_v36  ;;  %vm2985_vm1 = vcmask 256000  }
0x36c2   :  { %3626 = vmatprep.subr.bf16.mxu1 %v3863_v3 }
0x36c5   :  { %3627 = vmatpush3.bf16.msra.mxu1 %v2932_v60 }
0x36c6   :  { %3628 = vmatprep.subr.bf16.mxu1 %v3863_v3 }
0x36c9   :  { %3629 = vmatpush3.bf16.msra.mxu1 %v2933_v40 }
0x36ca   :  { %3630 = vmatprep.subr.bf16.mxu1 %v3863_v3  ;;  %v3176_v3 = vld [vmem:[%s5084_s22] ss:$0 sm:$0xff] }
0x36cd   :  { %3631 = vmatpush3.bf16.msra.mxu1 %v2934_v27 }
0x3793   :  { %v2907_v33 = vpop.f32.mrb[72].mxu1 }
0x3794   :  { %v3707_v45 = vpack.i.bf16 %v2907_v33, %v4947_v16  ;;  %v3622_v26 = vpop.f32.mrb[73].mxu1 }
0x3795   :  { %v2910_v47 = vpop.f32.mrb[74].mxu1 }
0x3796   :  { %3708 = vrot.lane.b32.xlu1 %v3707_v45, %s3867_s7  ;;  %v3623_v41 = vpop.f32.mrb[75].mxu1 }
0x3808   :  { %v3709_v18 = vpop.permute.xlu1 %3708 }
0x3809   :  { %v3711_v8 = vunpack.i.h.bf16 %v3709_v18  ;;  %v3710_v6 = vunpack.i.l.bf16 %v3709_v18 }
0x380b   :  { %v2921_v10 = vsel %vm214_vm5, %v3710_v6, %v3711_v8 }
0x380c   :  { %v2930_v28 = vpack.c.bf16 %v2921_v10, %v2921_v10 }
0x380e   :  { %3633 = vmatmul.mubr.msk.bf16.vlgmr.msra.gmra.mrb[76].mxu1 %vm812_vm4, %v2930_v28 }
0x38e1   :  { %v2979_v17 = vpop.f32.mrb[76].mxu1 }
0x38e2   :  { %v2980_v16 = vadd.f32 %v3172_v12, %v2979_v17  ;;  %v3634_v24 = vpop.f32.mrb[77].mxu1 }
0x38e3   :  { %v2982_v25 = vpop.f32.mrb[78].mxu1 }
0x38e4   :  { %v3635_v19 = vpop.f32.mrb[79].mxu1  ;;  %v2986_v32 = vsel %vm2985_vm1, %v2980_v16, 0.0 }
0x38e5   :  { %2987 = vadd.xlane.f32.xlu0 %v2986_v32 }
0x3972   :  { %v2988_v14 = vpop.xlane.xlu0 %2987 }
0x3973   :  { %v2990_v7 = vmul.f32 0.03125, %v2988_v14 }
0x3975   :  { %v2991_v62 = vsub.f32 %v2980_v16, %v2990_v7 }
0x3977   :  { %v2992_v34 = vmul.f32 %v2991_v62, %v2991_v62 }
0x3979   :  { %v2993_v63 = vsel %vm2985_vm1, %v2992_v34, 0.0 }
0x397a   :  { %2994 = vadd.xlane.f32.xlu0 %v2993_v63 }
0x3a07   :  { %v2995_v55 = vpop.xlane.xlu0 %2994 }
0x3a08   :  { %v2996_v20 = vmul.f32 0.03125, %v2995_v55 }
0x3a0a   :  { %v2997_v1 = vadd.f32 1e-05, %v2996_v20 }
0x3a0c   :  { %3836 = vrsqrt.f32 %v2997_v1 }
0x3a16   :  { %v3837_v30 = vpop.eup %3836 }
0x3a17   :  { %v2999_v42 = vmul.f32 %v3837_v30, %v2991_v62 }
0x3a19   :  { %v3007_v5 = vmul.f32 %v3174_v31, %v2999_v42 }
0x3a1b   :  { %v3015_v4 = vadd.f32 %v3175_v48, %v3007_v5 }
0x3a1d   :  { %v3016_v39 = vmax.f32 %v3015_v4, 0.0 }
0x3a1f   :  { %v3021_v9 = vpack.c.bf16 %v3016_v39, %v3016_v39 }
0x3a21   :  { %3641 = vmatmul.mubr.msk.bf16.vlgmr.msra.gmra.mrb[64].mxu0 %vm214_vm5, %v3021_v9 }
0x3af4   :  { %v3068_v52 = vpop.f32.mrb[64].mxu0 }
0x3af5   :  { %v3069_v2 = vadd.f32 %v3176_v3, %v3068_v52  ;;  %v3642_v50 = vpop.f32.mrb[65].mxu0 }
0x3af6   :  { %v3071_v49 = vpop.f32.mrb[66].mxu0 }
0x3af7   :  { %v3643_v44 = vpop.f32.mrb[67].mxu0  ;;  %3075 = vst.msk [vmem:[#allocation2] sm:$0x7] %vm3074_vm12, %v3069_v2 }
0x3af8   :  { %3850 = shalt.err (!%p3847_p4)
}
0x3af9   :  { %s3851_s22 = scalar_lea.hbm %s5085_s23, 64 }
0x3afa   :  { %p3852_p5 = scmp.ne.s32.totalorder %s5085_s23, %s3851_s22  ;;  %p3855_p6 = scmp.lt.u32.totalorder %s3851_s22, %s5085_s23 }
0x3afc   :  { %p3857_p7 = pnand %p3855_p6, %p3852_p5 }
0x3afe   :  { %3860 = shalt.err (!%p3857_p7)
}
0x3aff   :  { %3085 = dma.vmem_to_hbm [thread:$0]  %s3083_s12, 64, %s5085_s23, [#allocation3]  }
0x3b00   :  { %3861 = dma.done.wait [#allocation3], 64  }
0x3b01   :  { %3862 = vsyncadd [#allocation3], 4294967232 }
0x3b02   :  { %3089 = vsyncpa [#allocation3], 1 }

</bundles_post_ra>
